<compile_context>
chip_gen: v6e
topology: v6e:2x2x1
jax: 0.10.0
libtpu: 0.0.40
codegen_flags: <defaults>
</compile_context>

<pallas_src>
import math
import functools

import jax
import jax.numpy as jnp
from jax.experimental import pallas as pl
from jax.experimental.pallas import tpu as pltpu


def _encoder_rope_block_kernel(
    x_ref,
    ln1w_ref, ln1b_ref,
    wqkv_ref, bqkv_ref, wo_ref, bo_ref,
    cos_ref, sin_ref, gmsa_ref,
    ln2w_ref, ln2b_ref, w1_ref, b1_ref, w2_ref, b2_ref, gmlp_ref,
    o_ref,
    q_sc, k_sc, v_sc,
    *, L, D, H, HD, TQ, LC, eps):
    """Grid step = (batch b, q-tile qi).

    Q/K/V scratch persistence requires qi to be the innermost, sequentially
    executed ("arbitrary") grid axis with b outer -- do not reorder the grid.
    """
    qi = pl.program_id(1)
    bf16 = jnp.bfloat16
    n_kc = L // LC                      # number of K/V chunks (static)

    def layernorm(h, w_ref_, b_ref_):
        mu = jnp.mean(h, axis=-1, keepdims=True)
        var = jnp.mean(jnp.square(h - mu), axis=-1, keepdims=True)
        return (h - mu) * jax.lax.rsqrt(var + eps) * w_ref_[0] + b_ref_[0]

    def rope(t3, cos, sin_signed):
        # t3: (heads, rows, HD).  rotate_half([x1, x2]) = [-x2, x1]; the sign
        # is pre-folded into sin_signed -> one half-roll + 2 muls + 1 add.
        rot = jnp.concatenate([t3[..., HD // 2:], t3[..., : HD // 2]], axis=-1)
        return t3 * cos[None] + rot * sin_signed[None]

    # ---- once per batch row: LN1 + fused QKV projection + RoPE -------------
    @pl.when(qi == 0)
    def _():
        hf = layernorm(x_ref[0], ln1w_ref, ln1b_ref)           # (L, D) f32
        qkv = jnp.dot(hf.astype(bf16), wqkv_ref[...],
                      preferred_element_type=jnp.float32) + bqkv_ref[0]
        qkv = qkv.reshape(L, 3 * H, HD).transpose(1, 0, 2)     # (3H, L, HD)
        qk = rope(qkv[: 2 * H], cos_ref[...], sin_ref[...])    # (2H, L, HD)
        q_sc[...] = qk[:H].astype(bf16)                        # (H, L, HD)
        for h in range(H):                                     # lane-dense K^T
            k_sc[h] = qk[H + h].T.astype(bf16)                 # (HD, L)
        v_sc[...] = qkv[2 * H:].astype(bf16)                   # (H, L, HD)

    # ---- per q-tile: attention over cached K/V -----------------------------
    row0 = pl.multiple_of(qi * TQ, TQ)
    x_t = x_ref[0, pl.ds(row0, TQ), :]                         # (TQ, D) f32
    q3 = q_sc[:, pl.ds(row0, TQ), :]                           # (H, TQ, HD) bf16

    if n_kc == 1:
        s = jnp.einsum('hqc,hck->hqk', q3, k_sc[...],
                       preferred_element_type=jnp.float32)     # (H, TQ, L)
        s = s - jnp.max(s, axis=-1, keepdims=True)
        p = jnp.exp(s)
        p = p * pl.reciprocal(jnp.sum(p, axis=-1, keepdims=True), approx=True)
        o3 = jnp.einsum('hqk,hkc->hqc', p.astype(bf16), v_sc[...],
                        preferred_element_type=jnp.float32)    # (H, TQ, HD)
    else:
        # Online softmax over LC-wide K/V chunks bounds the (H, TQ, L) temps.
        def body(c, carry):
            m, l, acc = carry
            off = pl.multiple_of(c * LC, LC)
            kc = k_sc[:, :, pl.ds(off, LC)]                    # (H, HD, LC)
            vc = v_sc[:, pl.ds(off, LC), :]                    # (H, LC, HD)
            s = jnp.einsum('hqc,hck->hqk', q3, kc,
                           preferred_element_type=jnp.float32)
            m_new = jnp.maximum(m, jnp.max(s, axis=-1, keepdims=True))
            alpha = jnp.exp(m - m_new)
            p = jnp.exp(s - m_new)
            l = alpha * l + jnp.sum(p, axis=-1, keepdims=True)
            acc = alpha * acc + jnp.einsum(
                'hqk,hkc->hqc', p.astype(bf16), vc,
                preferred_element_type=jnp.float32)
            return m_new, l, acc

        init = (jnp.full((H, TQ, 1), -jnp.inf, jnp.float32),
                jnp.zeros((H, TQ, 1), jnp.float32),
                jnp.zeros((H, TQ, HD), jnp.float32))
        _, l_fin, acc = jax.lax.fori_loop(0, n_kc, body, init, unroll=True)
        o3 = acc * pl.reciprocal(l_fin, approx=True)

    # Head merge folded into the MXU: attn = sum_h o3[h] @ wo[h]  (no XLU
    # transpose + reshape copy of the attention output).
    o3b = o3.astype(bf16)
    attn = jnp.zeros((TQ, D), jnp.float32)
    for h in range(H):
        attn = attn + jnp.dot(o3b[h], wo_ref[h],
                              preferred_element_type=jnp.float32)
    attn = attn + bo_ref[0]

    x1 = x_t + gmsa_ref[0] * attn

    # ---- MLP: LN2 -> Linear -> GELU(tanh) -> Linear -------------------------
    h2 = layernorm(x1, ln2w_ref, ln2b_ref)
    m1 = jnp.dot(h2.astype(bf16), w1_ref[...],
                 preferred_element_type=jnp.float32) + b1_ref[0]
    cg = math.sqrt(2.0 / math.pi)
    m1 = 0.5 * m1 * (1.0 + jnp.tanh(cg * (m1 + 0.044715 * m1 * m1 * m1)))
    m2 = jnp.dot(m1.astype(bf16), w2_ref[...],
                 preferred_element_type=jnp.float32) + b2_ref[0]

    o_ref[0] = (x1 + gmlp_ref[0] * m2).astype(o_ref.dtype)


def make_rope_tables(L, head_dim, base=10000.0):
    inv_freq = 1.0 / (base ** (jnp.arange(0, head_dim, 2, dtype=jnp.float32) / head_dim))
    t = jnp.arange(L, dtype=jnp.float32)
    freqs = jnp.einsum("i,j->ij", t, inv_freq)          # (L, head_dim // 2)
    emb = jnp.concatenate([freqs, freqs], axis=-1)      # (L, head_dim)
    return jnp.cos(emb), jnp.sin(emb)


def _pick_q_tile(L, phys_vmem_bytes):
    # Bigger q-tiles amortise the ~0.35 us/step grid overhead; smaller tiles
    # keep the (H, TQ, L) score temps + scratch inside 64-MiB parts (v7x).
    if phys_vmem_bytes >= 96 * 2 ** 20:
        candidates = (512, 256, 128)    # v5e / v6e: 128 MiB VMEM
    else:
        candidates = (128, 256)         # v7x: 64 MiB per TensorCore
    for t in candidates:
        if L % t == 0:
            return t
    return L                            # small / odd L: single full-block tile


def encoder_rope_block(x, params, num_heads):
    B, L, D = x.shape
    H = num_heads
    assert D % H == 0
    HD = D // H
    Dm = params["w1_t"].shape[1]

    try:
        phys_vmem = int(pltpu.get_tpu_info().vmem_capacity_bytes)
    except Exception:
        phys_vmem = 64 * 2 ** 20        # conservative: valid on every generation
    vmem_limit = max(32 * 2 ** 20, int(phys_vmem * 0.82))

    TQ = _pick_q_tile(L, phys_vmem)
    NQ = L // TQ
    LC = 512 if (L > 512 and L % 512 == 0) else L   # K/V chunk for online softmax

    cos, sin = make_rope_tables(L, HD)
    sign = jnp.concatenate([-jnp.ones((HD // 2,), jnp.float32),
                            jnp.ones((HD // 2,), jnp.float32)])
    sin_s = sin * sign                               # sign-folded sin table

    bf16 = jnp.bfloat16
    scale = 1.0 / math.sqrt(HD)
    # Fused QKV weight (in, 3*out); the query scale is folded into the Q
    # columns (it distributes through RoPE exactly).  PyTorch weights are
    # (out, in); params already hold the (in, out) transpose.
    wqkv = jnp.concatenate([params["wq_t"] * scale, params["wk_t"],
                            params["wv_t"]], axis=1).astype(bf16)    # (D, 3D)
    bqkv = jnp.concatenate([params["bq"] * scale, params["bk"],
                            params["bv"]], axis=1)                   # (1, 3D)
    wo_r = params["wo_t"].reshape(H, HD, D).astype(bf16)             # (H, HD, D)
    w1 = params["w1_t"].astype(bf16)
    w2 = params["w2_t"].astype(bf16)

    operands = (
        x,
        params["ln1_w"], params["ln1_b"],
        wqkv, bqkv, wo_r, params["bo"],
        cos, sin_s, params["gate_msa"],
        params["ln2_w"], params["ln2_b"],
        w1, params["b1"], w2, params["b2"], params["gate_mlp"],
    )

    def build_in_specs(single_buffer_invariants):
        mode = None
        if single_buffer_invariants:
            try:
                mode = pl.Buffered(buffer_count=1)
            except Exception:
                mode = None

        def inv(a):
            index_map = lambda b, qi: (0,) * a.ndim
            if mode is None:
                return pl.BlockSpec(a.shape, index_map)
            return pl.BlockSpec(a.shape, index_map, pipeline_mode=mode)

        return [
            pl.BlockSpec((1, L, D), lambda b, qi: (b, 0, 0)),  # x, full row per b
            inv(params["ln1_w"]), inv(params["ln1_b"]),
            inv(wqkv), inv(bqkv), inv(wo_r), inv(params["bo"]),
            inv(cos), inv(sin_s), inv(params["gate_msa"]),
            inv(params["ln2_w"]), inv(params["ln2_b"]),
            inv(w1), inv(params["b1"]), inv(w2), inv(params["b2"]),
            inv(params["gate_mlp"]),
        ]

    # NOTE: with HD < 128 the (H, L, HD) Q/V scratch is lane padded to 128;
    # the generation-aware vmem_limit above leaves headroom for that.
    scratch_shapes = [
        pltpu.VMEM((H, L, HD), bf16),    # RoPE'd, pre-scaled Q
        pltpu.VMEM((H, HD, L), bf16),    # RoPE'd K transposed (lane dim = L)
        pltpu.VMEM((H, L, HD), bf16),    # V
    ]

    weight_bytes = 2 * (4 * D * D + 2 * D * Dm)      # bf16 weights
    flops = B * (8 * L * D * D + 4 * L * D * Dm + 4 * L * L * D)
    transcendentals = B * (H * L * L + L * Dm)
    bytes_accessed = (4 * B * L * D                  # x read once
                      + 4 * B * L * D                # output
                      + weight_bytes
                      + 4 * (2 * L * HD + 10 * D + 2 * Dm))  # tables/biases/ln/gates
    cost = pl.CostEstimate(flops=int(flops),
                           transcendentals=int(transcendentals),
                           bytes_accessed=int(bytes_accessed))

    kernel = functools.partial(
        _encoder_rope_block_kernel,
        L=L, D=D, H=H, HD=HD, TQ=TQ, LC=LC, eps=1e-6)

    def call(single_buffer_invariants):
        return pl.pallas_call(
            kernel,
            out_shape=jax.ShapeDtypeStruct((B, L, D), jnp.float32),
            grid_spec=pltpu.PrefetchScalarGridSpec(
                num_scalar_prefetch=0,
                grid=(B, NQ),
                in_specs=build_in_specs(single_buffer_invariants),
                out_specs=pl.BlockSpec((1, TQ, D), lambda b, qi: (b, qi, 0)),
                scratch_shapes=scratch_shapes),
            compiler_params=pltpu.CompilerParams(
                dimension_semantics=("parallel", "arbitrary"),
                vmem_limit_bytes=vmem_limit),
            cost_estimate=cost,
        )(*operands)

    try:
        return call(True)
    except Exception:
        # pipeline_mode=pl.Buffered(1) not supported by this jax build; fall
        # back to default (double-buffered) grid-invariant inputs.
        return call(False)


# ---------------------------------------------------------------------------
# Pure-JAX reference (mirrors the PyTorch forward) for correctness checking.
# ---------------------------------------------------------------------------
def ref_forward(x, params, num_heads):
    B, L, D = x.shape
    H = num_heads
    HD = D // H
    cos, sin = make_rope_tables(L, HD)

    def ln(h, w, b):
        mu = jnp.mean(h, axis=-1, keepdims=True)
        var = jnp.mean(jnp.square(h - mu), axis=-1, keepdims=True)
        return (h - mu) * jax.lax.rsqrt(var + 1e-6) * w + b

    def rope(t):  # t: (B, H, L, HD)
        t1, t2 = t[..., : HD // 2], t[..., HD // 2:]
        rot = jnp.concatenate([-t2, t1], axis=-1)
        return t * cos + rot * sin

    h = ln(x, params["ln1_w"][0], params["ln1_b"][0])
    q = h @ params["wq_t"] + params["bq"][0]
    k = h @ params["wk_t"] + params["bk"][0]
    v = h @ params["wv_t"] + params["bv"][0]
    q = q.reshape(B, L, H, HD).transpose(0, 2, 1, 3)
    k = k.reshape(B, L, H, HD).transpose(0, 2, 1, 3)
    v = v.reshape(B, L, H, HD).transpose(0, 2, 1, 3)
    q, k = rope(q), rope(k)
    s = jnp.einsum("bhic,bhjc->bhij", q, k) / math.sqrt(HD)
    a = jax.nn.softmax(s, axis=-1)
    o = jnp.einsum("bhij,bhjc->bhic", a, v)
    o = o.transpose(0, 2, 1, 3).reshape(B, L, D)
    o = o @ params["wo_t"] + params["bo"][0]
    x1 = x + params["gate_msa"][0] * o

    h2 = ln(x1, params["ln2_w"][0], params["ln2_b"][0])
    m = h2 @ params["w1_t"] + params["b1"][0]
    c = math.sqrt(2.0 / math.pi)
    m = 0.5 * m * (1.0 + jnp.tanh(c * (m + 0.044715 * m * m * m)))
    m = m @ params["w2_t"] + params["b2"][0]
    return x1 + params["gate_mlp"][0] * m


def init_params(key, hidden, mlp_ratio=4.0):
    Dm = int(hidden * mlp_ratio)
    ks = jax.random.split(key, 16)

    def lin(kw, kb, din, dout):
        # PyTorch weight shape is (out, in); store transposed (in, out).
        w = (jax.random.normal(kw, (dout, din), jnp.float32) * 0.05).T
        b = jax.random.normal(kb, (1, dout), jnp.float32) * 0.05
        return w, b

    p = {}
    p["wq_t"], p["bq"] = lin(ks[0], ks[1], hidden, hidden)
    p["wk_t"], p["bk"] = lin(ks[2], ks[3], hidden, hidden)
    p["wv_t"], p["bv"] = lin(ks[4], ks[5], hidden, hidden)
    p["wo_t"], p["bo"] = lin(ks[6], ks[7], hidden, hidden)
    p["w1_t"], p["b1"] = lin(ks[8], ks[9], hidden, Dm)
    p["w2_t"], p["b2"] = lin(ks[10], ks[11], Dm, hidden)
    p["ln1_w"] = 1.0 + 0.1 * jax.random.normal(ks[12], (1, hidden), jnp.float32)
    p["ln1_b"] = 0.1 * jax.random.normal(ks[13], (1, hidden), jnp.float32)
    p["ln2_w"] = 1.0 + 0.1 * jax.random.normal(ks[14], (1, hidden), jnp.float32)
    p["ln2_b"] = 0.1 * jax.random.normal(ks[15], (1, hidden), jnp.float32)
    # Module inits the gates to zero (-> identity block); use nonzero values so
    # the kernel's compute path is actually exercised.
    p["gate_msa"] = jnp.full((1, hidden), 0.5, jnp.float32)
    p["gate_mlp"] = jnp.full((1, hidden), 0.5, jnp.float32)
    return p


def _run_case(B, L, hidden, num_heads, seed, tol):
    key = jax.random.PRNGKey(seed)
    kx, kp = jax.random.split(key)
    x = jax.random.normal(kx, (B, L, hidden), jnp.float32)
    params = init_params(kp, hidden, mlp_ratio=4.0)

    out = jax.block_until_ready(encoder_rope_block(x, params, num_heads))
    ref = jax.block_until_ready(ref_forward(x, params, num_heads))
    assert out.shape == (B, L, hidden)
    err = float(jnp.max(jnp.abs(out - ref)))
    ok = bool(jnp.allclose(out, ref, atol=tol, rtol=tol))
    assert ok, f"mismatch vs reference (max abs err {err})"


if __name__ == "__main__":
    # Small shape from the module spec (single q-tile, single K/V chunk).
    _run_case(B=2, L=8, hidden=32, num_heads=4, seed=0, tol=3e-2)
    # Sequence-tiled path with persistent Q/K/V scratch reuse across q-tiles.
    _run_case(B=2, L=256, hidden=128, num_heads=4, seed=1, tol=3e-2)
    # Long-sequence path: multiple q-tiles AND the online-softmax K/V chunking.
    _run_case(B=2, L=1024, hidden=128, num_heads=4, seed=2, tol=5e-2)
    print("KERNEL_OK")
</pallas_src>

<mosaic_0001>
module attributes {stable_mosaic.version = 11 : i64} {
  func.func @_encoder_rope_block_kernel(%arg0: i32, %arg1: i32, %arg2: memref<1x8x32xf32, #tpu.memory_space<vmem>>, %arg3: memref<1x32xf32, #tpu.memory_space<vmem>>, %arg4: memref<1x32xf32, #tpu.memory_space<vmem>>, %arg5: memref<32x96xbf16, #tpu.memory_space<vmem>>, %arg6: memref<1x96xf32, #tpu.memory_space<vmem>>, %arg7: memref<4x8x32xbf16, #tpu.memory_space<vmem>>, %arg8: memref<1x32xf32, #tpu.memory_space<vmem>>, %arg9: memref<8x8xf32, #tpu.memory_space<vmem>>, %arg10: memref<8x8xf32, #tpu.memory_space<vmem>>, %arg11: memref<1x32xf32, #tpu.memory_space<vmem>>, %arg12: memref<1x32xf32, #tpu.memory_space<vmem>>, %arg13: memref<1x32xf32, #tpu.memory_space<vmem>>, %arg14: memref<32x128xbf16, #tpu.memory_space<vmem>>, %arg15: memref<1x128xf32, #tpu.memory_space<vmem>>, %arg16: memref<128x32xbf16, #tpu.memory_space<vmem>>, %arg17: memref<1x32xf32, #tpu.memory_space<vmem>>, %arg18: memref<1x32xf32, #tpu.memory_space<vmem>>, %arg19: memref<1x8x32xf32, #tpu.memory_space<vmem>>, %arg20: memref<4x8x8xbf16, #tpu.memory_space<vmem>>, %arg21: memref<4x8x8xbf16, #tpu.memory_space<vmem>>, %arg22: memref<4x8x8xbf16, #tpu.memory_space<vmem>>) attributes {dimension_semantics = [#tpu.dimension_semantics<parallel>, #tpu.dimension_semantics<arbitrary>], iteration_bounds = array<i64: 2, 1>, scalar_prefetch = 0 : i64, scratch_operands = 3 : i64, tpu.core_type = #tpu.core_type<tc>, window_params = [{transform_indices = @transform_0, window_bounds = array<i64: 1, 8, 32>}, {pipeline_mode = #tpu.pipeline_mode<synchronous>, transform_indices = @transform_1, window_bounds = array<i64: 1, 32>}, {pipeline_mode = #tpu.pipeline_mode<synchronous>, transform_indices = @transform_2, window_bounds = array<i64: 1, 32>}, {pipeline_mode = #tpu.pipeline_mode<synchronous>, transform_indices = @transform_3, window_bounds = array<i64: 32, 96>}, {pipeline_mode = #tpu.pipeline_mode<synchronous>, transform_indices = @transform_4, window_bounds = array<i64: 1, 96>}, {pipeline_mode = #tpu.pipeline_mode<synchronous>, transform_indices = @transform_5, window_bounds = array<i64: 4, 8, 32>}, {pipeline_mode = #tpu.pipeline_mode<synchronous>, transform_indices = @transform_6, window_bounds = array<i64: 1, 32>}, {pipeline_mode = #tpu.pipeline_mode<synchronous>, transform_indices = @transform_7, window_bounds = array<i64: 8, 8>}, {pipeline_mode = #tpu.pipeline_mode<synchronous>, transform_indices = @transform_8, window_bounds = array<i64: 8, 8>}, {pipeline_mode = #tpu.pipeline_mode<synchronous>, transform_indices = @transform_9, window_bounds = array<i64: 1, 32>}, {pipeline_mode = #tpu.pipeline_mode<synchronous>, transform_indices = @transform_10, window_bounds = array<i64: 1, 32>}, {pipeline_mode = #tpu.pipeline_mode<synchronous>, transform_indices = @transform_11, window_bounds = array<i64: 1, 32>}, {pipeline_mode = #tpu.pipeline_mode<synchronous>, transform_indices = @transform_12, window_bounds = array<i64: 32, 128>}, {pipeline_mode = #tpu.pipeline_mode<synchronous>, transform_indices = @transform_13, window_bounds = array<i64: 1, 128>}, {pipeline_mode = #tpu.pipeline_mode<synchronous>, transform_indices = @transform_14, window_bounds = array<i64: 128, 32>}, {pipeline_mode = #tpu.pipeline_mode<synchronous>, transform_indices = @transform_15, window_bounds = array<i64: 1, 32>}, {pipeline_mode = #tpu.pipeline_mode<synchronous>, transform_indices = @transform_16, window_bounds = array<i64: 1, 32>}, {transform_indices = @transform_17, window_bounds = array<i64: 1, 8, 32>}]} {
    %c0_i32 = arith.constant 0 : i32
    %0 = arith.cmpi eq, %arg1, %c0_i32 : i32
    %1 = arith.extui %0 : i1 to i32
    %c0_i32_0 = arith.constant 0 : i32
    %2 = arith.cmpi ne, %1, %c0_i32_0 : i32
    scf.if %2 {
      %c0_59 = arith.constant 0 : index
      %c0_60 = arith.constant 0 : index
      %c0_61 = arith.constant 0 : index
      %128 = vector.load %arg2[%c0_59, %c0_60, %c0_61] : memref<1x8x32xf32, #tpu.memory_space<vmem>>, vector<1x8x32xf32>
      %129 = vector.shape_cast %128 : vector<1x8x32xf32> to vector<8x32xf32>
      %cst_62 = arith.constant dense<0.000000e+00> : vector<8xf32>
      %130 = vector.multi_reduction <add>, %129, %cst_62 [1] : vector<8x32xf32> to vector<8xf32>
      %131 = vector.shape_cast %130 : vector<8xf32> to vector<8x1xf32>
      %cst_63 = arith.constant 3.200000e+01 : f32
      %132 = vector.broadcast %cst_63 : f32 to vector<8x1xf32>
      %133 = arith.divf %131, %132 : vector<8x1xf32>
      %134 = vector.broadcast %133 : vector<8x1xf32> to vector<8x32xf32>
      %135 = arith.subf %129, %134 : vector<8x32xf32>
      %136 = arith.mulf %135, %135 : vector<8x32xf32>
      %cst_64 = arith.constant dense<0.000000e+00> : vector<8xf32>
      %137 = vector.multi_reduction <add>, %136, %cst_64 [1] : vector<8x32xf32> to vector<8xf32>
      %138 = vector.shape_cast %137 : vector<8xf32> to vector<8x1xf32>
      %cst_65 = arith.constant 3.200000e+01 : f32
      %139 = vector.broadcast %cst_65 : f32 to vector<8x1xf32>
      %140 = arith.divf %138, %139 : vector<8x1xf32>
      %141 = vector.broadcast %133 : vector<8x1xf32> to vector<8x32xf32>
      %142 = arith.subf %129, %141 : vector<8x32xf32>
      %cst_66 = arith.constant 9.99999997E-7 : f32
      %143 = vector.broadcast %cst_66 : f32 to vector<8x1xf32>
      %144 = arith.addf %140, %143 : vector<8x1xf32>
      %145 = math.rsqrt %144 : vector<8x1xf32>
      %146 = vector.broadcast %145 : vector<8x1xf32> to vector<8x32xf32>
      %147 = arith.mulf %142, %146 : vector<8x32xf32>
      %c0_67 = arith.constant 0 : index
      %c0_68 = arith.constant 0 : index
      %148 = vector.load %arg3[%c0_67, %c0_68] : memref<1x32xf32, #tpu.memory_space<vmem>>, vector<1x32xf32>
      %149 = vector.shape_cast %148 : vector<1x32xf32> to vector<32xf32>
      %150 = vector.shape_cast %149 : vector<32xf32> to vector<1x32xf32>
      %151 = vector.broadcast %150 : vector<1x32xf32> to vector<8x32xf32>
      %152 = arith.mulf %147, %151 : vector<8x32xf32>
      %c0_69 = arith.constant 0 : index
      %c0_70 = arith.constant 0 : index
      %153 = vector.load %arg4[%c0_69, %c0_70] : memref<1x32xf32, #tpu.memory_space<vmem>>, vector<1x32xf32>
      %154 = vector.shape_cast %153 : vector<1x32xf32> to vector<32xf32>
      %155 = vector.shape_cast %154 : vector<32xf32> to vector<1x32xf32>
      %156 = vector.broadcast %155 : vector<1x32xf32> to vector<8x32xf32>
      %157 = arith.addf %152, %156 : vector<8x32xf32>
      %158 = arith.truncf %157 : vector<8x32xf32> to vector<8x32xbf16>
      %c0_71 = arith.constant 0 : index
      %c0_72 = arith.constant 0 : index
      %159 = vector.load %arg5[%c0_71, %c0_72] : memref<32x96xbf16, #tpu.memory_space<vmem>>, vector<32x96xbf16>
      %cst_73 = arith.constant dense<0.000000e+00> : vector<8x96xf32>
      %160 = tpu.matmul %158, %159, %cst_73 {dimension_numbers = #tpu.dot_dimension_numbers<[1], [0], [0], [1], [0, 0, 1, 1], [], []>} : vector<8x32xbf16>, vector<32x96xbf16>, vector<8x96xf32> -> vector<8x96xf32>
      %c0_74 = arith.constant 0 : index
      %c0_75 = arith.constant 0 : index
      %161 = vector.load %arg6[%c0_74, %c0_75] : memref<1x96xf32, #tpu.memory_space<vmem>>, vector<1x96xf32>
      %162 = vector.shape_cast %161 : vector<1x96xf32> to vector<96xf32>
      %163 = vector.shape_cast %162 : vector<96xf32> to vector<1x96xf32>
      %164 = vector.broadcast %163 : vector<1x96xf32> to vector<8x96xf32>
      %165 = arith.addf %160, %164 : vector<8x96xf32>
      %166 = vector.shape_cast %165 : vector<8x96xf32> to vector<8x12x8xf32>
      %167 = tpu.transpose %166, [1, 0, 2] : vector<8x12x8xf32> -> vector<12x8x8xf32>
      %168 = vector.extract_strided_slice %167 {offsets = [0, 0, 0], sizes = [8, 8, 8], strides = [1, 1, 1]} : vector<12x8x8xf32> to vector<8x8x8xf32>
      %c0_76 = arith.constant 0 : index
      %c0_77 = arith.constant 0 : index
      %169 = vector.load %arg9[%c0_76, %c0_77] : memref<8x8xf32, #tpu.memory_space<vmem>>, vector<8x8xf32>
      %c0_78 = arith.constant 0 : index
      %c0_79 = arith.constant 0 : index
      %170 = vector.load %arg10[%c0_78, %c0_79] : memref<8x8xf32, #tpu.memory_space<vmem>>, vector<8x8xf32>
      %171 = vector.extract_strided_slice %168 {offsets = [0, 0, 4], sizes = [8, 8, 4], strides = [1, 1, 1]} : vector<8x8x8xf32> to vector<8x8x4xf32>
      %172 = vector.extract_strided_slice %168 {offsets = [0, 0, 0], sizes = [8, 8, 4], strides = [1, 1, 1]} : vector<8x8x8xf32> to vector<8x8x4xf32>
      %173 = tpu.concatenate %171, %172 in 2 : vector<8x8x4xf32>, vector<8x8x4xf32> -> vector<8x8x8xf32>
      %174 = vector.shape_cast %169 : vector<8x8xf32> to vector<1x8x8xf32>
      %175 = vector.broadcast %174 : vector<1x8x8xf32> to vector<8x8x8xf32>
      %176 = arith.mulf %168, %175 : vector<8x8x8xf32>
      %177 = vector.shape_cast %170 : vector<8x8xf32> to vector<1x8x8xf32>
      %178 = vector.broadcast %177 : vector<1x8x8xf32> to vector<8x8x8xf32>
      %179 = arith.mulf %173, %178 : vector<8x8x8xf32>
      %180 = arith.addf %176, %179 : vector<8x8x8xf32>
      %181 = vector.extract_strided_slice %180 {offsets = [0, 0, 0], sizes = [4, 8, 8], strides = [1, 1, 1]} : vector<8x8x8xf32> to vector<4x8x8xf32>
      %182 = arith.truncf %181 : vector<4x8x8xf32> to vector<4x8x8xbf16>
      %c0_80 = arith.constant 0 : index
      %c0_81 = arith.constant 0 : index
      %c0_82 = arith.constant 0 : index
      %183 = vector.load %arg20[%c0_80, %c0_81, %c0_82] : memref<4x8x8xbf16, #tpu.memory_space<vmem>>, vector<4x8x8xbf16>
      tpu.vector_store %arg20[%c0_80, %c0_81, %c0_82], %182 {strides = array<i32>} : memref<4x8x8xbf16, #tpu.memory_space<vmem>>, vector<4x8x8xbf16>,
      %184 = vector.extract_strided_slice %180 {offsets = [4, 0, 0], sizes = [1, 8, 8], strides = [1, 1, 1]} : vector<8x8x8xf32> to vector<1x8x8xf32>
      %185 = vector.shape_cast %184 : vector<1x8x8xf32> to vector<8x8xf32>
      %186 = tpu.transpose %185, [1, 0] : vector<8x8xf32> -> vector<8x8xf32>
      %187 = arith.truncf %186 : vector<8x8xf32> to vector<8x8xbf16>
      %c0_83 = arith.constant 0 : index
      %c0_84 = arith.constant 0 : index
      %c0_85 = arith.constant 0 : index
      %188 = vector.load %arg21[%c0_83, %c0_84, %c0_85] : memref<4x8x8xbf16, #tpu.memory_space<vmem>>, vector<1x8x8xbf16>
      %189 = vector.shape_cast %188 : vector<1x8x8xbf16> to vector<8x8xbf16>
      %190 = vector.shape_cast %187 : vector<8x8xbf16> to vector<1x8x8xbf16>
      tpu.vector_store %arg21[%c0_83, %c0_84, %c0_85], %190 {strides = array<i32>} : memref<4x8x8xbf16, #tpu.memory_space<vmem>>, vector<1x8x8xbf16>,
      %191 = vector.extract_strided_slice %180 {offsets = [5, 0, 0], sizes = [1, 8, 8], strides = [1, 1, 1]} : vector<8x8x8xf32> to vector<1x8x8xf32>
      %192 = vector.shape_cast %191 : vector<1x8x8xf32> to vector<8x8xf32>
      %193 = tpu.transpose %192, [1, 0] : vector<8x8xf32> -> vector<8x8xf32>
      %194 = arith.truncf %193 : vector<8x8xf32> to vector<8x8xbf16>
      %c1_86 = arith.constant 1 : index
      %c0_87 = arith.constant 0 : index
      %c0_88 = arith.constant 0 : index
      %195 = vector.load %arg21[%c1_86, %c0_87, %c0_88] : memref<4x8x8xbf16, #tpu.memory_space<vmem>>, vector<1x8x8xbf16>
      %196 = vector.shape_cast %195 : vector<1x8x8xbf16> to vector<8x8xbf16>
      %197 = vector.shape_cast %194 : vector<8x8xbf16> to vector<1x8x8xbf16>
      tpu.vector_store %arg21[%c1_86, %c0_87, %c0_88], %197 {strides = array<i32>} : memref<4x8x8xbf16, #tpu.memory_space<vmem>>, vector<1x8x8xbf16>,
      %198 = vector.extract_strided_slice %180 {offsets = [6, 0, 0], sizes = [1, 8, 8], strides = [1, 1, 1]} : vector<8x8x8xf32> to vector<1x8x8xf32>
      %199 = vector.shape_cast %198 : vector<1x8x8xf32> to vector<8x8xf32>
      %200 = tpu.transpose %199, [1, 0] : vector<8x8xf32> -> vector<8x8xf32>
      %201 = arith.truncf %200 : vector<8x8xf32> to vector<8x8xbf16>
      %c2_89 = arith.constant 2 : index
      %c0_90 = arith.constant 0 : index
      %c0_91 = arith.constant 0 : index
      %202 = vector.load %arg21[%c2_89, %c0_90, %c0_91] : memref<4x8x8xbf16, #tpu.memory_space<vmem>>, vector<1x8x8xbf16>
      %203 = vector.shape_cast %202 : vector<1x8x8xbf16> to vector<8x8xbf16>
      %204 = vector.shape_cast %201 : vector<8x8xbf16> to vector<1x8x8xbf16>
      tpu.vector_store %arg21[%c2_89, %c0_90, %c0_91], %204 {strides = array<i32>} : memref<4x8x8xbf16, #tpu.memory_space<vmem>>, vector<1x8x8xbf16>,
      %205 = vector.extract_strided_slice %180 {offsets = [7, 0, 0], sizes = [1, 8, 8], strides = [1, 1, 1]} : vector<8x8x8xf32> to vector<1x8x8xf32>
      %206 = vector.shape_cast %205 : vector<1x8x8xf32> to vector<8x8xf32>
      %207 = tpu.transpose %206, [1, 0] : vector<8x8xf32> -> vector<8x8xf32>
      %208 = arith.truncf %207 : vector<8x8xf32> to vector<8x8xbf16>
      %c3_92 = arith.constant 3 : index
      %c0_93 = arith.constant 0 : index
      %c0_94 = arith.constant 0 : index
      %209 = vector.load %arg21[%c3_92, %c0_93, %c0_94] : memref<4x8x8xbf16, #tpu.memory_space<vmem>>, vector<1x8x8xbf16>
      %210 = vector.shape_cast %209 : vector<1x8x8xbf16> to vector<8x8xbf16>
      %211 = vector.shape_cast %208 : vector<8x8xbf16> to vector<1x8x8xbf16>
      tpu.vector_store %arg21[%c3_92, %c0_93, %c0_94], %211 {strides = array<i32>} : memref<4x8x8xbf16, #tpu.memory_space<vmem>>, vector<1x8x8xbf16>,
      %212 = vector.extract_strided_slice %167 {offsets = [8, 0, 0], sizes = [4, 8, 8], strides = [1, 1, 1]} : vector<12x8x8xf32> to vector<4x8x8xf32>
      %213 = arith.truncf %212 : vector<4x8x8xf32> to vector<4x8x8xbf16>
      %c0_95 = arith.constant 0 : index
      %c0_96 = arith.constant 0 : index
      %c0_97 = arith.constant 0 : index
      %214 = vector.load %arg22[%c0_95, %c0_96, %c0_97] : memref<4x8x8xbf16, #tpu.memory_space<vmem>>, vector<4x8x8xbf16>
      tpu.vector_store %arg22[%c0_95, %c0_96, %c0_97], %213 {strides = array<i32>} : memref<4x8x8xbf16, #tpu.memory_space<vmem>>, vector<4x8x8xbf16>,
    } else {
    }
    %c8_i32 = arith.constant 8 : i32
    %3 = arith.muli %arg1, %c8_i32 : i32
    %4 = tpu.assume_multiple %3, 8 : i32
    %c0 = arith.constant 0 : index
    %5 = arith.index_cast %4 : i32 to index
    %c0_1 = arith.constant 0 : index
    %6 = vector.load %arg2[%c0, %5, %c0_1] : memref<1x8x32xf32, #tpu.memory_space<vmem>>, vector<1x8x32xf32>
    %7 = vector.shape_cast %6 : vector<1x8x32xf32> to vector<8x32xf32>
    %c0_2 = arith.constant 0 : index
    %8 = arith.index_cast %4 : i32 to index
    %c0_3 = arith.constant 0 : index
    %9 = vector.load %arg20[%c0_2, %8, %c0_3] : memref<4x8x8xbf16, #tpu.memory_space<vmem>>, vector<4x8x8xbf16>
    %c0_4 = arith.constant 0 : index
    %c0_5 = arith.constant 0 : index
    %c0_6 = arith.constant 0 : index
    %10 = vector.load %arg21[%c0_4, %c0_5, %c0_6] : memref<4x8x8xbf16, #tpu.memory_space<vmem>>, vector<4x8x8xbf16>
    "tpu.trace_start"() <{level = 10 : i32, message = "hqc,hck->hqk"}> : () -> ()
    %cst = arith.constant dense<0.000000e+00> : vector<4x8x8xf32>
    %11 = tpu.matmul %9, %10, %cst {dimension_numbers = #tpu.dot_dimension_numbers<[2], [1], [1], [2], [0, 0, 0, 1, 1, 2], [0], [0]>} : vector<4x8x8xbf16>, vector<4x8x8xbf16>, vector<4x8x8xf32> -> vector<4x8x8xf32>
    "tpu.trace_stop"() : () -> ()
    %cst_7 = arith.constant dense<0xFF800000> : vector<4x8xf32>
    %12 = vector.multi_reduction <maximumf>, %11, %cst_7 [2] : vector<4x8x8xf32> to vector<4x8xf32>
    %13 = vector.shape_cast %12 : vector<4x8xf32> to vector<4x8x1xf32>
    %14 = vector.broadcast %13 : vector<4x8x1xf32> to vector<4x8x8xf32>
    %15 = arith.subf %11, %14 : vector<4x8x8xf32>
    %16 = math.exp %15 : vector<4x8x8xf32>
    %cst_8 = arith.constant dense<0.000000e+00> : vector<4x8xf32>
    %17 = vector.multi_reduction <add>, %16, %cst_8 [2] : vector<4x8x8xf32> to vector<4x8xf32>
    %18 = vector.shape_cast %17 : vector<4x8xf32> to vector<4x8x1xf32>
    %19 = tpu.reciprocal %18 {approx = true} : vector<4x8x1xf32> -> vector<4x8x1xf32>
    %20 = vector.broadcast %19 : vector<4x8x1xf32> to vector<4x8x8xf32>
    %21 = arith.mulf %16, %20 : vector<4x8x8xf32>
    %22 = arith.truncf %21 : vector<4x8x8xf32> to vector<4x8x8xbf16>
    %c0_9 = arith.constant 0 : index
    %c0_10 = arith.constant 0 : index
    %c0_11 = arith.constant 0 : index
    %23 = vector.load %arg22[%c0_9, %c0_10, %c0_11] : memref<4x8x8xbf16, #tpu.memory_space<vmem>>, vector<4x8x8xbf16>
    "tpu.trace_start"() <{level = 10 : i32, message = "hqk,hkc->hqc"}> : () -> ()
    %cst_12 = arith.constant dense<0.000000e+00> : vector<4x8x8xf32>
    %24 = tpu.matmul %22, %23, %cst_12 {dimension_numbers = #tpu.dot_dimension_numbers<[2], [1], [1], [2], [0, 0, 0, 1, 1, 2], [0], [0]>} : vector<4x8x8xbf16>, vector<4x8x8xbf16>, vector<4x8x8xf32> -> vector<4x8x8xf32>
    "tpu.trace_stop"() : () -> ()
    %25 = arith.truncf %24 : vector<4x8x8xf32> to vector<4x8x8xbf16>
    %cst_13 = arith.constant 0.000000e+00 : f32
    %26 = vector.broadcast %cst_13 : f32 to vector<8x32xf32>
    %27 = vector.extract_strided_slice %25 {offsets = [0, 0, 0], sizes = [1, 8, 8], strides = [1, 1, 1]} : vector<4x8x8xbf16> to vector<1x8x8xbf16>
    %28 = vector.shape_cast %27 : vector<1x8x8xbf16> to vector<8x8xbf16>
    %c0_14 = arith.constant 0 : index
    %c0_15 = arith.constant 0 : index
    %c0_16 = arith.constant 0 : index
    %29 = vector.load %arg7[%c0_14, %c0_15, %c0_16] : memref<4x8x32xbf16, #tpu.memory_space<vmem>>, vector<1x8x32xbf16>
    %30 = vector.shape_cast %29 : vector<1x8x32xbf16> to vector<8x32xbf16>
    %cst_17 = arith.constant dense<0.000000e+00> : vector<8x32xf32>
    %31 = tpu.matmul %28, %30, %cst_17 {dimension_numbers = #tpu.dot_dimension_numbers<[1], [0], [0], [1], [0, 0, 1, 1], [], []>} : vector<8x8xbf16>, vector<8x32xbf16>, vector<8x32xf32> -> vector<8x32xf32>
    %32 = arith.addf %26, %31 : vector<8x32xf32>
    %33 = vector.extract_strided_slice %25 {offsets = [1, 0, 0], sizes = [1, 8, 8], strides = [1, 1, 1]} : vector<4x8x8xbf16> to vector<1x8x8xbf16>
    %34 = vector.shape_cast %33 : vector<1x8x8xbf16> to vector<8x8xbf16>
    %c1 = arith.constant 1 : index
    %c0_18 = arith.constant 0 : index
    %c0_19 = arith.constant 0 : index
    %35 = vector.load %arg7[%c1, %c0_18, %c0_19] : memref<4x8x32xbf16, #tpu.memory_space<vmem>>, vector<1x8x32xbf16>
    %36 = vector.shape_cast %35 : vector<1x8x32xbf16> to vector<8x32xbf16>
    %cst_20 = arith.constant dense<0.000000e+00> : vector<8x32xf32>
    %37 = tpu.matmul %34, %36, %cst_20 {dimension_numbers = #tpu.dot_dimension_numbers<[1], [0], [0], [1], [0, 0, 1, 1], [], []>} : vector<8x8xbf16>, vector<8x32xbf16>, vector<8x32xf32> -> vector<8x32xf32>
    %38 = arith.addf %32, %37 : vector<8x32xf32>
    %39 = vector.extract_strided_slice %25 {offsets = [2, 0, 0], sizes = [1, 8, 8], strides = [1, 1, 1]} : vector<4x8x8xbf16> to vector<1x8x8xbf16>
    %40 = vector.shape_cast %39 : vector<1x8x8xbf16> to vector<8x8xbf16>
    %c2 = arith.constant 2 : index
    %c0_21 = arith.constant 0 : index
    %c0_22 = arith.constant 0 : index
    %41 = vector.load %arg7[%c2, %c0_21, %c0_22] : memref<4x8x32xbf16, #tpu.memory_space<vmem>>, vector<1x8x32xbf16>
    %42 = vector.shape_cast %41 : vector<1x8x32xbf16> to vector<8x32xbf16>
    %cst_23 = arith.constant dense<0.000000e+00> : vector<8x32xf32>
    %43 = tpu.matmul %40, %42, %cst_23 {dimension_numbers = #tpu.dot_dimension_numbers<[1], [0], [0], [1], [0, 0, 1, 1], [], []>} : vector<8x8xbf16>, vector<8x32xbf16>, vector<8x32xf32> -> vector<8x32xf32>
    %44 = arith.addf %38, %43 : vector<8x32xf32>
    %45 = vector.extract_strided_slice %25 {offsets = [3, 0, 0], sizes = [1, 8, 8], strides = [1, 1, 1]} : vector<4x8x8xbf16> to vector<1x8x8xbf16>
    %46 = vector.shape_cast %45 : vector<1x8x8xbf16> to vector<8x8xbf16>
    %c3 = arith.constant 3 : index
    %c0_24 = arith.constant 0 : index
    %c0_25 = arith.constant 0 : index
    %47 = vector.load %arg7[%c3, %c0_24, %c0_25] : memref<4x8x32xbf16, #tpu.memory_space<vmem>>, vector<1x8x32xbf16>
    %48 = vector.shape_cast %47 : vector<1x8x32xbf16> to vector<8x32xbf16>
    %cst_26 = arith.constant dense<0.000000e+00> : vector<8x32xf32>
    %49 = tpu.matmul %46, %48, %cst_26 {dimension_numbers = #tpu.dot_dimension_numbers<[1], [0], [0], [1], [0, 0, 1, 1], [], []>} : vector<8x8xbf16>, vector<8x32xbf16>, vector<8x32xf32> -> vector<8x32xf32>
    %50 = arith.addf %44, %49 : vector<8x32xf32>
    %c0_27 = arith.constant 0 : index
    %c0_28 = arith.constant 0 : index
    %51 = vector.load %arg8[%c0_27, %c0_28] : memref<1x32xf32, #tpu.memory_space<vmem>>, vector<1x32xf32>
    %52 = vector.shape_cast %51 : vector<1x32xf32> to vector<32xf32>
    %53 = vector.shape_cast %52 : vector<32xf32> to vector<1x32xf32>
    %54 = vector.broadcast %53 : vector<1x32xf32> to vector<8x32xf32>
    %55 = arith.addf %50, %54 : vector<8x32xf32>
    %c0_29 = arith.constant 0 : index
    %c0_30 = arith.constant 0 : index
    %56 = vector.load %arg11[%c0_29, %c0_30] : memref<1x32xf32, #tpu.memory_space<vmem>>, vector<1x32xf32>
    %57 = vector.shape_cast %56 : vector<1x32xf32> to vector<32xf32>
    %58 = vector.shape_cast %57 : vector<32xf32> to vector<1x32xf32>
    %59 = vector.broadcast %58 : vector<1x32xf32> to vector<8x32xf32>
    %60 = arith.mulf %59, %55 : vector<8x32xf32>
    %61 = arith.addf %7, %60 : vector<8x32xf32>
    %cst_31 = arith.constant dense<0.000000e+00> : vector<8xf32>
    %62 = vector.multi_reduction <add>, %61, %cst_31 [1] : vector<8x32xf32> to vector<8xf32>
    %63 = vector.shape_cast %62 : vector<8xf32> to vector<8x1xf32>
    %cst_32 = arith.constant 3.200000e+01 : f32
    %64 = vector.broadcast %cst_32 : f32 to vector<8x1xf32>
    %65 = arith.divf %63, %64 : vector<8x1xf32>
    %66 = vector.broadcast %65 : vector<8x1xf32> to vector<8x32xf32>
    %67 = arith.subf %61, %66 : vector<8x32xf32>
    %68 = arith.mulf %67, %67 : vector<8x32xf32>
    %cst_33 = arith.constant dense<0.000000e+00> : vector<8xf32>
    %69 = vector.multi_reduction <add>, %68, %cst_33 [1] : vector<8x32xf32> to vector<8xf32>
    %70 = vector.shape_cast %69 : vector<8xf32> to vector<8x1xf32>
    %cst_34 = arith.constant 3.200000e+01 : f32
    %71 = vector.broadcast %cst_34 : f32 to vector<8x1xf32>
    %72 = arith.divf %70, %71 : vector<8x1xf32>
    %73 = vector.broadcast %65 : vector<8x1xf32> to vector<8x32xf32>
    %74 = arith.subf %61, %73 : vector<8x32xf32>
    %cst_35 = arith.constant 9.99999997E-7 : f32
    %75 = vector.broadcast %cst_35 : f32 to vector<8x1xf32>
    %76 = arith.addf %72, %75 : vector<8x1xf32>
    %77 = math.rsqrt %76 : vector<8x1xf32>
    %78 = vector.broadcast %77 : vector<8x1xf32> to vector<8x32xf32>
    %79 = arith.mulf %74, %78 : vector<8x32xf32>
    %c0_36 = arith.constant 0 : index
    %c0_37 = arith.constant 0 : index
    %80 = vector.load %arg12[%c0_36, %c0_37] : memref<1x32xf32, #tpu.memory_space<vmem>>, vector<1x32xf32>
    %81 = vector.shape_cast %80 : vector<1x32xf32> to vector<32xf32>
    %82 = vector.shape_cast %81 : vector<32xf32> to vector<1x32xf32>
    %83 = vector.broadcast %82 : vector<1x32xf32> to vector<8x32xf32>
    %84 = arith.mulf %79, %83 : vector<8x32xf32>
    %c0_38 = arith.constant 0 : index
    %c0_39 = arith.constant 0 : index
    %85 = vector.load %arg13[%c0_38, %c0_39] : memref<1x32xf32, #tpu.memory_space<vmem>>, vector<1x32xf32>
    %86 = vector.shape_cast %85 : vector<1x32xf32> to vector<32xf32>
    %87 = vector.shape_cast %86 : vector<32xf32> to vector<1x32xf32>
    %88 = vector.broadcast %87 : vector<1x32xf32> to vector<8x32xf32>
    %89 = arith.addf %84, %88 : vector<8x32xf32>
    %90 = arith.truncf %89 : vector<8x32xf32> to vector<8x32xbf16>
    %c0_40 = arith.constant 0 : index
    %c0_41 = arith.constant 0 : index
    %91 = vector.load %arg14[%c0_40, %c0_41] : memref<32x128xbf16, #tpu.memory_space<vmem>>, vector<32x128xbf16>
    %cst_42 = arith.constant dense<0.000000e+00> : vector<8x128xf32>
    %92 = tpu.matmul %90, %91, %cst_42 {dimension_numbers = #tpu.dot_dimension_numbers<[1], [0], [0], [1], [0, 0, 1, 1], [], []>} : vector<8x32xbf16>, vector<32x128xbf16>, vector<8x128xf32> -> vector<8x128xf32>
    %c0_43 = arith.constant 0 : index
    %c0_44 = arith.constant 0 : index
    %93 = vector.load %arg15[%c0_43, %c0_44] : memref<1x128xf32, #tpu.memory_space<vmem>>, vector<1x128xf32>
    %94 = vector.shape_cast %93 : vector<1x128xf32> to vector<128xf32>
    %95 = vector.shape_cast %94 : vector<128xf32> to vector<1x128xf32>
    %96 = vector.broadcast %95 : vector<1x128xf32> to vector<8x128xf32>
    %97 = arith.addf %92, %96 : vector<8x128xf32>
    %cst_45 = arith.constant 5.000000e-01 : f32
    %98 = vector.broadcast %cst_45 : f32 to vector<8x128xf32>
    %99 = arith.mulf %98, %97 : vector<8x128xf32>
    %cst_46 = arith.constant 4.471500e-02 : f32
    %100 = vector.broadcast %cst_46 : f32 to vector<8x128xf32>
    %101 = arith.mulf %100, %97 : vector<8x128xf32>
    %102 = arith.mulf %101, %97 : vector<8x128xf32>
    %103 = arith.mulf %102, %97 : vector<8x128xf32>
    %104 = arith.addf %97, %103 : vector<8x128xf32>
    %cst_47 = arith.constant 0.797884583 : f32
    %105 = vector.broadcast %cst_47 : f32 to vector<8x128xf32>
    %106 = arith.mulf %105, %104 : vector<8x128xf32>
    %107 = math.tanh %106 : vector<8x128xf32>
    %cst_48 = arith.constant 1.000000e+00 : f32
    %108 = vector.broadcast %cst_48 : f32 to vector<8x128xf32>
    %109 = arith.addf %108, %107 : vector<8x128xf32>
    %110 = arith.mulf %99, %109 : vector<8x128xf32>
    %111 = arith.truncf %110 : vector<8x128xf32> to vector<8x128xbf16>
    %c0_49 = arith.constant 0 : index
    %c0_50 = arith.constant 0 : index
    %112 = vector.load %arg16[%c0_49, %c0_50] : memref<128x32xbf16, #tpu.memory_space<vmem>>, vector<128x32xbf16>
    %cst_51 = arith.constant dense<0.000000e+00> : vector<8x32xf32>
    %113 = tpu.matmul %111, %112, %cst_51 {dimension_numbers = #tpu.dot_dimension_numbers<[1], [0], [0], [1], [0, 0, 1, 1], [], []>} : vector<8x128xbf16>, vector<128x32xbf16>, vector<8x32xf32> -> vector<8x32xf32>
    %c0_52 = arith.constant 0 : index
    %c0_53 = arith.constant 0 : index
    %114 = vector.load %arg17[%c0_52, %c0_53] : memref<1x32xf32, #tpu.memory_space<vmem>>, vector<1x32xf32>
    %115 = vector.shape_cast %114 : vector<1x32xf32> to vector<32xf32>
    %116 = vector.shape_cast %115 : vector<32xf32> to vector<1x32xf32>
    %117 = vector.broadcast %116 : vector<1x32xf32> to vector<8x32xf32>
    %118 = arith.addf %113, %117 : vector<8x32xf32>
    %c0_54 = arith.constant 0 : index
    %c0_55 = arith.constant 0 : index
    %119 = vector.load %arg18[%c0_54, %c0_55] : memref<1x32xf32, #tpu.memory_space<vmem>>, vector<1x32xf32>
    %120 = vector.shape_cast %119 : vector<1x32xf32> to vector<32xf32>
    %121 = vector.shape_cast %120 : vector<32xf32> to vector<1x32xf32>
    %122 = vector.broadcast %121 : vector<1x32xf32> to vector<8x32xf32>
    %123 = arith.mulf %122, %118 : vector<8x32xf32>
    %124 = arith.addf %61, %123 : vector<8x32xf32>
    %c0_56 = arith.constant 0 : index
    %c0_57 = arith.constant 0 : index
    %c0_58 = arith.constant 0 : index
    %125 = vector.load %arg19[%c0_56, %c0_57, %c0_58] : memref<1x8x32xf32, #tpu.memory_space<vmem>>, vector<1x8x32xf32>
    %126 = vector.shape_cast %125 : vector<1x8x32xf32> to vector<8x32xf32>
    %127 = vector.shape_cast %124 : vector<8x32xf32> to vector<1x8x32xf32>
    tpu.vector_store %arg19[%c0_56, %c0_57, %c0_58], %127 {strides = array<i32>} : memref<1x8x32xf32, #tpu.memory_space<vmem>>, vector<1x8x32xf32>,
    return
  }
  func.func @transform_0(%arg0: i32, %arg1: i32) -> (i32, i32, i32) {
    %c0_i32 = arith.constant 0 : i32
    %c0_i32_0 = arith.constant 0 : i32
    %c0_i32_1 = arith.constant 0 : i32
    return %arg0, %c0_i32, %c0_i32_0 : i32, i32, i32
  }
  func.func @transform_1(%arg0: i32, %arg1: i32) -> (i32, i32) {
    %c0_i32 = arith.constant 0 : i32
    %c0_i32_0 = arith.constant 0 : i32
    %c0_i32_1 = arith.constant 0 : i32
    return %c0_i32, %c0_i32_0 : i32, i32
  }
  func.func @transform_2(%arg0: i32, %arg1: i32) -> (i32, i32) {
    %c0_i32 = arith.constant 0 : i32
    %c0_i32_0 = arith.constant 0 : i32
    %c0_i32_1 = arith.constant 0 : i32
    return %c0_i32, %c0_i32_0 : i32, i32
  }
  func.func @transform_3(%arg0: i32, %arg1: i32) -> (i32, i32) {
    %c0_i32 = arith.constant 0 : i32
    %c0_i32_0 = arith.constant 0 : i32
    %c0_i32_1 = arith.constant 0 : i32
    return %c0_i32, %c0_i32_0 : i32, i32
  }
  func.func @transform_4(%arg0: i32, %arg1: i32) -> (i32, i32) {
    %c0_i32 = arith.constant 0 : i32
    %c0_i32_0 = arith.constant 0 : i32
    %c0_i32_1 = arith.constant 0 : i32
    return %c0_i32, %c0_i32_0 : i32, i32
  }
  func.func @transform_5(%arg0: i32, %arg1: i32) -> (i32, i32, i32) {
    %c0_i32 = arith.constant 0 : i32
    %c0_i32_0 = arith.constant 0 : i32
    %c0_i32_1 = arith.constant 0 : i32
    %c0_i32_2 = arith.constant 0 : i32
    return %c0_i32, %c0_i32_0, %c0_i32_1 : i32, i32, i32
  }
  func.func @transform_6(%arg0: i32, %arg1: i32) -> (i32, i32) {
    %c0_i32 = arith.constant 0 : i32
    %c0_i32_0 = arith.constant 0 : i32
    %c0_i32_1 = arith.constant 0 : i32
    return %c0_i32, %c0_i32_0 : i32, i32
  }
  func.func @transform_7(%arg0: i32, %arg1: i32) -> (i32, i32) {
    %c0_i32 = arith.constant 0 : i32
    %c0_i32_0 = arith.constant 0 : i32
    %c0_i32_1 = arith.constant 0 : i32
    return %c0_i32, %c0_i32_0 : i32, i32
  }
  func.func @transform_8(%arg0: i32, %arg1: i32) -> (i32, i32) {
    %c0_i32 = arith.constant 0 : i32
    %c0_i32_0 = arith.constant 0 : i32
    %c0_i32_1 = arith.constant 0 : i32
    return %c0_i32, %c0_i32_0 : i32, i32
  }
  func.func @transform_9(%arg0: i32, %arg1: i32) -> (i32, i32) {
    %c0_i32 = arith.constant 0 : i32
    %c0_i32_0 = arith.constant 0 : i32
    %c0_i32_1 = arith.constant 0 : i32
    return %c0_i32, %c0_i32_0 : i32, i32
  }
  func.func @transform_10(%arg0: i32, %arg1: i32) -> (i32, i32) {
    %c0_i32 = arith.constant 0 : i32
    %c0_i32_0 = arith.constant 0 : i32
    %c0_i32_1 = arith.constant 0 : i32
    return %c0_i32, %c0_i32_0 : i32, i32
  }
  func.func @transform_11(%arg0: i32, %arg1: i32) -> (i32, i32) {
    %c0_i32 = arith.constant 0 : i32
    %c0_i32_0 = arith.constant 0 : i32
    %c0_i32_1 = arith.constant 0 : i32
    return %c0_i32, %c0_i32_0 : i32, i32
  }
  func.func @transform_12(%arg0: i32, %arg1: i32) -> (i32, i32) {
    %c0_i32 = arith.constant 0 : i32
    %c0_i32_0 = arith.constant 0 : i32
    %c0_i32_1 = arith.constant 0 : i32
    return %c0_i32, %c0_i32_0 : i32, i32
  }
  func.func @transform_13(%arg0: i32, %arg1: i32) -> (i32, i32) {
    %c0_i32 = arith.constant 0 : i32
    %c0_i32_0 = arith.constant 0 : i32
    %c0_i32_1 = arith.constant 0 : i32
    return %c0_i32, %c0_i32_0 : i32, i32
  }
  func.func @transform_14(%arg0: i32, %arg1: i32) -> (i32, i32) {
    %c0_i32 = arith.constant 0 : i32
    %c0_i32_0 = arith.constant 0 : i32
    %c0_i32_1 = arith.constant 0 : i32
    return %c0_i32, %c0_i32_0 : i32, i32
  }
  func.func @transform_15(%arg0: i32, %arg1: i32) -> (i32, i32) {
    %c0_i32 = arith.constant 0 : i32
    %c0_i32_0 = arith.constant 0 : i32
    %c0_i32_1 = arith.constant 0 : i32
    return %c0_i32, %c0_i32_0 : i32, i32
  }
  func.func @transform_16(%arg0: i32, %arg1: i32) -> (i32, i32) {
    %c0_i32 = arith.constant 0 : i32
    %c0_i32_0 = arith.constant 0 : i32
    %c0_i32_1 = arith.constant 0 : i32
    return %c0_i32, %c0_i32_0 : i32, i32
  }
  func.func @transform_17(%arg0: i32, %arg1: i32) -> (i32, i32, i32) {
    %c0_i32 = arith.constant 0 : i32
    %c0_i32_0 = arith.constant 0 : i32
    return %arg0, %arg1, %c0_i32 : i32, i32, i32
  }
}

module attributes {stable_mosaic.version = 11 : i64} {
  func.func @_encoder_rope_block_kernel(%arg0: i32, %arg1: i32, %arg2: memref<1x8x32xf32, #tpu.memory_space<vmem>>, %arg3: memref<1x32xf32, #tpu.memory_space<vmem>>, %arg4: memref<1x32xf32, #tpu.memory_space<vmem>>, %arg5: memref<32x96xbf16, #tpu.memory_space<vmem>>, %arg6: memref<1x96xf32, #tpu.memory_space<vmem>>, %arg7: memref<4x8x32xbf16, #tpu.memory_space<vmem>>, %arg8: memref<1x32xf32, #tpu.memory_space<vmem>>, %arg9: memref<8x8xf32, #tpu.memory_space<vmem>>, %arg10: memref<8x8xf32, #tpu.memory_space<vmem>>, %arg11: memref<1x32xf32, #tpu.memory_space<vmem>>, %arg12: memref<1x32xf32, #tpu.memory_space<vmem>>, %arg13: memref<1x32xf32, #tpu.memory_space<vmem>>, %arg14: memref<32x128xbf16, #tpu.memory_space<vmem>>, %arg15: memref<1x128xf32, #tpu.memory_space<vmem>>, %arg16: memref<128x32xbf16, #tpu.memory_space<vmem>>, %arg17: memref<1x32xf32, #tpu.memory_space<vmem>>, %arg18: memref<1x32xf32, #tpu.memory_space<vmem>>, %arg19: memref<1x8x32xf32, #tpu.memory_space<vmem>>, %arg20: memref<4x8x8xbf16, #tpu.memory_space<vmem>>, %arg21: memref<4x8x8xbf16, #tpu.memory_space<vmem>>, %arg22: memref<4x8x8xbf16, #tpu.memory_space<vmem>>) attributes {dimension_semantics = [#tpu.dimension_semantics<parallel>, #tpu.dimension_semantics<arbitrary>], iteration_bounds = array<i64: 2, 1>, scalar_prefetch = 0 : i64, scratch_operands = 3 : i64, tpu.core_type = #tpu.core_type<tc>, window_params = [{transform_indices = @transform_0, window_bounds = array<i64: 1, 8, 32>}, {pipeline_mode = #tpu.pipeline_mode<synchronous>, transform_indices = @transform_1, window_bounds = array<i64: 1, 32>}, {pipeline_mode = #tpu.pipeline_mode<synchronous>, transform_indices = @transform_2, window_bounds = array<i64: 1, 32>}, {pipeline_mode = #tpu.pipeline_mode<synchronous>, transform_indices = @transform_3, window_bounds = array<i64: 32, 96>}, {pipeline_mode = #tpu.pipeline_mode<synchronous>, transform_indices = @transform_4, window_bounds = array<i64: 1, 96>}, {pipeline_mode = #tpu.pipeline_mode<synchronous>, transform_indices = @transform_5, window_bounds = array<i64: 4, 8, 32>}, {pipeline_mode = #tpu.pipeline_mode<synchronous>, transform_indices = @transform_6, window_bounds = array<i64: 1, 32>}, {pipeline_mode = #tpu.pipeline_mode<synchronous>, transform_indices = @transform_7, window_bounds = array<i64: 8, 8>}, {pipeline_mode = #tpu.pipeline_mode<synchronous>, transform_indices = @transform_8, window_bounds = array<i64: 8, 8>}, {pipeline_mode = #tpu.pipeline_mode<synchronous>, transform_indices = @transform_9, window_bounds = array<i64: 1, 32>}, {pipeline_mode = #tpu.pipeline_mode<synchronous>, transform_indices = @transform_10, window_bounds = array<i64: 1, 32>}, {pipeline_mode = #tpu.pipeline_mode<synchronous>, transform_indices = @transform_11, window_bounds = array<i64: 1, 32>}, {pipeline_mode = #tpu.pipeline_mode<synchronous>, transform_indices = @transform_12, window_bounds = array<i64: 32, 128>}, {pipeline_mode = #tpu.pipeline_mode<synchronous>, transform_indices = @transform_13, window_bounds = array<i64: 1, 128>}, {pipeline_mode = #tpu.pipeline_mode<synchronous>, transform_indices = @transform_14, window_bounds = array<i64: 128, 32>}, {pipeline_mode = #tpu.pipeline_mode<synchronous>, transform_indices = @transform_15, window_bounds = array<i64: 1, 32>}, {pipeline_mode = #tpu.pipeline_mode<synchronous>, transform_indices = @transform_16, window_bounds = array<i64: 1, 32>}, {transform_indices = @transform_17, window_bounds = array<i64: 1, 8, 32>}]} {
    %c0_i32 = arith.constant 0 : i32
    %0 = arith.cmpi eq, %arg1, %c0_i32 : i32
    %1 = arith.extui %0 : i1 to i32
    %c0_i32_0 = arith.constant 0 : i32
    %2 = arith.cmpi ne, %1, %c0_i32_0 : i32
    scf.if %2 {
      %c0_59 = arith.constant 0 : index
      %c0_60 = arith.constant 0 : index
      %c0_61 = arith.constant 0 : index
      %128 = vector.load %arg2[%c0_59, %c0_60, %c0_61] : memref<1x8x32xf32, #tpu.memory_space<vmem>>, vector<1x8x32xf32>
      %129 = vector.shape_cast %128 : vector<1x8x32xf32> to vector<8x32xf32>
      %cst_62 = arith.constant dense<0.000000e+00> : vector<8xf32>
      %130 = vector.multi_reduction <add>, %129, %cst_62 [1] : vector<8x32xf32> to vector<8xf32>
      %131 = vector.shape_cast %130 : vector<8xf32> to vector<8x1xf32>
      %cst_63 = arith.constant 3.200000e+01 : f32
      %132 = vector.broadcast %cst_63 : f32 to vector<8x1xf32>
      %133 = arith.divf %131, %132 : vector<8x1xf32>
      %134 = vector.broadcast %133 : vector<8x1xf32> to vector<8x32xf32>
      %135 = arith.subf %129, %134 : vector<8x32xf32>
      %136 = arith.mulf %135, %135 : vector<8x32xf32>
      %cst_64 = arith.constant dense<0.000000e+00> : vector<8xf32>
      %137 = vector.multi_reduction <add>, %136, %cst_64 [1] : vector<8x32xf32> to vector<8xf32>
      %138 = vector.shape_cast %137 : vector<8xf32> to vector<8x1xf32>
      %cst_65 = arith.constant 3.200000e+01 : f32
      %139 = vector.broadcast %cst_65 : f32 to vector<8x1xf32>
      %140 = arith.divf %138, %139 : vector<8x1xf32>
      %141 = vector.broadcast %133 : vector<8x1xf32> to vector<8x32xf32>
      %142 = arith.subf %129, %141 : vector<8x32xf32>
      %cst_66 = arith.constant 9.99999997E-7 : f32
      %143 = vector.broadcast %cst_66 : f32 to vector<8x1xf32>
      %144 = arith.addf %140, %143 : vector<8x1xf32>
      %145 = math.rsqrt %144 : vector<8x1xf32>
      %146 = vector.broadcast %145 : vector<8x1xf32> to vector<8x32xf32>
      %147 = arith.mulf %142, %146 : vector<8x32xf32>
      %c0_67 = arith.constant 0 : index
      %c0_68 = arith.constant 0 : index
      %148 = vector.load %arg3[%c0_67, %c0_68] : memref<1x32xf32, #tpu.memory_space<vmem>>, vector<1x32xf32>
      %149 = vector.shape_cast %148 : vector<1x32xf32> to vector<32xf32>
      %150 = vector.shape_cast %149 : vector<32xf32> to vector<1x32xf32>
      %151 = vector.broadcast %150 : vector<1x32xf32> to vector<8x32xf32>
      %152 = arith.mulf %147, %151 : vector<8x32xf32>
      %c0_69 = arith.constant 0 : index
      %c0_70 = arith.constant 0 : index
      %153 = vector.load %arg4[%c0_69, %c0_70] : memref<1x32xf32, #tpu.memory_space<vmem>>, vector<1x32xf32>
      %154 = vector.shape_cast %153 : vector<1x32xf32> to vector<32xf32>
      %155 = vector.shape_cast %154 : vector<32xf32> to vector<1x32xf32>
      %156 = vector.broadcast %155 : vector<1x32xf32> to vector<8x32xf32>
      %157 = arith.addf %152, %156 : vector<8x32xf32>
      %158 = arith.truncf %157 : vector<8x32xf32> to vector<8x32xbf16>
      %c0_71 = arith.constant 0 : index
      %c0_72 = arith.constant 0 : index
      %159 = vector.load %arg5[%c0_71, %c0_72] : memref<32x96xbf16, #tpu.memory_space<vmem>>, vector<32x96xbf16>
      %cst_73 = arith.constant dense<0.000000e+00> : vector<8x96xf32>
      %160 = tpu.matmul %158, %159, %cst_73 {dimension_numbers = #tpu.dot_dimension_numbers<[1], [0], [0], [1], [0, 0, 1, 1], [], []>} : vector<8x32xbf16>, vector<32x96xbf16>, vector<8x96xf32> -> vector<8x96xf32>
      %c0_74 = arith.constant 0 : index
      %c0_75 = arith.constant 0 : index
      %161 = vector.load %arg6[%c0_74, %c0_75] : memref<1x96xf32, #tpu.memory_space<vmem>>, vector<1x96xf32>
      %162 = vector.shape_cast %161 : vector<1x96xf32> to vector<96xf32>
      %163 = vector.shape_cast %162 : vector<96xf32> to vector<1x96xf32>
      %164 = vector.broadcast %163 : vector<1x96xf32> to vector<8x96xf32>
      %165 = arith.addf %160, %164 : vector<8x96xf32>
      %166 = vector.shape_cast %165 : vector<8x96xf32> to vector<8x12x8xf32>
      %167 = tpu.transpose %166, [1, 0, 2] : vector<8x12x8xf32> -> vector<12x8x8xf32>
      %168 = vector.extract_strided_slice %167 {offsets = [0, 0, 0], sizes = [8, 8, 8], strides = [1, 1, 1]} : vector<12x8x8xf32> to vector<8x8x8xf32>
      %c0_76 = arith.constant 0 : index
      %c0_77 = arith.constant 0 : index
      %169 = vector.load %arg9[%c0_76, %c0_77] : memref<8x8xf32, #tpu.memory_space<vmem>>, vector<8x8xf32>
      %c0_78 = arith.constant 0 : index
      %c0_79 = arith.constant 0 : index
      %170 = vector.load %arg10[%c0_78, %c0_79] : memref<8x8xf32, #tpu.memory_space<vmem>>, vector<8x8xf32>
      %171 = vector.extract_strided_slice %168 {offsets = [0, 0, 4], sizes = [8, 8, 4], strides = [1, 1, 1]} : vector<8x8x8xf32> to vector<8x8x4xf32>
      %172 = vector.extract_strided_slice %168 {offsets = [0, 0, 0], sizes = [8, 8, 4], strides = [1, 1, 1]} : vector<8x8x8xf32> to vector<8x8x4xf32>
      %173 = tpu.concatenate %171, %172 in 2 : vector<8x8x4xf32>, vector<8x8x4xf32> -> vector<8x8x8xf32>
      %174 = vector.shape_cast %169 : vector<8x8xf32> to vector<1x8x8xf32>
      %175 = vector.broadcast %174 : vector<1x8x8xf32> to vector<8x8x8xf32>
      %176 = arith.mulf %168, %175 : vector<8x8x8xf32>
      %177 = vector.shape_cast %170 : vector<8x8xf32> to vector<1x8x8xf32>
      %178 = vector.broadcast %177 : vector<1x8x8xf32> to vector<8x8x8xf32>
      %179 = arith.mulf %173, %178 : vector<8x8x8xf32>
      %180 = arith.addf %176, %179 : vector<8x8x8xf32>
      %181 = vector.extract_strided_slice %180 {offsets = [0, 0, 0], sizes = [4, 8, 8], strides = [1, 1, 1]} : vector<8x8x8xf32> to vector<4x8x8xf32>
      %182 = arith.truncf %181 : vector<4x8x8xf32> to vector<4x8x8xbf16>
      %c0_80 = arith.constant 0 : index
      %c0_81 = arith.constant 0 : index
      %c0_82 = arith.constant 0 : index
      %183 = vector.load %arg20[%c0_80, %c0_81, %c0_82] : memref<4x8x8xbf16, #tpu.memory_space<vmem>>, vector<4x8x8xbf16>
      tpu.vector_store %arg20[%c0_80, %c0_81, %c0_82], %182 {strides = array<i32>} : memref<4x8x8xbf16, #tpu.memory_space<vmem>>, vector<4x8x8xbf16>,
      %184 = vector.extract_strided_slice %180 {offsets = [4, 0, 0], sizes = [1, 8, 8], strides = [1, 1, 1]} : vector<8x8x8xf32> to vector<1x8x8xf32>
      %185 = vector.shape_cast %184 : vector<1x8x8xf32> to vector<8x8xf32>
      %186 = tpu.transpose %185, [1, 0] : vector<8x8xf32> -> vector<8x8xf32>
      %187 = arith.truncf %186 : vector<8x8xf32> to vector<8x8xbf16>
      %c0_83 = arith.constant 0 : index
      %c0_84 = arith.constant 0 : index
      %c0_85 = arith.constant 0 : index
      %188 = vector.load %arg21[%c0_83, %c0_84, %c0_85] : memref<4x8x8xbf16, #tpu.memory_space<vmem>>, vector<1x8x8xbf16>
      %189 = vector.shape_cast %188 : vector<1x8x8xbf16> to vector<8x8xbf16>
      %190 = vector.shape_cast %187 : vector<8x8xbf16> to vector<1x8x8xbf16>
      tpu.vector_store %arg21[%c0_83, %c0_84, %c0_85], %190 {strides = array<i32>} : memref<4x8x8xbf16, #tpu.memory_space<vmem>>, vector<1x8x8xbf16>,
      %191 = vector.extract_strided_slice %180 {offsets = [5, 0, 0], sizes = [1, 8, 8], strides = [1, 1, 1]} : vector<8x8x8xf32> to vector<1x8x8xf32>
      %192 = vector.shape_cast %191 : vector<1x8x8xf32> to vector<8x8xf32>
      %193 = tpu.transpose %192, [1, 0] : vector<8x8xf32> -> vector<8x8xf32>
      %194 = arith.truncf %193 : vector<8x8xf32> to vector<8x8xbf16>
      %c1_86 = arith.constant 1 : index
      %c0_87 = arith.constant 0 : index
      %c0_88 = arith.constant 0 : index
      %195 = vector.load %arg21[%c1_86, %c0_87, %c0_88] : memref<4x8x8xbf16, #tpu.memory_space<vmem>>, vector<1x8x8xbf16>
      %196 = vector.shape_cast %195 : vector<1x8x8xbf16> to vector<8x8xbf16>
      %197 = vector.shape_cast %194 : vector<8x8xbf16> to vector<1x8x8xbf16>
      tpu.vector_store %arg21[%c1_86, %c0_87, %c0_88], %197 {strides = array<i32>} : memref<4x8x8xbf16, #tpu.memory_space<vmem>>, vector<1x8x8xbf16>,
      %198 = vector.extract_strided_slice %180 {offsets = [6, 0, 0], sizes = [1, 8, 8], strides = [1, 1, 1]} : vector<8x8x8xf32> to vector<1x8x8xf32>
      %199 = vector.shape_cast %198 : vector<1x8x8xf32> to vector<8x8xf32>
      %200 = tpu.transpose %199, [1, 0] : vector<8x8xf32> -> vector<8x8xf32>
      %201 = arith.truncf %200 : vector<8x8xf32> to vector<8x8xbf16>
      %c2_89 = arith.constant 2 : index
      %c0_90 = arith.constant 0 : index
      %c0_91 = arith.constant 0 : index
      %202 = vector.load %arg21[%c2_89, %c0_90, %c0_91] : memref<4x8x8xbf16, #tpu.memory_space<vmem>>, vector<1x8x8xbf16>
      %203 = vector.shape_cast %202 : vector<1x8x8xbf16> to vector<8x8xbf16>
      %204 = vector.shape_cast %201 : vector<8x8xbf16> to vector<1x8x8xbf16>
      tpu.vector_store %arg21[%c2_89, %c0_90, %c0_91], %204 {strides = array<i32>} : memref<4x8x8xbf16, #tpu.memory_space<vmem>>, vector<1x8x8xbf16>,
      %205 = vector.extract_strided_slice %180 {offsets = [7, 0, 0], sizes = [1, 8, 8], strides = [1, 1, 1]} : vector<8x8x8xf32> to vector<1x8x8xf32>
      %206 = vector.shape_cast %205 : vector<1x8x8xf32> to vector<8x8xf32>
      %207 = tpu.transpose %206, [1, 0] : vector<8x8xf32> -> vector<8x8xf32>
      %208 = arith.truncf %207 : vector<8x8xf32> to vector<8x8xbf16>
      %c3_92 = arith.constant 3 : index
      %c0_93 = arith.constant 0 : index
      %c0_94 = arith.constant 0 : index
      %209 = vector.load %arg21[%c3_92, %c0_93, %c0_94] : memref<4x8x8xbf16, #tpu.memory_space<vmem>>, vector<1x8x8xbf16>
      %210 = vector.shape_cast %209 : vector<1x8x8xbf16> to vector<8x8xbf16>
      %211 = vector.shape_cast %208 : vector<8x8xbf16> to vector<1x8x8xbf16>
      tpu.vector_store %arg21[%c3_92, %c0_93, %c0_94], %211 {strides = array<i32>} : memref<4x8x8xbf16, #tpu.memory_space<vmem>>, vector<1x8x8xbf16>,
      %212 = vector.extract_strided_slice %167 {offsets = [8, 0, 0], sizes = [4, 8, 8], strides = [1, 1, 1]} : vector<12x8x8xf32> to vector<4x8x8xf32>
      %213 = arith.truncf %212 : vector<4x8x8xf32> to vector<4x8x8xbf16>
      %c0_95 = arith.constant 0 : index
      %c0_96 = arith.constant 0 : index
      %c0_97 = arith.constant 0 : index
      %214 = vector.load %arg22[%c0_95, %c0_96, %c0_97] : memref<4x8x8xbf16, #tpu.memory_space<vmem>>, vector<4x8x8xbf16>
      tpu.vector_store %arg22[%c0_95, %c0_96, %c0_97], %213 {strides = array<i32>} : memref<4x8x8xbf16, #tpu.memory_space<vmem>>, vector<4x8x8xbf16>,
    } else {
    }
    %c8_i32 = arith.constant 8 : i32
    %3 = arith.muli %arg1, %c8_i32 : i32
    %4 = tpu.assume_multiple %3, 8 : i32
    %c0 = arith.constant 0 : index
    %5 = arith.index_cast %4 : i32 to index
    %c0_1 = arith.constant 0 : index
    %6 = vector.load %arg2[%c0, %5, %c0_1] : memref<1x8x32xf32, #tpu.memory_space<vmem>>, vector<1x8x32xf32>
    %7 = vector.shape_cast %6 : vector<1x8x32xf32> to vector<8x32xf32>
    %c0_2 = arith.constant 0 : index
    %8 = arith.index_cast %4 : i32 to index
    %c0_3 = arith.constant 0 : index
    %9 = vector.load %arg20[%c0_2, %8, %c0_3] : memref<4x8x8xbf16, #tpu.memory_space<vmem>>, vector<4x8x8xbf16>
    %c0_4 = arith.constant 0 : index
    %c0_5 = arith.constant 0 : index
    %c0_6 = arith.constant 0 : index
    %10 = vector.load %arg21[%c0_4, %c0_5, %c0_6] : memref<4x8x8xbf16, #tpu.memory_space<vmem>>, vector<4x8x8xbf16>
    "tpu.trace_start"() <{level = 10 : i32, message = "hqc,hck->hqk"}> : () -> ()
    %cst = arith.constant dense<0.000000e+00> : vector<4x8x8xf32>
    %11 = tpu.matmul %9, %10, %cst {dimension_numbers = #tpu.dot_dimension_numbers<[2], [1], [1], [2], [0, 0, 0, 1, 1, 2], [0], [0]>} : vector<4x8x8xbf16>, vector<4x8x8xbf16>, vector<4x8x8xf32> -> vector<4x8x8xf32>
    "tpu.trace_stop"() : () -> ()
    %cst_7 = arith.constant dense<0xFF800000> : vector<4x8xf32>
    %12 = vector.multi_reduction <maximumf>, %11, %cst_7 [2] : vector<4x8x8xf32> to vector<4x8xf32>
    %13 = vector.shape_cast %12 : vector<4x8xf32> to vector<4x8x1xf32>
    %14 = vector.broadcast %13 : vector<4x8x1xf32> to vector<4x8x8xf32>
    %15 = arith.subf %11, %14 : vector<4x8x8xf32>
    %16 = math.exp %15 : vector<4x8x8xf32>
    %cst_8 = arith.constant dense<0.000000e+00> : vector<4x8xf32>
    %17 = vector.multi_reduction <add>, %16, %cst_8 [2] : vector<4x8x8xf32> to vector<4x8xf32>
    %18 = vector.shape_cast %17 : vector<4x8xf32> to vector<4x8x1xf32>
    %19 = tpu.reciprocal %18 {approx = true} : vector<4x8x1xf32> -> vector<4x8x1xf32>
    %20 = vector.broadcast %19 : vector<4x8x1xf32> to vector<4x8x8xf32>
    %21 = arith.mulf %16, %20 : vector<4x8x8xf32>
    %22 = arith.truncf %21 : vector<4x8x8xf32> to vector<4x8x8xbf16>
    %c0_9 = arith.constant 0 : index
    %c0_10 = arith.constant 0 : index
    %c0_11 = arith.constant 0 : index
    %23 = vector.load %arg22[%c0_9, %c0_10, %c0_11] : memref<4x8x8xbf16, #tpu.memory_space<vmem>>, vector<4x8x8xbf16>
    "tpu.trace_start"() <{level = 10 : i32, message = "hqk,hkc->hqc"}> : () -> ()
    %cst_12 = arith.constant dense<0.000000e+00> : vector<4x8x8xf32>
    %24 = tpu.matmul %22, %23, %cst_12 {dimension_numbers = #tpu.dot_dimension_numbers<[2], [1], [1], [2], [0, 0, 0, 1, 1, 2], [0], [0]>} : vector<4x8x8xbf16>, vector<4x8x8xbf16>, vector<4x8x8xf32> -> vector<4x8x8xf32>
    "tpu.trace_stop"() : () -> ()
    %25 = arith.truncf %24 : vector<4x8x8xf32> to vector<4x8x8xbf16>
    %cst_13 = arith.constant 0.000000e+00 : f32
    %26 = vector.broadcast %cst_13 : f32 to vector<8x32xf32>
    %27 = vector.extract_strided_slice %25 {offsets = [0, 0, 0], sizes = [1, 8, 8], strides = [1, 1, 1]} : vector<4x8x8xbf16> to vector<1x8x8xbf16>
    %28 = vector.shape_cast %27 : vector<1x8x8xbf16> to vector<8x8xbf16>
    %c0_14 = arith.constant 0 : index
    %c0_15 = arith.constant 0 : index
    %c0_16 = arith.constant 0 : index
    %29 = vector.load %arg7[%c0_14, %c0_15, %c0_16] : memref<4x8x32xbf16, #tpu.memory_space<vmem>>, vector<1x8x32xbf16>
    %30 = vector.shape_cast %29 : vector<1x8x32xbf16> to vector<8x32xbf16>
    %cst_17 = arith.constant dense<0.000000e+00> : vector<8x32xf32>
    %31 = tpu.matmul %28, %30, %cst_17 {dimension_numbers = #tpu.dot_dimension_numbers<[1], [0], [0], [1], [0, 0, 1, 1], [], []>} : vector<8x8xbf16>, vector<8x32xbf16>, vector<8x32xf32> -> vector<8x32xf32>
    %32 = arith.addf %26, %31 : vector<8x32xf32>
    %33 = vector.extract_strided_slice %25 {offsets = [1, 0, 0], sizes = [1, 8, 8], strides = [1, 1, 1]} : vector<4x8x8xbf16> to vector<1x8x8xbf16>
    %34 = vector.shape_cast %33 : vector<1x8x8xbf16> to vector<8x8xbf16>
    %c1 = arith.constant 1 : index
    %c0_18 = arith.constant 0 : index
    %c0_19 = arith.constant 0 : index
    %35 = vector.load %arg7[%c1, %c0_18, %c0_19] : memref<4x8x32xbf16, #tpu.memory_space<vmem>>, vector<1x8x32xbf16>
    %36 = vector.shape_cast %35 : vector<1x8x32xbf16> to vector<8x32xbf16>
    %cst_20 = arith.constant dense<0.000000e+00> : vector<8x32xf32>
    %37 = tpu.matmul %34, %36, %cst_20 {dimension_numbers = #tpu.dot_dimension_numbers<[1], [0], [0], [1], [0, 0, 1, 1], [], []>} : vector<8x8xbf16>, vector<8x32xbf16>, vector<8x32xf32> -> vector<8x32xf32>
    %38 = arith.addf %32, %37 : vector<8x32xf32>
    %39 = vector.extract_strided_slice %25 {offsets = [2, 0, 0], sizes = [1, 8, 8], strides = [1, 1, 1]} : vector<4x8x8xbf16> to vector<1x8x8xbf16>
    %40 = vector.shape_cast %39 : vector<1x8x8xbf16> to vector<8x8xbf16>
    %c2 = arith.constant 2 : index
    %c0_21 = arith.constant 0 : index
    %c0_22 = arith.constant 0 : index
    %41 = vector.load %arg7[%c2, %c0_21, %c0_22] : memref<4x8x32xbf16, #tpu.memory_space<vmem>>, vector<1x8x32xbf16>
    %42 = vector.shape_cast %41 : vector<1x8x32xbf16> to vector<8x32xbf16>
    %cst_23 = arith.constant dense<0.000000e+00> : vector<8x32xf32>
    %43 = tpu.matmul %40, %42, %cst_23 {dimension_numbers = #tpu.dot_dimension_numbers<[1], [0], [0], [1], [0, 0, 1, 1], [], []>} : vector<8x8xbf16>, vector<8x32xbf16>, vector<8x32xf32> -> vector<8x32xf32>
    %44 = arith.addf %38, %43 : vector<8x32xf32>
    %45 = vector.extract_strided_slice %25 {offsets = [3, 0, 0], sizes = [1, 8, 8], strides = [1, 1, 1]} : vector<4x8x8xbf16> to vector<1x8x8xbf16>
    %46 = vector.shape_cast %45 : vector<1x8x8xbf16> to vector<8x8xbf16>
    %c3 = arith.constant 3 : index
    %c0_24 = arith.constant 0 : index
    %c0_25 = arith.constant 0 : index
    %47 = vector.load %arg7[%c3, %c0_24, %c0_25] : memref<4x8x32xbf16, #tpu.memory_space<vmem>>, vector<1x8x32xbf16>
    %48 = vector.shape_cast %47 : vector<1x8x32xbf16> to vector<8x32xbf16>
    %cst_26 = arith.constant dense<0.000000e+00> : vector<8x32xf32>
    %49 = tpu.matmul %46, %48, %cst_26 {dimension_numbers = #tpu.dot_dimension_numbers<[1], [0], [0], [1], [0, 0, 1, 1], [], []>} : vector<8x8xbf16>, vector<8x32xbf16>, vector<8x32xf32> -> vector<8x32xf32>
    %50 = arith.addf %44, %49 : vector<8x32xf32>
    %c0_27 = arith.constant 0 : index
    %c0_28 = arith.constant 0 : index
    %51 = vector.load %arg8[%c0_27, %c0_28] : memref<1x32xf32, #tpu.memory_space<vmem>>, vector<1x32xf32>
    %52 = vector.shape_cast %51 : vector<1x32xf32> to vector<32xf32>
    %53 = vector.shape_cast %52 : vector<32xf32> to vector<1x32xf32>
    %54 = vector.broadcast %53 : vector<1x32xf32> to vector<8x32xf32>
    %55 = arith.addf %50, %54 : vector<8x32xf32>
    %c0_29 = arith.constant 0 : index
    %c0_30 = arith.constant 0 : index
    %56 = vector.load %arg11[%c0_29, %c0_30] : memref<1x32xf32, #tpu.memory_space<vmem>>, vector<1x32xf32>
    %57 = vector.shape_cast %56 : vector<1x32xf32> to vector<32xf32>
    %58 = vector.shape_cast %57 : vector<32xf32> to vector<1x32xf32>
    %59 = vector.broadcast %58 : vector<1x32xf32> to vector<8x32xf32>
    %60 = arith.mulf %59, %55 : vector<8x32xf32>
    %61 = arith.addf %7, %60 : vector<8x32xf32>
    %cst_31 = arith.constant dense<0.000000e+00> : vector<8xf32>
    %62 = vector.multi_reduction <add>, %61, %cst_31 [1] : vector<8x32xf32> to vector<8xf32>
    %63 = vector.shape_cast %62 : vector<8xf32> to vector<8x1xf32>
    %cst_32 = arith.constant 3.200000e+01 : f32
    %64 = vector.broadcast %cst_32 : f32 to vector<8x1xf32>
    %65 = arith.divf %63, %64 : vector<8x1xf32>
    %66 = vector.broadcast %65 : vector<8x1xf32> to vector<8x32xf32>
    %67 = arith.subf %61, %66 : vector<8x32xf32>
    %68 = arith.mulf %67, %67 : vector<8x32xf32>
    %cst_33 = arith.constant dense<0.000000e+00> : vector<8xf32>
    %69 = vector.multi_reduction <add>, %68, %cst_33 [1] : vector<8x32xf32> to vector<8xf32>
    %70 = vector.shape_cast %69 : vector<8xf32> to vector<8x1xf32>
    %cst_34 = arith.constant 3.200000e+01 : f32
    %71 = vector.broadcast %cst_34 : f32 to vector<8x1xf32>
    %72 = arith.divf %70, %71 : vector<8x1xf32>
    %73 = vector.broadcast %65 : vector<8x1xf32> to vector<8x32xf32>
    %74 = arith.subf %61, %73 : vector<8x32xf32>
    %cst_35 = arith.constant 9.99999997E-7 : f32
    %75 = vector.broadcast %cst_35 : f32 to vector<8x1xf32>
    %76 = arith.addf %72, %75 : vector<8x1xf32>
    %77 = math.rsqrt %76 : vector<8x1xf32>
    %78 = vector.broadcast %77 : vector<8x1xf32> to vector<8x32xf32>
    %79 = arith.mulf %74, %78 : vector<8x32xf32>
    %c0_36 = arith.constant 0 : index
    %c0_37 = arith.constant 0 : index
    %80 = vector.load %arg12[%c0_36, %c0_37] : memref<1x32xf32, #tpu.memory_space<vmem>>, vector<1x32xf32>
    %81 = vector.shape_cast %80 : vector<1x32xf32> to vector<32xf32>
    %82 = vector.shape_cast %81 : vector<32xf32> to vector<1x32xf32>
    %83 = vector.broadcast %82 : vector<1x32xf32> to vector<8x32xf32>
    %84 = arith.mulf %79, %83 : vector<8x32xf32>
    %c0_38 = arith.constant 0 : index
    %c0_39 = arith.constant 0 : index
    %85 = vector.load %arg13[%c0_38, %c0_39] : memref<1x32xf32, #tpu.memory_space<vmem>>, vector<1x32xf32>
    %86 = vector.shape_cast %85 : vector<1x32xf32> to vector<32xf32>
    %87 = vector.shape_cast %86 : vector<32xf32> to vector<1x32xf32>
    %88 = vector.broadcast %87 : vector<1x32xf32> to vector<8x32xf32>
    %89 = arith.addf %84, %88 : vector<8x32xf32>
    %90 = arith.truncf %89 : vector<8x32xf32> to vector<8x32xbf16>
    %c0_40 = arith.constant 0 : index
    %c0_41 = arith.constant 0 : index
    %91 = vector.load %arg14[%c0_40, %c0_41] : memref<32x128xbf16, #tpu.memory_space<vmem>>, vector<32x128xbf16>
    %cst_42 = arith.constant dense<0.000000e+00> : vector<8x128xf32>
    %92 = tpu.matmul %90, %91, %cst_42 {dimension_numbers = #tpu.dot_dimension_numbers<[1], [0], [0], [1], [0, 0, 1, 1], [], []>} : vector<8x32xbf16>, vector<32x128xbf16>, vector<8x128xf32> -> vector<8x128xf32>
    %c0_43 = arith.constant 0 : index
    %c0_44 = arith.constant 0 : index
    %93 = vector.load %arg15[%c0_43, %c0_44] : memref<1x128xf32, #tpu.memory_space<vmem>>, vector<1x128xf32>
    %94 = vector.shape_cast %93 : vector<1x128xf32> to vector<128xf32>
    %95 = vector.shape_cast %94 : vector<128xf32> to vector<1x128xf32>
    %96 = vector.broadcast %95 : vector<1x128xf32> to vector<8x128xf32>
    %97 = arith.addf %92, %96 : vector<8x128xf32>
    %cst_45 = arith.constant 5.000000e-01 : f32
    %98 = vector.broadcast %cst_45 : f32 to vector<8x128xf32>
    %99 = arith.mulf %98, %97 : vector<8x128xf32>
    %cst_46 = arith.constant 4.471500e-02 : f32
    %100 = vector.broadcast %cst_46 : f32 to vector<8x128xf32>
    %101 = arith.mulf %100, %97 : vector<8x128xf32>
    %102 = arith.mulf %101, %97 : vector<8x128xf32>
    %103 = arith.mulf %102, %97 : vector<8x128xf32>
    %104 = arith.addf %97, %103 : vector<8x128xf32>
    %cst_47 = arith.constant 0.797884583 : f32
    %105 = vector.broadcast %cst_47 : f32 to vector<8x128xf32>
    %106 = arith.mulf %105, %104 : vector<8x128xf32>
    %107 = math.tanh %106 : vector<8x128xf32>
    %cst_48 = arith.constant 1.000000e+00 : f32
    %108 = vector.broadcast %cst_48 : f32 to vector<8x128xf32>
    %109 = arith.addf %108, %107 : vector<8x128xf32>
    %110 = arith.mulf %99, %109 : vector<8x128xf32>
    %111 = arith.truncf %110 : vector<8x128xf32> to vector<8x128xbf16>
    %c0_49 = arith.constant 0 : index
    %c0_50 = arith.constant 0 : index
    %112 = vector.load %arg16[%c0_49, %c0_50] : memref<128x32xbf16, #tpu.memory_space<vmem>>, vector<128x32xbf16>
    %cst_51 = arith.constant dense<0.000000e+00> : vector<8x32xf32>
    %113 = tpu.matmul %111, %112, %cst_51 {dimension_numbers = #tpu.dot_dimension_numbers<[1], [0], [0], [1], [0, 0, 1, 1], [], []>} : vector<8x128xbf16>, vector<128x32xbf16>, vector<8x32xf32> -> vector<8x32xf32>
    %c0_52 = arith.constant 0 : index
    %c0_53 = arith.constant 0 : index
    %114 = vector.load %arg17[%c0_52, %c0_53] : memref<1x32xf32, #tpu.memory_space<vmem>>, vector<1x32xf32>
    %115 = vector.shape_cast %114 : vector<1x32xf32> to vector<32xf32>
    %116 = vector.shape_cast %115 : vector<32xf32> to vector<1x32xf32>
    %117 = vector.broadcast %116 : vector<1x32xf32> to vector<8x32xf32>
    %118 = arith.addf %113, %117 : vector<8x32xf32>
    %c0_54 = arith.constant 0 : index
    %c0_55 = arith.constant 0 : index
    %119 = vector.load %arg18[%c0_54, %c0_55] : memref<1x32xf32, #tpu.memory_space<vmem>>, vector<1x32xf32>
    %120 = vector.shape_cast %119 : vector<1x32xf32> to vector<32xf32>
    %121 = vector.shape_cast %120 : vector<32xf32> to vector<1x32xf32>
    %122 = vector.broadcast %121 : vector<1x32xf32> to vector<8x32xf32>
    %123 = arith.mulf %122, %118 : vector<8x32xf32>
    %124 = arith.addf %61, %123 : vector<8x32xf32>
    %c0_56 = arith.constant 0 : index
    %c0_57 = arith.constant 0 : index
    %c0_58 = arith.constant 0 : index
    %125 = vector.load %arg19[%c0_56, %c0_57, %c0_58] : memref<1x8x32xf32, #tpu.memory_space<vmem>>, vector<1x8x32xf32>
    %126 = vector.shape_cast %125 : vector<1x8x32xf32> to vector<8x32xf32>
    %127 = vector.shape_cast %124 : vector<8x32xf32> to vector<1x8x32xf32>
    tpu.vector_store %arg19[%c0_56, %c0_57, %c0_58], %127 {strides = array<i32>} : memref<1x8x32xf32, #tpu.memory_space<vmem>>, vector<1x8x32xf32>,
    return
  }
  func.func @transform_0(%arg0: i32, %arg1: i32) -> (i32, i32, i32) {
    %c0_i32 = arith.constant 0 : i32
    %c0_i32_0 = arith.constant 0 : i32
    %c0_i32_1 = arith.constant 0 : i32
    return %arg0, %c0_i32, %c0_i32_0 : i32, i32, i32
  }
  func.func @transform_1(%arg0: i32, %arg1: i32) -> (i32, i32) {
    %c0_i32 = arith.constant 0 : i32
    %c0_i32_0 = arith.constant 0 : i32
    %c0_i32_1 = arith.constant 0 : i32
    return %c0_i32, %c0_i32_0 : i32, i32
  }
  func.func @transform_2(%arg0: i32, %arg1: i32) -> (i32, i32) {
    %c0_i32 = arith.constant 0 : i32
    %c0_i32_0 = arith.constant 0 : i32
    %c0_i32_1 = arith.constant 0 : i32
    return %c0_i32, %c0_i32_0 : i32, i32
  }
  func.func @transform_3(%arg0: i32, %arg1: i32) -> (i32, i32) {
    %c0_i32 = arith.constant 0 : i32
    %c0_i32_0 = arith.constant 0 : i32
    %c0_i32_1 = arith.constant 0 : i32
    return %c0_i32, %c0_i32_0 : i32, i32
  }
  func.func @transform_4(%arg0: i32, %arg1: i32) -> (i32, i32) {
    %c0_i32 = arith.constant 0 : i32
    %c0_i32_0 = arith.constant 0 : i32
    %c0_i32_1 = arith.constant 0 : i32
    return %c0_i32, %c0_i32_0 : i32, i32
  }
  func.func @transform_5(%arg0: i32, %arg1: i32) -> (i32, i32, i32) {
    %c0_i32 = arith.constant 0 : i32
    %c0_i32_0 = arith.constant 0 : i32
    %c0_i32_1 = arith.constant 0 : i32
    %c0_i32_2 = arith.constant 0 : i32
    return %c0_i32, %c0_i32_0, %c0_i32_1 : i32, i32, i32
  }
  func.func @transform_6(%arg0: i32, %arg1: i32) -> (i32, i32) {
    %c0_i32 = arith.constant 0 : i32
    %c0_i32_0 = arith.constant 0 : i32
    %c0_i32_1 = arith.constant 0 : i32
    return %c0_i32, %c0_i32_0 : i32, i32
  }
  func.func @transform_7(%arg0: i32, %arg1: i32) -> (i32, i32) {
    %c0_i32 = arith.constant 0 : i32
    %c0_i32_0 = arith.constant 0 : i32
    %c0_i32_1 = arith.constant 0 : i32
    return %c0_i32, %c0_i32_0 : i32, i32
  }
  func.func @transform_8(%arg0: i32, %arg1: i32) -> (i32, i32) {
    %c0_i32 = arith.constant 0 : i32
    %c0_i32_0 = arith.constant 0 : i32
    %c0_i32_1 = arith.constant 0 : i32
    return %c0_i32, %c0_i32_0 : i32, i32
  }
  func.func @transform_9(%arg0: i32, %arg1: i32) -> (i32, i32) {
    %c0_i32 = arith.constant 0 : i32
    %c0_i32_0 = arith.constant 0 : i32
    %c0_i32_1 = arith.constant 0 : i32
    return %c0_i32, %c0_i32_0 : i32, i32
  }
  func.func @transform_10(%arg0: i32, %arg1: i32) -> (i32, i32) {
    %c0_i32 = arith.constant 0 : i32
    %c0_i32_0 = arith.constant 0 : i32
    %c0_i32_1 = arith.constant 0 : i32
    return %c0_i32, %c0_i32_0 : i32, i32
  }
  func.func @transform_11(%arg0: i32, %arg1: i32) -> (i32, i32) {
    %c0_i32 = arith.constant 0 : i32
    %c0_i32_0 = arith.constant 0 : i32
    %c0_i32_1 = arith.constant 0 : i32
    return %c0_i32, %c0_i32_0 : i32, i32
  }
  func.func @transform_12(%arg0: i32, %arg1: i32) -> (i32, i32) {
    %c0_i32 = arith.constant 0 : i32
    %c0_i32_0 = arith.constant 0 : i32
    %c0_i32_1 = arith.constant 0 : i32
    return %c0_i32, %c0_i32_0 : i32, i32
  }
  func.func @transform_13(%arg0: i32, %arg1: i32) -> (i32, i32) {
    %c0_i32 = arith.constant 0 : i32
    %c0_i32_0 = arith.constant 0 : i32
    %c0_i32_1 = arith.constant 0 : i32
    return %c0_i32, %c0_i32_0 : i32, i32
  }
  func.func @transform_14(%arg0: i32, %arg1: i32) -> (i32, i32) {
    %c0_i32 = arith.constant 0 : i32
    %c0_i32_0 = arith.constant 0 : i32
    %c0_i32_1 = arith.constant 0 : i32
    return %c0_i32, %c0_i32_0 : i32, i32
  }
  func.func @transform_15(%arg0: i32, %arg1: i32) -> (i32, i32) {
    %c0_i32 = arith.constant 0 : i32
    %c0_i32_0 = arith.constant 0 : i32
    %c0_i32_1 = arith.constant 0 : i32
    return %c0_i32, %c0_i32_0 : i32, i32
  }
  func.func @transform_16(%arg0: i32, %arg1: i32) -> (i32, i32) {
    %c0_i32 = arith.constant 0 : i32
    %c0_i32_0 = arith.constant 0 : i32
    %c0_i32_1 = arith.constant 0 : i32
    return %c0_i32, %c0_i32_0 : i32, i32
  }
  func.func @transform_17(%arg0: i32, %arg1: i32) -> (i32, i32, i32) {
    %c0_i32 = arith.constant 0 : i32
    %c0_i32_0 = arith.constant 0 : i32
    return %arg0, %arg1, %c0_i32 : i32, i32, i32
  }
}

</mosaic_0001>

<bundles_post_ra>
// kernel: tpu_custom_call.1
= control target key start
LH: loop header
LB: loop body
LE: loop exit
PB: predicated region body
PF: predicated region fallthrough
CT: control target
= control target key end

     0   :  { %s3230_s0 = inlined_call_operand.vmem [shape: f32[2,8,32], index: 0, kind: input, shape index: {}]   ;;  %s3231_s1 = inlined_call_operand.vmem [shape: f32[1,32], index: 1, kind: input, shape index: {}]   ;;  %s3232_s2 = inlined_call_operand.vmem [shape: f32[1,32], index: 2, kind: input, shape index: {}]   ;;  %s3233_s3 = inlined_call_operand.vmem [shape: bf16[32,96], index: 3, kind: input, shape index: {}]   ;;  %s3234_s4 = inlined_call_operand.vmem [shape: f32[1,96], index: 4, kind: input, shape index: {}]   ;;  %s3235_s5 = inlined_call_operand.vmem [shape: bf16[4,8,32], index: 5, kind: input, shape index: {}]   ;;  %s3236_s6 = inlined_call_operand.vmem [shape: f32[1,32], index: 6, kind: input, shape index: {}]   ;;  %s3237_s7 = inlined_call_operand.vmem [shape: f32[8,8], index: 7, kind: input, shape index: {}]   ;;  %s3238_s8 = inlined_call_operand.vmem [shape: f32[8,8], index: 8, kind: input, shape index: {}]   ;;  %s3239_s9 = inlined_call_operand.vmem [shape: f32[1,32], index: 9, kind: input, shape index: {}]   ;;  %s3240_s10 = inlined_call_operand.vmem [shape: f32[1,32], index: 10, kind: input, shape index: {}]   ;;  %s3241_s11 = inlined_call_operand.vmem [shape: f32[1,32], index: 11, kind: input, shape index: {}]   ;;  %s3242_s12 = inlined_call_operand.vmem [shape: bf16[32,128], index: 12, kind: input, shape index: {}]   ;;  %s3243_s13 = inlined_call_operand.vmem [shape: f32[1,128], index: 13, kind: input, shape index: {}]   ;;  %s3244_s14 = inlined_call_operand.vmem [shape: bf16[128,32], index: 14, kind: input, shape index: {}]   ;;  %s3245_s15 = inlined_call_operand.vmem [shape: f32[1,32], index: 15, kind: input, shape index: {}]   ;;  %s3246_s16 = inlined_call_operand.vmem [shape: f32[1,32], index: 16, kind: input, shape index: {}]   ;;  %s3247_s17 = inlined_call_operand.hbm [shape: f32[2,8,32], index: 17, kind: output, shape index: {}]  }
   0x1   :  { %3251 = sst [smem:[#allocation11_spill]] %s3230_s0 }
   0x2   :  { %3252 = sst [smem:[#allocation12_spill]] %s3231_s1 }
   0x3   :  { %3253 = sst [smem:[#allocation13_spill]] %s3232_s2 }
   0x4   :  { %3254 = sst [smem:[#allocation14_spill]] %s3233_s3 }
   0x5   :  { %3255 = sst [smem:[#allocation15_spill]] %s3234_s4 }
   0x6   :  { %22 = vsyncpa [#allocation6], 0 }
   0x7   :  { %24 = vsyncpa [#allocation6 + $0x1], 0  ;;  %s2817_s24 = smov 0   ;;  %s2819_s25 = smov 0  }
   0x8   :  { %s2821_s26 = smov 0   ;;  %s2823_s27 = smov 0  }
   0x9   :  { %s2825_s28 = smov 0   ;;  %s2827_s29 = smov 0  }
   0xa LB: > { %3256 = sst [smem:[#allocation8_spill]] %s2687_s24  ;;  %s2318_s0 = sadd.s32 4294967295, %s2707_s29   ;;  %s2707_s29 = sphi %s2827_s29, %s30_s29   ;;  %s2703_s28 = sphi %s2825_s28, %s3268_s28   ;;  %s2699_s27 = sphi %s2823_s27, %s3267_s27   ;;  %s2695_s26 = sphi %s2821_s26, %s3271_s26   ;;  %s2691_s25 = sphi %s2819_s25, %s3270_s25   ;;  %s2687_s24 = sphi %s2817_s24, %s3269_s24  }
   0xb   : > { %3257 = sst [smem:[#allocation9_spill]] %s2703_s28  ;;  %s2319_s30 = sadd.s32 4294967294, %s2707_s29  }
   0xc   : > { %s42_s18 = sadd.s32 1, %s2703_s28  ;;  %s413_s19 = sadd.s32 1, %s2695_s26 }
   0xd   : > { %p44_p0 = scmp.ge.s32.totalorder %s42_s18, 2  ;;  %p423_p1 = scmp.ne.s32.totalorder %s2695_s26, %s2691_s25 }
   0xe   : > { %p424_p2 = scmp.eq.s32.totalorder %s2318_s0, 1  ;;  %p429_p3 = scmp.ne.s32.totalorder %s2691_s25, %s2687_s24 }
   0xf   : > { %s3273_s18 = smov (%p44_p0, %s42_s18), 0  ;;  %p430_p5 = scmp.eq.s32.totalorder %s2319_s30, 1 }
  0x10   : > { %3258 = sst [smem:[#allocation10_spill]] %s3273_s18  ;;  %p2857_p4 = por %p424_p2, %p423_p1 }
  0x11   : > { %s408_s20 = ssub.s32 %s2703_s28, %s3273_s18  ;;  %p2322_p6 = scmp.ge.s32.totalorder %s2707_s29, 1 }
  0x12   : > { %p411_p7 = scmp.eq.s32.totalorder %s408_s20, 0  ;;  %p2864_p8 = por %p430_p5, %p429_p3 }
  0x13   : > { %p503_p9 = scmp.lt.s32.totalorder %s2707_s29, 3 }
  0x14   : > { %s2870_s22 = scalar_select %p411_p7, %s2695_s26, %s413_s19  }
  0x15   : > { %p504_p10 = pnand %p2322_p6, %p503_p9 }
  0x16   : > { %p554_p11 = scmp.lt.s32.totalorder (!%p504_p10), %s2699_s27, 1  ;;  %s3261_s18 = sld [smem:[#allocation11_spill]] (!%p504_p10) }
  0x17   : > { %507 = sbr.rel (%p504_p10) target bundleno = 2614 (0xa36), region = 88  ;;  %s3262_s3 = sld [smem:[#allocation14_spill]] (!%p504_p10) }
  0x18   : > { %s3264_s2 = sld [smem:[#allocation13_spill]] (!%p504_p10)  ;;  %s2715_s30 = smov (!%p504_p10), 120  }
  0x19   : > { %s3265_s4 = sld [smem:[#allocation15_spill]] (!%p504_p10)  ;;  %s2716_s19 = smov (!%p504_p10), 112  }
  0x1a   : > { %s2717_s20 = smov (!%p504_p10), 104   ;;  %s2720_s24 = smov (!%p504_p10), 124  }
  0x1c   : > { %s555_s23 = scalar_select %p554_p11, %s2699_s27, 1  ;;  %vm564_vm0 = vcmask 261120   ;;  %v2709_v8 = vmov 0.0   ;;  %vm2710_vm1 = vmmov 0   ;;  %v2718_v26 = vmov 1983009808  }
  0x1d   : > { %v2597_v7 = vld [vmem:[%s3262_s3 + $0x8] sm:$0xff]   ;;  %2417 = vmatprep.subr.bf16.mxu0 %v2709_v8  ;;  %2421 = vmatprep.mubr.msk.bf16.mxu0 %vm2710_vm1, %v2709_v8  ;;  %v2598_v9 = vld [vmem:[%s3262_s3] sm:$0xff]   ;;  %v699_v27 = vunpack.c.l.s4 %v2718_v26  ;;  %v701_v28 = vlaneseq  ;;  %v2719_v30 = vmov 1934713408   ;;  %vm1162_vm2 = vcmask 31744  }
  0x1e   : > { %s2324_s0 = sshll.u32 %s555_s23, 3  ;;  %2418 = vmatpush3.bf16.msra.mxu0 %v2597_v7  ;;  %2443 = vmatprep.subr.bf16.mxu1 %v2709_v8  ;;  %v2326_v16 = vld [vmem:[%s3264_s2] ss:$0 sm:$0xff]  ;;  %s2713_s23 = smov 88   ;;  %v763_v31 = vunpack.c.l.s4 %v2719_v30  ;;  %vm1199_vm3 = vcmask 60416   ;;  %vm1370_vm4 = vcmask 1043456  }
  0x1f   : > { %s557_s28 = scalar_lea.vmem %s3261_s18, %s2324_s0  ;;  %2419 = vmatprep.subr.bf16.mxu0 %v2709_v8  ;;  %2445 = vmatprep.mubr.msk.bf16.mxu1 %vm2710_vm1, %v2709_v8  ;;  %s3263_s0 = sld [smem:[#allocation12_spill]]  ;;  %v2327_v20 = vld [vmem:[%s3265_s4] ss:$0 sm:$0xff]  ;;  %v700_v32 = vunpack.c.0.s8 %v699_v27  ;;  %v702_v33 = vshrl.u32 %v701_v28, 7  ;;  %vm1366_vm5 = vcmask 64512  }
  0x20   : > { %v2877_v0 = vld [vmem:[%s557_s28] sm:$0xff]  ;;  %s2711_s28 = smov 80   ;;  %s2712_s18 = smov 96   ;;  %v764_v36 = vunpack.c.0.s8 %v763_v31 }
  0x21   : > { %v565_v1 = vsel %vm564_vm0, %v2877_v0, 0.0  ;;  %v2918_v37 = vsub.s32 %v700_v32, %v702_v33 }
  0x22   : > { %566 = vadd.xlane.f32.xlu0 %v565_v1  ;;  %2420 = vmatpush3.bf16.msra.mxu0 %v2598_v9  ;;  %v2920_v43 = vsub.s32 %v764_v36, %v702_v33 }
  0x23   : > { %2425 = vmatprep.subr.bf16.mxu0 %v2709_v8 }
  0x25   : > { %v2325_v14 = vld [vmem:[%s3263_s0] ss:$0 sm:$0xff]  ;;  %s2714_s0 = smov 72  }
  0xab   : > { %v567_v2 = vpop.xlane.xlu0 %566 }
  0xac   : > { %v569_v3 = vmul.f32 0.03125, %v567_v2 }
  0xae   : > { %v570_v4 = vsub.f32 %v2877_v0, %v569_v3 }
  0xb0   : > { %v571_v5 = vmul.f32 %v570_v4, %v570_v4 }
  0xb2   : > { %v572_v6 = vsel %vm564_vm0, %v571_v5, 0.0 }
  0xb3   : > { %573 = vadd.xlane.f32.xlu0 %v572_v6 }
 0x13c   : > { %v574_v10 = vpop.xlane.xlu0 %573 }
 0x13d   : > { %v575_v11 = vmul.f32 0.03125, %v574_v10 }
 0x13f   : > { %v576_v12 = vadd.f32 1e-06, %v575_v11 }
 0x141   : > { %2609 = vrsqrt.f32 %v576_v12 }
 0x14e   : > { %v2610_v13 = vpop.eup %2609 }
 0x14f   : > { %v578_v15 = vmul.f32 %v2610_v13, %v570_v4 }
 0x151   : > { %v586_v17 = vmul.f32 %v2325_v14, %v578_v15 }
 0x153   : > { %v594_v18 = vadd.f32 %v2326_v16, %v586_v17 }
 0x155   : > { %v595_v19 = vpack.c.bf16 %v594_v18, %v594_v18 }
 0x157   : > { %2422 = vmatmul.mubr.msk.bf16.vlgmr.msra.gmra.mxu0 %vm564_vm0, %v595_v19 }
 0x158   : > { %2427 = vmatprep.mubr.msk.bf16.mxu0 %vm2710_vm1, %v2709_v8 }
 0x217   : > { %v656_v21 = vpop.f32.mrf.mxu0 }
 0x218   : > { %v2909_v22 = vadd.f32 %v2327_v20, %v656_v21 }
 0x219   : > { %v2423_v23 = vpop.f32.mrf.mxu0 }
 0x21a   : > { %678 = vrot.lane.b32.xlu0 %v2909_v22, %s2711_s28  ;;  %672 = vrot.lane.b32.xlu1 %v2909_v22, %s2712_s18  ;;  %s2721_s28 = smov 4  }
 0x21b   : > { %v659_v24 = vpop.f32.mrf.mxu0 }
 0x21d   : > { %v2424_v25 = vpop.f32.mrf.mxu0 }
 0x21e   : > { %675 = vrot.lane.b32.xlu1 %v2909_v22, %s2713_s23 }
 0x222   : > { %681 = vrot.lane.b32.xlu1 %v2909_v22, %s2714_s0 }
 0x226   : > { %663 = vrot.lane.b32.xlu1 %v2909_v22, %s2715_s30 }
 0x22a   : > { %666 = vrot.lane.b32.xlu1 %v2909_v22, %s2716_s19  ;;  %s2722_s19 = smov 64  }
 0x22e   : > { %669 = vrot.lane.b32.xlu1 %v2909_v22, %s2717_s20  ;;  %s2723_s20 = smov 56  }
 0x28c   : > { %v673_v29 = vpop.permute.xlu1 %672  ;;  %v679_v34 = vpop.permute.xlu0 %678 }
 0x28d   : > { %v728_v38 = vcombine.low %v673_v29, %v679_v34  ;;  %v729_v39 = vcombine.high %v673_v29, %v679_v34 }
 0x28f   : > { %v736_v44 = vrot.slane %v728_v38, %v2918_v37  ;;  %v743_v45 = vrot.slane %v729_v39, %v2918_v37 }
 0x290   : > { %v676_v35 = vpop.permute.xlu1 %675 }
 0x294   : > { %v682_v40 = vpop.permute.xlu1 %681 }
 0x295   : > { %v744_v41 = vcombine.low %v676_v35, %v682_v40  ;;  %v745_v42 = vcombine.high %v676_v35, %v682_v40 }
 0x297   : > { %v752_v46 = vrot.slane %v744_v41, %v2918_v37  ;;  %v759_v47 = vrot.slane %v745_v42, %v2918_v37 }
 0x298   : > { %v664_v48 = vpop.permute.xlu1 %663 }
 0x299   : > { %v792_v49 = vcombine.low %v736_v44, %v752_v46  ;;  %v793_v50 = vcombine.high %v736_v44, %v752_v46  ;;  %v808_v51 = vcombine.low %v743_v45, %v759_v47  ;;  %v809_v52 = vcombine.high %v743_v45, %v759_v47 }
 0x29b   : > { %v800_v53 = vrot.slane %v792_v49, %v2920_v43  ;;  %v807_v54 = vrot.slane %v793_v50, %v2920_v43  ;;  %v816_v55 = vrot.slane %v808_v51, %v2920_v43  ;;  %v823_v56 = vrot.slane %v809_v52, %v2920_v43 }
 0x29c   : > { %v667_v57 = vpop.permute.xlu1 %666 }
 0x29d   : > { %v2332_v58 = vcombine.low %v800_v53, %v807_v54  ;;  %v2334_v59 = vcombine.high %v800_v53, %v807_v54  ;;  %v2336_v60 = vcombine.low %v816_v55, %v823_v56  ;;  %v2338_v61 = vcombine.high %v816_v55, %v823_v56 }
 0x29e   : > { %v696_v62 = vcombine.low %v2909_v22, %v667_v57  ;;  %v697_v63 = vcombine.high %v2909_v22, %v667_v57 }
 0x29f   : > { %v915_v1 = vrot.slane %v2332_v58, %v2918_v37  ;;  %v931_v2 = vrot.slane %v2334_v59, %v2918_v37  ;;  %v947_v3 = vrot.slane %v2336_v60, %v2918_v37  ;;  %v963_v4 = vrot.slane %v2338_v61, %v2918_v37  ;;  %v1105_v58 = vld [vmem:[%s3238_s8] sm:$0xff] }
 0x2a0   : > { %v670_v5 = vpop.permute.xlu1 %669  ;;  %v704_v11 = vrot.slane %v696_v62, %v2918_v37  ;;  %v711_v12 = vrot.slane %v697_v63, %v2918_v37  ;;  %v1104_v59 = vld [vmem:[%s3237_s7] sm:$0xff] }
 0x2a1   : > { %v712_v6 = vcombine.low %v664_v48, %v670_v5  ;;  %v713_v7 = vcombine.high %v664_v48, %v670_v5  ;;  %v980_v9 = vcombine.low %v915_v1, %v931_v2  ;;  %v1012_v10 = vcombine.low %v947_v3, %v963_v4 }
 0x2a2   : > { %v981_v13 = vcombine.high %v915_v1, %v931_v2  ;;  %v1013_v14 = vcombine.high %v947_v3, %v963_v4 }
 0x2a3   : > { %v720_v15 = vrot.slane %v712_v6, %v2918_v37  ;;  %v727_v16 = vrot.slane %v713_v7, %v2918_v37  ;;  %v988_v17 = vrot.slane %v980_v9, %v2920_v43  ;;  %v1020_v18 = vrot.slane %v1012_v10, %v2920_v43 }
 0x2a4   : > { %v995_v26 = vrot.slane %v981_v13, %v2920_v43  ;;  %v1027_v27 = vrot.slane %v1013_v14, %v2920_v43 }
 0x2a5   : > { %v760_v19 = vcombine.low %v704_v11, %v720_v15  ;;  %v761_v20 = vcombine.high %v704_v11, %v720_v15  ;;  %v776_v21 = vcombine.low %v711_v12, %v727_v16  ;;  %v777_v23 = vcombine.high %v711_v12, %v727_v16 }
 0x2a6   : > { %v2942_v24 = vcombine.high %v988_v17, %v1020_v18  ;;  %v1032_v25 = vcombine.low %v988_v17, %v1020_v18  ;;  %v1034_v36 = vcombine.low %v995_v26, %v1027_v27  ;;  %v1035_v45 = vcombine.high %v995_v26, %v1027_v27 }
 0x2a7   : > { %v768_v28 = vrot.slane %v760_v19, %v2920_v43  ;;  %v775_v29 = vrot.slane %v761_v20, %v2920_v43  ;;  %v784_v30 = vrot.slane %v776_v21, %v2920_v43  ;;  %v791_v31 = vrot.slane %v777_v23, %v2920_v43 }
 0x2a8   : > { %1124 = vrot.lane.b32.xlu0 %v2942_v24, %s2720_s24  ;;  %1122 = vrot.lane.b32.xlu1 %v1032_v25, %s2720_s24  ;;  %v1175_v1 = vmul.f32 %v1104_v59, %v1032_v25  ;;  %v1176_v7 = vmul.f32 %v1104_v59, %v2942_v24  ;;  %v1177_v14 = vmul.f32 %v1104_v59, %v1034_v36 }
 0x2a9   : > { %v2331_v32 = vcombine.low %v768_v28, %v775_v29  ;;  %v2333_v33 = vcombine.high %v768_v28, %v775_v29  ;;  %v2335_v34 = vcombine.low %v784_v30, %v791_v31  ;;  %v2337_v35 = vcombine.high %v784_v30, %v791_v31 }
 0x2aa   : > { %v1178_v19 = vmul.f32 %v1104_v59, %v1035_v45 }
 0x2ab   : > { %v908_v38 = vrot.slane %v2331_v32, %v2918_v37  ;;  %v924_v39 = vrot.slane %v2333_v33, %v2918_v37  ;;  %v940_v40 = vrot.slane %v2335_v34, %v2918_v37  ;;  %v956_v41 = vrot.slane %v2337_v35, %v2918_v37 }
 0x2ac   : > { %1126 = vrot.lane.b32.xlu0 %v1034_v36, %s2720_s24  ;;  %1146 = vrot.lane.b32.xlu1 %v1032_v25, %s2721_s28 }
 0x2ad   : > { %v964_v42 = vcombine.low %v908_v38, %v924_v39  ;;  %v996_v44 = vcombine.low %v940_v40, %v956_v41  ;;  %v965_v49 = vcombine.high %v908_v38, %v924_v39  ;;  %v997_v50 = vcombine.high %v940_v40, %v956_v41 }
 0x2af   : > { %v972_v46 = vrot.slane %v964_v42, %v2920_v43  ;;  %v1004_v47 = vrot.slane %v996_v44, %v2920_v43  ;;  %v979_v52 = vrot.slane %v965_v49, %v2920_v43  ;;  %v1011_v53 = vrot.slane %v997_v50, %v2920_v43 }
 0x2b0   : > { %1128 = vrot.lane.b32.xlu0 %v1035_v45, %s2720_s24  ;;  %1148 = vrot.lane.b32.xlu1 %v2942_v24, %s2721_s28 }
 0x2b1   : > { %v1028_v48 = vcombine.low %v972_v46, %v1004_v47  ;;  %v1029_v51 = vcombine.high %v972_v46, %v1004_v47  ;;  %v1030_v54 = vcombine.low %v979_v52, %v1011_v53  ;;  %v2967_v55 = vcombine.high %v979_v52, %v1011_v53 }
 0x2b3   : > { %v1171_v25 = vmul.f32 %v1104_v59, %v1028_v48  ;;  %v1172_v32 = vmul.f32 %v1104_v59, %v1029_v51  ;;  %v1173_v39 = vmul.f32 %v1104_v59, %v1030_v54  ;;  %v1174_v47 = vmul.f32 %v1104_v59, %v2967_v55 }
 0x2b4   : > { %1150 = vrot.lane.b32.xlu1 %v1034_v36, %s2721_s28  ;;  %1114 = vrot.lane.b32.xlu0 %v1028_v48, %s2720_s24 }
 0x2b8   : > { %1152 = vrot.lane.b32.xlu1 %v1035_v45, %s2721_s28  ;;  %1116 = vrot.lane.b32.xlu0 %v1029_v51, %s2720_s24 }
 0x2bc   : > { %1138 = vrot.lane.b32.xlu1 %v1028_v48, %s2721_s28  ;;  %1118 = vrot.lane.b32.xlu0 %v1030_v54, %s2720_s24 }
 0x2c0   : > { %1140 = vrot.lane.b32.xlu1 %v1029_v51, %s2721_s28  ;;  %1120 = vrot.lane.b32.xlu0 %v2967_v55, %s2720_s24  ;;  %s2724_s24 = smov 48  }
 0x2c4   : > { %1142 = vrot.lane.b32.xlu1 %v1030_v54, %s2721_s28 }
 0x2c8   : > { %1144 = vrot.lane.b32.xlu1 %v2967_v55, %s2721_s28  ;;  %s2725_s28 = smov 40  }
 0x31a   : > { %v1125_v56 = vpop.permute.xlu0 %1124  ;;  %v1123_v57 = vpop.permute.xlu1 %1122 }
 0x31e   : > { %v1127_v60 = vpop.permute.xlu0 %1126  ;;  %v1147_v61 = vpop.permute.xlu1 %1146 }
 0x31f   : > { %v1167_v62 = vsel %vm1162_vm2, %v1123_v57, %v1147_v61 }
 0x320   : > { %v1183_v63 = vmul.f32 %v1167_v62, %v1105_v58 }
 0x322   : > { %v1129_v2 = vpop.permute.xlu0 %1128  ;;  %v1149_v3 = vpop.permute.xlu1 %1148  ;;  %v1191_v4 = vadd.f32 %v1183_v63, %v1175_v1 }
 0x323   : > { %v1168_v5 = vsel %vm1162_vm2, %v1125_v56, %v1149_v3 }
 0x324   : > { %v1184_v6 = vmul.f32 %v1168_v5, %v1105_v58  ;;  %1204 = vxpose.xlu0.b32.start.end [1/1] (short) (narrow) %v1191_v4, 8 }
 0x326   : > { %v1151_v9 = vpop.permute.xlu1 %1150  ;;  %v1192_v10 = vadd.f32 %v1184_v6, %v1176_v7  ;;  %v1115_v12 = vpop.permute.xlu0 %1114 }
 0x327   : > { %v1169_v11 = vsel %vm1162_vm2, %v1127_v60, %v1151_v9 }
 0x328   : > { %v1185_v13 = vmul.f32 %v1169_v11, %v1105_v58  ;;  %1238 = vxpose.xlu1.b32.start.end [1/1] (short) (narrow) %v1192_v10, 8 }
 0x32a   : > { %v1153_v15 = vpop.permute.xlu1 %1152  ;;  %v1193_v16 = vadd.f32 %v1185_v13, %v1177_v14  ;;  %v1117_v20 = vpop.permute.xlu0 %1116 }
 0x32b   : > { %v1170_v17 = vsel %vm1162_vm2, %v1129_v2, %v1153_v15 }
 0x32c   : > { %v1186_v18 = vmul.f32 %v1170_v17, %v1105_v58  ;;  %1273 = vxpose.xlu0.b32.start.end [1/1] (short) (narrow) %v1193_v16, 8 }
 0x32e   : > { %v1139_v21 = vpop.permute.xlu1 %1138  ;;  %v1194_v23 = vadd.f32 %v1186_v18, %v1178_v19  ;;  %v1119_v30 = vpop.permute.xlu0 %1118 }
 0x32f   : > { %v1163_v24 = vsel %vm1162_vm2, %v1115_v12, %v1139_v21 }
 0x330   : > { %v1179_v26 = vmul.f32 %v1163_v24, %v1105_v58  ;;  %1308 = vxpose.xlu0.b32.start.end [1/1] (short) (narrow) %v1194_v23, 8 }
 0x332   : > { %v1187_v27 = vadd.f32 %v1179_v26, %v1171_v25  ;;  %v1141_v28 = vpop.permute.xlu1 %1140  ;;  %v1121_v41 = vpop.permute.xlu0 %1120 }
 0x333   : > { %v1164_v29 = vsel %vm1162_vm2, %v1117_v20, %v1141_v28 }
 0x334   : > { %v1195_v31 = vpack.c.bf16 %v1187_v27, %v1187_v27  ;;  %v1180_v33 = vmul.f32 %v1164_v29, %v1105_v58 }
 0x336   : > { %1200 = vst.msk [vmem:[#allocation2] sm:$0xf] %vm1199_vm3, %v1195_v31  ;;  %v1188_v34 = vadd.f32 %v1180_v33, %v1172_v32  ;;  %v1143_v35 = vpop.permute.xlu1 %1142 }
 0x337   : > { %v1165_v36 = vsel %vm1162_vm2, %v1119_v30, %v1143_v35 }
 0x338   : > { %v1196_v38 = vpack.c.bf16 %v1188_v34, %v1188_v34  ;;  %v1181_v40 = vmul.f32 %v1165_v36, %v1105_v58 }
 0x33a   : > { %1201 = vst.msk [vmem:[#allocation2 + $0x4] sm:$0xf] %vm1199_vm3, %v1196_v38  ;;  %v1189_v42 = vadd.f32 %v1181_v40, %v1173_v39  ;;  %v1145_v44 = vpop.permute.xlu1 %1144 }
 0x33b   : > { %v1166_v45 = vsel %vm1162_vm2, %v1121_v41, %v1145_v44 }
 0x33c   : > { %v1197_v46 = vpack.c.bf16 %v1189_v42, %v1189_v42  ;;  %v1182_v48 = vmul.f32 %v1166_v45, %v1105_v58 }
 0x33d   : > { %v1358_v61 = vld [vmem:[#allocation2] sm:$0xf] }
 0x33e   : > { %1202 = vst.msk [vmem:[#allocation2 + $0x8] sm:$0xf] %vm1199_vm3, %v1197_v46  ;;  %v1190_v49 = vadd.f32 %v1182_v48, %v1174_v47 }
 0x340   : > { %v1198_v50 = vpack.c.bf16 %v1190_v49, %v1190_v49 }
 0x341   : > { %v1359_v3 = vld [vmem:[#allocation2 + $0x4] sm:$0xf] }
 0x342   : > { %1203 = vst.msk [vmem:[#allocation2 + $0xc] sm:$0xf] %vm1199_vm3, %v1198_v50 }
 0x345   : > { %v1360_v7 = vld [vmem:[#allocation2 + $0x8] sm:$0xf] }
 0x349   : > { %v1361_v6 = vld [vmem:[#allocation2 + $0xc] sm:$0xf] }
 0x3a0   : > { %v1220_v51 = vpop.trf.xlu0 }
 0x3a1   : > { %v1236_v52 = vpack.c.bf16 %v1220_v51, %v1220_v51 }
 0x3a3   : > { %1237 = vst.msk [vmem:[#allocation3] sm:$0xf] %vm1199_vm3, %v1236_v52 }
 0x3a4   : > { %v1254_v53 = vpop.trf.xlu1 }
 0x3a5   : > { %v1270_v54 = vpack.c.bf16 %v1254_v53, %v1254_v53 }
 0x3a7   : > { %1272 = vst.msk [vmem:[#allocation3 + $0x4] sm:$0xf] %vm1199_vm3, %v1270_v54 }
 0x3a8   : > { %v1289_v56 = vpop.trf.xlu0 }
 0x3a9   : > { %v1305_v57 = vpack.c.bf16 %v1289_v56, %v1289_v56 }
 0x3aa   : > { %v1362_v60 = vld [vmem:[#allocation3] sm:$0xf] }
 0x3ab   : > { %1307 = vst.msk [vmem:[#allocation3 + $0x8] sm:$0xf] %vm1199_vm3, %v1305_v57  ;;  %v1372_v55 = vsel %vm1370_vm4, %v1362_v60, 0 }
 0x3ac   : > { %2426 = vmatpush3.bf16.msra.mxu0 %v1372_v55  ;;  %v1324_v58 = vpop.trf.xlu0 }
 0x3ad   : > { %v1340_v59 = vpack.c.bf16 %v1324_v58, %v1324_v58  ;;  %2431 = vmatprep.subr.bf16.mxu0 %v2709_v8 }
 0x3ae   : > { %v1363_v62 = vld [vmem:[#allocation3 + $0x4] sm:$0xf] }
 0x3af   : > { %1342 = vst.msk [vmem:[#allocation3 + $0xc] sm:$0xf] %vm1199_vm3, %v1340_v59  ;;  %2428 = vmatmul.mubr.msk.bf16.vlgmr.msra.gmra.mxu0 %vm1366_vm5, %v1358_v61  ;;  %v1418_v63 = vsel %vm1370_vm4, %v1363_v62, 0 }
 0x3b0   : > { %2432 = vmatpush3.bf16.msra.mxu0 %v1418_v63  ;;  %2433 = vmatprep.mubr.msk.bf16.mxu0 %vm2710_vm1, %v2709_v8 }
 0x3b1   : > { %2437 = vmatprep.subr.bf16.mxu0 %v2709_v8 }
 0x3b2   : > { %v1364_v1 = vld [vmem:[#allocation3 + $0x8] sm:$0xf] }
 0x3b3   : > { %v1464_v2 = vsel %vm1370_vm4, %v1364_v1, 0 }
 0x3b6   : > { %v1365_v4 = vld [vmem:[#allocation3 + $0xc] sm:$0xf] }
 0x3b7   : > { %2434 = vmatmul.mubr.msk.bf16.vlgmr.msra.gmra.mxu0 %vm1366_vm5, %v1359_v3  ;;  %v1510_v5 = vsel %vm1370_vm4, %v1365_v4, 0 }
 0x3b8   : > { %2444 = vmatpush3.bf16.msra.mxu1 %v1510_v5  ;;  %2438 = vmatpush3.bf16.msra.mxu0 %v1464_v2 }
 0x3b9   : > { %2439 = vmatprep.mubr.msk.bf16.mxu0 %vm2710_vm1, %v2709_v8  ;;  %2449 = vmatprep.subr.bf16.mxu0 %v2709_v8 }
 0x3ba   : > { %2455 = vmatprep.subr.bf16.mxu1 %v2709_v8 }
 0x3bb   : > { %2446 = vmatmul.mubr.msk.bf16.vlgmr.msra.gmra.mxu1 %vm1366_vm5, %v1361_v6 }
 0x3bc   : > { %2457 = vmatprep.mubr.msk.bf16.mxu1 %vm2710_vm1, %v2709_v8 }
 0x3bf   : > { %2440 = vmatmul.mubr.msk.bf16.vlgmr.msra.gmra.mxu0 %vm1366_vm5, %v1360_v7 }
 0x3c0   : > { %2451 = vmatprep.mubr.msk.bf16.mxu0 %vm2710_vm1, %v2709_v8 }
 0x46f   : > { %v1408_v9 = vpop.f32.mrf.mxu0 }
 0x470   : > { %v1552_v10 = vsel %vm1366_vm5, %v1408_v9, -inf }
 0x471   : > { %1553 = vmax.xlane.f32.xlu0 %v1552_v10  ;;  %v2429_v11 = vpop.f32.mrf.mxu0 }
 0x473   : > { %v1411_v12 = vpop.f32.mrf.mxu0 }
 0x475   : > { %v2430_v13 = vpop.f32.mrf.mxu0 }
 0x477   : > { %v1454_v14 = vpop.f32.mrf.mxu0 }
 0x478   : > { %v1555_v15 = vsel %vm1366_vm5, %v1454_v14, -inf }
 0x479   : > { %1556 = vmax.xlane.f32.xlu1 %v1555_v15  ;;  %v2435_v16 = vpop.f32.mrf.mxu0 }
 0x47b   : > { %v1457_v17 = vpop.f32.mrf.mxu0  ;;  %v1546_v18 = vpop.f32.mrf.mxu1 }
 0x47c   : > { %v1561_v19 = vsel %vm1366_vm5, %v1546_v18, -inf }
 0x47d   : > { %v2447_v20 = vpop.f32.mrf.mxu1  ;;  %1562 = vmax.xlane.f32.xlu0 %v1561_v19  ;;  %v2436_v21 = vpop.f32.mrf.mxu0 }
 0x47f   : > { %v1500_v23 = vpop.f32.mrf.mxu0  ;;  %v1549_v24 = vpop.f32.mrf.mxu1 }
 0x480   : > { %v1558_v25 = vsel %vm1366_vm5, %v1500_v23, -inf }
 0x481   : > { %v2448_v26 = vpop.f32.mrf.mxu1  ;;  %1559 = vmax.xlane.f32.xlu1 %v1558_v25  ;;  %v2441_v27 = vpop.f32.mrf.mxu0 }
 0x483   : > { %v1503_v28 = vpop.f32.mrf.mxu0 }
 0x485   : > { %v2442_v29 = vpop.f32.mrf.mxu0 }
 0x492   : > { %684 = vrot.lane.b32.xlu1 %v2909_v22, %s2722_s19  ;;  %s2375_s19 = sshll.u32 %s2699_s27, 7  ;;  %s2726_s27 = smov [#allocation5]  }
 0x493   : > { %687 = vrot.lane.b32.xlu0 %v2909_v22, %s2723_s20  ;;  %s3189_s18 = scalar_lea.hbm %s3247_s17, %s2375_s19 }
 0x496   : > { %690 = vrot.lane.b32.xlu1 %v2909_v22, %s2724_s24  ;;  %s551_s24 = sand.u32 1, %s2691_s25  }
 0x497   : > { %s2232_s23 = scalar_lea.sflag [#allocation6], %s551_s24 }
 0x49a   : > { %693 = vrot.lane.b32.xlu1 %v2909_v22, %s2725_s28  ;;  %s2323_s28 = sshll.u32 %s551_s24, 3 }
 0x49b   : > { %s553_s20 = scalar_lea.vmem [#allocation5], %s2323_s28  ;;  %s2635_s28 = sshll.u32 %s2726_s27, 4  ;;  %s2636_s28 = int_to_ptr.vmem [resolvable:$false] %s2635_s28 }
 0x49c   : > { %s2246_s2 = sshll.u32 %s553_s20, 4  ;;  %s2637_s30 = scalar_lea.vmem %s2636_s28, 256  ;;  %s2247_s2 = int_to_ptr.vmem [resolvable:$true] %s2246_s2 }
 0x49d   : > { %s2631_s0 = scalar_lea.vmem %s2247_s2, 128  ;;  %p2638_p1 = scmp.lt.s32.totalorder %s2247_s2, %s2636_s28 }
 0x49e   : > { %p2632_p12 = scmp.ne.s32.totalorder %s2247_s2, %s2631_s0  ;;  %p2639_p2 = scmp.lt.s32.totalorder %s2637_s30, %s2631_s0 }
 0x4a0   : > { %p2633_p13 = pnand %p2632_p12, %p2857_p4  ;;  %p2640_p3 = por %p2639_p2, %p2638_p1 }
 0x4a2   : > { %p2634_p0 = pneg %p2633_p13 }
 0x4a4   : > { %p2641_p5 = pnand %p2640_p3, %p2634_p0 }
 0x4fa   : > { %v1554_v30 = vpop.xlane.xlu0 %1553 }
 0x4fb   : > { %v1564_v31 = vsub.f32 %v1408_v9, %v1554_v30 }
 0x4fd   : > { %v1568_v32 = vmul.f32 1.442695, %v1564_v31 }
 0x4ff   : > { %2611 = vpow2.f32 %v1568_v32 }
 0x502   : > { %v1557_v33 = vpop.xlane.xlu1 %1556 }
 0x503   : > { %v1565_v34 = vsub.f32 %v1454_v14, %v1557_v33 }
 0x505   : > { %v1570_v35 = vmul.f32 1.442695, %v1565_v34 }
 0x506   : > { %v1563_v36 = vpop.xlane.xlu0 %1562 }
 0x507   : > { %2613 = vpow2.f32 %v1570_v35  ;;  %v1567_v38 = vsub.f32 %v1546_v18, %v1563_v36 }
 0x509   : > { %v1574_v45 = vmul.f32 1.442695, %v1567_v38 }
 0x50a   : > { %v1560_v39 = vpop.xlane.xlu1 %1559  ;;  %v688_v51 = vpop.permute.xlu0 %687 }
 0x50b   : > { %v1566_v40 = vsub.f32 %v1500_v23, %v1560_v39 }
 0x50c   : > { %v3024_v41 = vpop.eup %2611 }
 0x50d   : > { %v1572_v42 = vmul.f32 1.442695, %v1566_v40  ;;  %v1576_v44 = vsel %vm1366_vm5, %v3024_v41, 0.0 }
 0x50e   : > { %1577 = vadd.xlane.f32.xlu0 %v1576_v44  ;;  %v685_v22 = vpop.permute.xlu1 %684 }
 0x50f   : > { %2615 = vpow2.f32 %v1572_v42 }
 0x510   : > { %2617 = vpow2.f32 %v1574_v45 }
 0x512   : > { %v691_v46 = vpop.permute.xlu1 %690 }
 0x513   : > { %v832_v48 = vcombine.low %v685_v22, %v691_v46  ;;  %v833_v49 = vcombine.high %v685_v22, %v691_v46 }
 0x514   : > { %v3028_v47 = vpop.eup %2613 }
 0x515   : > { %v1579_v50 = vsel %vm1366_vm5, %v3028_v47, 0.0  ;;  %v840_v56 = vrot.slane %v832_v48, %v2918_v37  ;;  %v847_v57 = vrot.slane %v833_v49, %v2918_v37 }
 0x516   : > { %1580 = vadd.xlane.f32.xlu1 %v1579_v50  ;;  %v694_v52 = vpop.permute.xlu1 %693 }
 0x517   : > { %v848_v53 = vcombine.low %v688_v51, %v694_v52  ;;  %v849_v54 = vcombine.high %v688_v51, %v694_v52 }
 0x519   : > { %v856_v60 = vrot.slane %v848_v53, %v2918_v37  ;;  %v863_v55 = vrot.slane %v849_v54, %v2918_v37 }
 0x51b   : > { %v864_v58 = vcombine.low %v840_v56, %v856_v60  ;;  %v865_v59 = vcombine.high %v840_v56, %v856_v60  ;;  %v880_v61 = vcombine.low %v847_v57, %v863_v55  ;;  %v881_v62 = vcombine.high %v847_v57, %v863_v55  ;;  %v1792_v60 = vld [vmem:[%s3235_s5] sm:$0xf] }
 0x51c   : > { %v3036_v63 = vpop.eup %2615  ;;  %v1845_v55 = vsel %vm1370_vm4, %v1792_v60, 0 }
 0x51d   : > { %v872_v1 = vrot.slane %v864_v58, %v2920_v43  ;;  %v879_v2 = vrot.slane %v865_v59, %v2920_v43  ;;  %v888_v3 = vrot.slane %v880_v61, %v2920_v43  ;;  %v895_v4 = vrot.slane %v881_v62, %v2920_v43  ;;  %v3044_v6 = vpop.eup %2617  ;;  %v2349_v58 = vld [vmem:[%s3235_s5 + $0x4] sm:$0xf]  ;;  %v2354_v61 = vld [vmem:[%s3235_s5 + $0xc] sm:$0xf] }
 0x51e   : > { %v1582_v5 = vsel %vm1366_vm5, %v3036_v63, 0.0  ;;  %v1585_v16 = vsel %vm1366_vm5, %v3044_v6, 0.0  ;;  %v1799_v59 = vsel %vm1370_vm4, %v2349_v58, 0 }
 0x51f   : > { %v1036_v7 = vcombine.low %v872_v1, %v879_v2  ;;  %v2339_v9 = vcombine.high %v872_v1, %v879_v2  ;;  %v1052_v10 = vcombine.low %v888_v3, %v895_v4  ;;  %v2340_v11 = vcombine.high %v888_v3, %v895_v4  ;;  %1583 = vadd.xlane.f32.xlu0 %v1582_v5  ;;  %v2352_v5 = vld [vmem:[%s3235_s5 + $0x8] sm:$0xf] }
 0x520   : > { %v1942_v1 = vsel %vm1370_vm4, %v2354_v61, 0 }
 0x521   : > { %v1043_v12 = vrot.slane %v1036_v7, %v2918_v37  ;;  %v1051_v13 = vrot.slane %v2339_v9, %v2918_v37  ;;  %v1059_v14 = vrot.slane %v1052_v10, %v2918_v37  ;;  %v1067_v15 = vrot.slane %v2340_v11, %v2918_v37 }
 0x522   : > { %v1893_v9 = vsel %vm1370_vm4, %v2352_v5, 0  ;;  %v2605_v5 = vld [vmem:[%s3244_s14 + $0x18] sm:$0xff]  }
 0x523   : > { %v1068_v17 = vcombine.low %v1043_v12, %v1051_v13  ;;  %v1069_v18 = vcombine.high %v1043_v12, %v1051_v13  ;;  %v1084_v19 = vcombine.low %v1059_v14, %v1067_v15  ;;  %v1085_v20 = vcombine.high %v1059_v14, %v1067_v15  ;;  %1586 = vadd.xlane.f32.xlu0 %v1585_v16 }
 0x525   : > { %v1076_v21 = vrot.slane %v1068_v17, %v2920_v43  ;;  %v1083_v23 = vrot.slane %v1069_v18, %v2920_v43  ;;  %v1092_v24 = vrot.slane %v1084_v19, %v2920_v43  ;;  %v1099_v25 = vrot.slane %v1085_v20, %v2920_v43 }
 0x527   : > { %v1100_v26 = vcombine.low %v1076_v21, %v1092_v24  ;;  %v1101_v27 = vcombine.high %v1076_v21, %v1092_v24  ;;  %v1102_v28 = vcombine.low %v1083_v23, %v1099_v25  ;;  %v1103_v37 = vcombine.high %v1083_v23, %v1099_v25 }
 0x529   : > { %v1343_v29 = vpack.c.bf16 %v1100_v26, %v1100_v26  ;;  %v1344_v30 = vpack.c.bf16 %v1101_v27, %v1101_v27  ;;  %v1345_v31 = vpack.c.bf16 %v1102_v28, %v1102_v28  ;;  %v1346_v32 = vpack.c.bf16 %v1103_v37, %v1103_v37 }
 0x52b   : > { %1347 = vst.msk [vmem:[#allocation4] sm:$0xf] %vm1199_vm3, %v1343_v29  ;;  %1348 = vst.msk [vmem:[#allocation4 + $0x4] sm:$0xf] %vm1199_vm3, %v1344_v30 }
 0x52c   : > { %1349 = vst.msk [vmem:[#allocation4 + $0x8] sm:$0xf] %vm1199_vm3, %v1345_v31  ;;  %1350 = vst.msk [vmem:[#allocation4 + $0xc] sm:$0xf] %vm1199_vm3, %v1346_v32 }
 0x532   : > { %v1600_v33 = vld [vmem:[#allocation4] sm:$0xf]  ;;  %v1601_v34 = vld [vmem:[#allocation4 + $0x4] sm:$0xf] }
 0x533   : > { %v1608_v43 = vsel %vm1370_vm4, %v1600_v33, 0  ;;  %v1654_v35 = vsel %vm1370_vm4, %v1601_v34, 0  ;;  %v1602_v42 = vld [vmem:[#allocation4 + $0x8] sm:$0xf] }
 0x534   : > { %2450 = vmatpush3.bf16.msra.mxu0 %v1608_v43  ;;  %2456 = vmatpush3.bf16.msra.mxu1 %v1654_v35  ;;  %v1700_v22 = vsel %vm1370_vm4, %v1602_v42, 0 }
 0x535   : > { %2461 = vmatprep.subr.bf16.mxu0 %v2709_v8  ;;  %2467 = vmatprep.subr.bf16.mxu1 %v2709_v8 }
 0x597   : > { %v1578_v36 = vpop.xlane.xlu0 %1577 }
 0x598   : > { %2619 = vrcp.f32 %v1578_v36  ;;  %v2356_v36 = vld [vmem:[%s3236_s6] ss:$0 sm:$0xff] }
 0x59f   : > { %v1581_v38 = vpop.xlane.xlu1 %1580 }
 0x5a0   : > { %2621 = vrcp.f32 %v1581_v38 }
 0x5a5   : > { %v2620_v39 = vpop.eup %2619 }
 0x5a6   : > { %v1592_v40 = vmul.f32 %v2620_v39, %v3024_v41  ;;  %v1603_v41 = vld [vmem:[#allocation4 + $0xc] sm:$0xf]  ;;  %v2357_v39 = vld [vmem:[%s3239_s9] ss:$0 sm:$0xff] }
 0x5a7   : > { %v1746_v51 = vsel %vm1370_vm4, %v1603_v41, 0 }
 0x5a8   : > { %v1584_v44 = vpop.xlane.xlu0 %1583  ;;  %v1596_v45 = vpack.c.bf16 %v1592_v40, %v1592_v40 }
 0x5a9   : > { %2623 = vrcp.f32 %v1584_v44 }
 0x5aa   : > { %2452 = vmatmul.mubr.msk.bf16.vlgmr.msra.gmra.mxu0 %vm1366_vm5, %v1596_v45 }
 0x5ab   : > { %2462 = vmatpush3.bf16.msra.mxu0 %v1700_v22  ;;  %2463 = vmatprep.mubr.msk.bf16.mxu0 %vm2710_vm1, %v2709_v8 }
 0x5ac   : > { %v1587_v46 = vpop.xlane.xlu0 %1586  ;;  %2473 = vmatprep.subr.bf16.mxu0 %v2709_v8 }
 0x5ad   : > { %v2622_v48 = vpop.eup %2621  ;;  %2625 = vrcp.f32 %v1587_v46 }
 0x5ae   : > { %v1593_v49 = vmul.f32 %v2622_v48, %v3028_v47 }
 0x5b0   : > { %v1597_v50 = vpack.c.bf16 %v1593_v49, %v1593_v49 }
 0x5b2   : > { %2458 = vmatmul.mubr.msk.bf16.vlgmr.msra.gmra.mxu1 %vm1366_vm5, %v1597_v50 }
 0x5b3   : > { %2468 = vmatpush3.bf16.msra.mxu1 %v1746_v51  ;;  %2469 = vmatprep.mubr.msk.bf16.mxu1 %vm2710_vm1, %v2709_v8 }
 0x5b4   : > { %2479 = vmatprep.subr.bf16.mxu1 %v2709_v8 }
 0x5b6   : > { %v2624_v52 = vpop.eup %2623 }
 0x5b7   : > { %v1594_v53 = vmul.f32 %v2624_v52, %v3036_v63 }
 0x5b9   : > { %v1598_v54 = vpack.c.bf16 %v1594_v53, %v1594_v53 }
 0x5ba   : > { %v2626_v56 = vpop.eup %2625 }
 0x5bb   : > { %2464 = vmatmul.mubr.msk.bf16.vlgmr.msra.gmra.mxu0 %vm1366_vm5, %v1598_v54  ;;  %v1595_v47 = vmul.f32 %v2626_v56, %v3044_v6  ;;  %v2599_v54 = vld [vmem:[%s3242_s12 + $0x8] sm:$0xff]  }
 0x5bc   : > { %2475 = vmatprep.mubr.msk.bf16.mxu0 %vm2710_vm1, %v2709_v8  ;;  %2474 = vmatpush3.bf16.msra.mxu0 %v1799_v59  ;;  %v2359_v59 = vld [vmem:[%s3241_s11] ss:$0 sm:$0xff] }
 0x5bd   : > { %v1599_v57 = vpack.c.bf16 %v1595_v47, %v1595_v47  ;;  %2485 = vmatprep.subr.bf16.mxu0 %v2709_v8 }
 0x5bf   : > { %2470 = vmatmul.mubr.msk.bf16.vlgmr.msra.gmra.mxu1 %vm1366_vm5, %v1599_v57 }
 0x5c0   : > { %2481 = vmatprep.mubr.msk.bf16.mxu1 %vm2710_vm1, %v2709_v8  ;;  %2480 = vmatpush3.bf16.msra.mxu1 %v1845_v55  ;;  %v2358_v55 = vld [vmem:[%s3240_s10] ss:$0 sm:$0xff] }
 0x5c1   : > { %2491 = vmatprep.subr.bf16.mxu1 %v2709_v8 }
 0x66a   : > { %v1644_v62 = vpop.f32.mrf.mxu0 }
 0x66b   : > { %v1788_v63 = vpack.c.bf16 %v1644_v62, %v1644_v62 }
 0x66c   : > { %v2453_v2 = vpop.f32.mrf.mxu0 }
 0x66d   : > { %2482 = vmatmul.mubr.msk.bf16.vlgmr.msra.gmra.mxu1 %vm1366_vm5, %v1788_v63  ;;  %v2602_v2 = vld [vmem:[%s3244_s14 + $0x30] sm:$0xff]  }
 0x66e   : > { %v1647_v3 = vpop.f32.mrf.mxu0  ;;  %2492 = vmatpush3.bf16.msra.mxu1 %v1942_v1  ;;  %2493 = vmatprep.mubr.msk.bf16.mxu1 %vm2710_vm1, %v2709_v8  ;;  %v2601_v1 = vld [vmem:[%s3244_s14 + $0x38] sm:$0xff]  }
 0x66f   : > { %2505 = vmatprep.subr.bf16.mxu1 %v2709_v8  ;;  %v2603_v3 = vld [vmem:[%s3244_s14 + $0x28] sm:$0xff]  }
 0x670   : > { %v2454_v4 = vpop.f32.mrf.mxu0 }
 0x671   : > { %v2604_v4 = vld [vmem:[%s3244_s14 + $0x20] sm:$0xff]  }
 0x672   : > { %v1690_v6 = vpop.f32.mrf.mxu1 }
 0x673   : > { %v1789_v7 = vpack.c.bf16 %v1690_v6, %v1690_v6  ;;  %v2606_v6 = vld [vmem:[%s3244_s14 + $0x10] sm:$0xff]  }
 0x674   : > { %v2459_v10 = vpop.f32.mrf.mxu1 }
 0x675   : > { %2476 = vmatmul.mubr.msk.bf16.vlgmr.msra.gmra.mxu0 %vm1366_vm5, %v1789_v7  ;;  %v2607_v7 = vld [vmem:[%s3244_s14 + $0x8] sm:$0xff]   ;;  %v2360_v10 = vld [vmem:[%s3243_s13] ss:$0 sm:$0xff] }
 0x676   : > { %v1693_v11 = vpop.f32.mrf.mxu1  ;;  %2486 = vmatpush3.bf16.msra.mxu0 %v1893_v9  ;;  %2487 = vmatprep.mubr.msk.bf16.mxu0 %vm2710_vm1, %v2709_v8  ;;  %v2608_v9 = vld [vmem:[%s3244_s14] sm:$0xff]  }
 0x677   : > { %2497 = vmatprep.subr.bf16.mxu0 %v2709_v8 }
 0x678   : > { %v2460_v12 = vpop.f32.mrf.mxu1 }
 0x67b   : > { %v1736_v13 = vpop.f32.mrf.mxu0 }
 0x67c   : > { %v1790_v14 = vpack.c.bf16 %v1736_v13, %v1736_v13 }
 0x67d   : > { %v2465_v15 = vpop.f32.mrf.mxu0 }
 0x67e   : > { %2488 = vmatmul.mubr.msk.bf16.vlgmr.msra.gmra.mxu0 %vm1366_vm5, %v1790_v14 }
 0x67f   : > { %v1739_v16 = vpop.f32.mrf.mxu0  ;;  %v1782_v17 = vpop.f32.mrf.mxu1  ;;  %2501 = vmatprep.mubr.msk.bf16.mxu0 %vm2710_vm1, %v2709_v8  ;;  %2498 = vmatpush3.bf16.msra.mxu0 %v2599_v54 }
 0x680   : > { %v1791_v18 = vpack.c.bf16 %v1782_v17, %v1782_v17  ;;  %2499 = vmatprep.subr.bf16.mxu0 %v2709_v8 }
 0x681   : > { %v2466_v19 = vpop.f32.mrf.mxu0  ;;  %v2471_v20 = vpop.f32.mrf.mxu1 }
 0x682   : > { %2494 = vmatmul.mubr.msk.bf16.vlgmr.msra.gmra.mxu1 %vm1366_vm5, %v1791_v18 }
 0x683   : > { %v1785_v21 = vpop.f32.mrf.mxu1  ;;  %2521 = vmatprep.mubr.msk.bf16.mxu1 %vm2710_vm1, %v2709_v8  ;;  %2506 = vmatpush3.bf16.msra.mxu1 %v2601_v1 }
 0x684   : > { %2507 = vmatprep.subr.bf16.mxu1 %v2709_v8 }
 0x685   : > { %v2472_v23 = vpop.f32.mrf.mxu1 }
 0x687   : > { %2508 = vmatpush3.bf16.msra.mxu1 %v2602_v2 }
 0x688   : > { %2509 = vmatprep.subr.bf16.mxu1 %v2709_v8 }
 0x68b   : > { %2510 = vmatpush3.bf16.msra.mxu1 %v2603_v3 }
 0x68c   : > { %2511 = vmatprep.subr.bf16.mxu1 %v2709_v8 }
 0x68f   : > { %2512 = vmatpush3.bf16.msra.mxu1 %v2604_v4 }
 0x690   : > { %2513 = vmatprep.subr.bf16.mxu1 %v2709_v8 }
 0x693   : > { %2514 = vmatpush3.bf16.msra.mxu1 %v2605_v5 }
 0x694   : > { %2515 = vmatprep.subr.bf16.mxu1 %v2709_v8 }
 0x697   : > { %2516 = vmatpush3.bf16.msra.mxu1 %v2606_v6 }
 0x698   : > { %2517 = vmatprep.subr.bf16.mxu1 %v2709_v8 }
 0x69b   : > { %2518 = vmatpush3.bf16.msra.mxu1 %v2607_v7 }
 0x69c   : > { %2519 = vmatprep.subr.bf16.mxu1 %v2709_v8 }
 0x69f   : > { %2520 = vmatpush3.bf16.msra.mxu1 %v2608_v9 }
 0x72d   : > { %v1881_v24 = vpop.f32.mrf.mxu1 }
 0x72f   : > { %v2483_v25 = vpop.f32.mrf.mxu1 }
 0x731   : > { %v1884_v26 = vpop.f32.mrf.mxu1 }
 0x732   : > { %v2364_v26 = vld [vmem:[%s3245_s15] ss:$0 sm:$0xff] }
 0x733   : > { %v2484_v27 = vpop.f32.mrf.mxu1 }
 0x735   : > { %v1835_v28 = vpop.f32.mrf.mxu0 }
 0x736   : > { %v1882_v32 = vadd.f32 %v1881_v24, %v1835_v28  ;;  %v2373_v28 = vld [vmem:[%s3246_s16] ss:$0 sm:$0xff] }
 0x737   : > { %v2477_v37 = vpop.f32.mrf.mxu0 }
 0x739   : > { %v1838_v29 = vpop.f32.mrf.mxu0 }
 0x73b   : > { %v2478_v30 = vpop.f32.mrf.mxu0 }
 0x73e   : > { %v1929_v31 = vpop.f32.mrf.mxu0 }
 0x73f   : > { %v1935_v34 = vadd.f32 %v1929_v31, %v1882_v32 }
 0x740   : > { %v2489_v33 = vpop.f32.mrf.mxu0 }
 0x742   : > { %v1932_v43 = vpop.f32.mrf.mxu0  ;;  %v1978_v35 = vpop.f32.mrf.mxu1 }
 0x743   : > { %v1984_v38 = vadd.f32 %v1978_v35, %v1935_v34 }
 0x744   : > { %v2490_v40 = vpop.f32.mrf.mxu0  ;;  %v2495_v42 = vpop.f32.mrf.mxu1 }
 0x745   : > { %v1992_v44 = vadd.f32 %v2356_v36, %v1984_v38 }
 0x746   : > { %v1981_v45 = vpop.f32.mrf.mxu1 }
 0x747   : > { %v2000_v22 = vmul.f32 %v2357_v39, %v1992_v44 }
 0x748   : > { %v2496_v46 = vpop.f32.mrf.mxu1 }
 0x749   : > { %v3123_v48 = vadd.f32 %v2000_v22, %v2877_v0  ;;  %v2600_v0 = vld [vmem:[%s3242_s12] sm:$0xff]  }
 0x74a   : > { %2500 = vmatpush3.bf16.msra.mxu0 %v2600_v0 }
 0x74b   : > { %v2003_v49 = vsel %vm564_vm0, %v3123_v48, 0.0 }
 0x74c   : > { %2004 = vadd.xlane.f32.xlu1 %v2003_v49 }
 0x7d5   : > { %v2005_v41 = vpop.xlane.xlu1 %2004 }
 0x7d6   : > { %v2007_v50 = vmul.f32 0.03125, %v2005_v41 }
 0x7d8   : > { %v2008_v51 = vsub.f32 %v3123_v48, %v2007_v50 }
 0x7da   : > { %v2009_v52 = vmul.f32 %v2008_v51, %v2008_v51 }
 0x7dc   : > { %v2010_v53 = vsel %vm564_vm0, %v2009_v52, 0.0 }
 0x7dd   : > { %2011 = vadd.xlane.f32.xlu0 %v2010_v53 }
 0x866   : > { %v2012_v56 = vpop.xlane.xlu0 %2011 }
 0x867   : > { %v2013_v47 = vmul.f32 0.03125, %v2012_v56 }
 0x869   : > { %v2014_v57 = vadd.f32 1e-06, %v2013_v47 }
 0x86b   : > { %2627 = vrsqrt.f32 %v2014_v57 }
 0x878   : > { %v2628_v60 = vpop.eup %2627 }
 0x879   : > { %v2016_v58 = vmul.f32 %v2628_v60, %v2008_v51 }
 0x87b   : > { %v2024_v61 = vmul.f32 %v2358_v55, %v2016_v58 }
 0x87d   : > { %v2032_v62 = vadd.f32 %v2359_v59, %v2024_v61 }
 0x87f   : > { %v2033_v63 = vpack.c.bf16 %v2032_v62, %v2032_v62 }
 0x881   : > { %2502 = vmatmul.mubr.msk.bf16.vlgmr.msra.gmra.mxu0 %vm564_vm0, %v2033_v63 }
 0x941   : > { %v2094_v11 = vpop.f32.mrf.mxu0 }
 0x942   : > { %v2095_v12 = vadd.f32 %v2360_v10, %v2094_v11 }
 0x943   : > { %v2503_v13 = vpop.f32.mrf.mxu0 }
 0x944   : > { %v2101_v14 = vmul.f32 0.044715, %v2095_v12  ;;  %v2100_v8 = vmul.f32 0.5, %v2095_v12 }
 0x945   : > { %v2097_v15 = vpop.f32.mrf.mxu0 }
 0x946   : > { %v2102_v16 = vmul.f32 %v2101_v14, %v2095_v12 }
 0x947   : > { %v2504_v17 = vpop.f32.mrf.mxu0 }
 0x948   : > { %v2103_v18 = vmul.f32 %v2102_v16, %v2095_v12 }
 0x94a   : > { %v2104_v19 = vadd.f32 %v2103_v18, %v2095_v12 }
 0x94c   : > { %v2105_v20 = vmul.f32 0.7978846, %v2104_v19 }
 0x94e   : > { %2629 = vtanh.f32 %v2105_v20 }
 0x95b   : > { %v2630_v21 = vpop.eup %2629 }
 0x95c   : > { %v2107_v23 = vadd.f32 1.0, %v2630_v21 }
 0x95e   : > { %v2108_v24 = vmul.f32 %v2107_v23, %v2100_v8 }
 0x960   : > { %v2109_v25 = vpack.c.bf16 %v2108_v24, %v2108_v24 }
 0x962   : > { %2522 = vmatmul.mubr.bf16.vlgmr.msra.gmra.mxu1 %v2109_v25 }
 0xa22   : > { %v2215_v27 = vpop.f32.mrf.mxu1 }
 0xa23   : > { %v2216_v37 = vadd.f32 %v2364_v26, %v2215_v27 }
 0xa24   : > { %v2523_v29 = vpop.f32.mrf.mxu1 }
 0xa25   : > { %v2228_v30 = vmul.f32 %v2373_v28, %v2216_v37 }
 0xa26   : > { %v2218_v31 = vpop.f32.mrf.mxu1 }
 0xa27   : > { %v2229_v32 = vadd.f32 %v2228_v30, %v3123_v48 }
 0xa28   : > { %v2524_v33 = vpop.f32.mrf.mxu1 }
 0xa29   : > { %2230 = vst.msk [vmem:[%s553_s20] sm:$0xff] %vm564_vm0, %v2229_v32 }
 0xa2a   : > { %2644 = shalt.err (!%p2641_p5)
}
 0xa2b   : > { %s2645_s3 = scalar_lea.hbm %s3189_s18, 128  ;;  %s2649_s19 = scalar_lea.hbm %s3247_s17, 256 }
 0xa2c   : > { %p2646_p6 = scmp.ne.s32.totalorder %s3189_s18, %s2645_s3  ;;  %p2650_p10 = scmp.lt.s32.totalorder %s3189_s18, %s3247_s17 }
 0xa2d   : > { %p2651_p11 = scmp.lt.s32.totalorder %s2649_s19, %s2645_s3 }
 0xa2e   : > { %p2647_p7 = pnand %p2646_p6, %p2857_p4 }
 0xa2f   : > { %p2652_p12 = por %p2651_p11, %p2650_p10 }
 0xa30   : > { %p2648_p9 = pneg %p2647_p7 }
 0xa32   : > { %p2653_p13 = pnand %p2652_p12, %p2648_p9 }
 0xa34   : > { %2656 = shalt.err (!%p2653_p13)
}
 0xa35   : > { %2525 = dma.vmem_to_hbm [thread:$0]  (%p2857_p4), %s2247_s2, 128, %s3189_s18, %s2232_s23  }
 0xa36 PF: > { %s3266_s0 = sld [smem:[#allocation8_spill]]  ;;  %p2531_p0 = scmp.ge.s32.totalorder %s2707_s29, 2 }
 0xa38   : > { %p2528_p1 = pnand %p2531_p0, %p2864_p8 }
 0xa3a   : > { %p2529_p2 = pneg %p2528_p1 }
 0xa3c   : > { %s2258_s28 = sand.u32 1, %s3266_s0  }
 0xa3d   : > { %s2259_s30 = scalar_lea.sflag [#allocation6], %s2258_s28 }
 0xa3e   : > { %2682 = dma.done.wait (%p2529_p2), %s2259_s30, 128  }
 0xa3f   : > { %2684 = vsyncadd (%p2529_p2), %s2259_s30, 4294967168  ;;  %s30_s29 = sadd.s32 1, %s2707_s29   ;;  %s3267_s27 = sld [smem:[#allocation9_spill]] }
 0xa40   : > { %p27_p3 = scmp.ge.s32.totalorder %s30_s29, 4   ;;  %s3268_s28 = sld [smem:[#allocation10_spill]] }
 0xa41   : > { %s3269_s24 = smov %s2691_s25  ;;  %s3270_s25 = smov %s2695_s26 }
 0xa42   : > { %s3271_s26 = smov %s2870_s22  ;;  %29 = sbr.rel (!%p27_p3) target bundleno = 10 (0xa), region = 135 }
 0xa47   :  { %2264 = vsyncpa [#allocation6], 1 }
 0xa48   :  { %2266 = vsyncpa [#allocation6 + $0x1], 1 }

// kernel: tpu_custom_call.1
= control target key start
LH: loop header
LB: loop body
LE: loop exit
PB: predicated region body
PF: predicated region fallthrough
CT: control target
= control target key end

     0   :  { %s3230_s0 = inlined_call_operand.vmem [shape: f32[2,8,32], index: 0, kind: input, shape index: {}]   ;;  %s3231_s1 = inlined_call_operand.vmem [shape: f32[1,32], index: 1, kind: input, shape index: {}]   ;;  %s3232_s2 = inlined_call_operand.vmem [shape: f32[1,32], index: 2, kind: input, shape index: {}]   ;;  %s3233_s3 = inlined_call_operand.vmem [shape: bf16[32,96], index: 3, kind: input, shape index: {}]   ;;  %s3234_s4 = inlined_call_operand.vmem [shape: f32[1,96], index: 4, kind: input, shape index: {}]   ;;  %s3235_s5 = inlined_call_operand.vmem [shape: bf16[4,8,32], index: 5, kind: input, shape index: {}]   ;;  %s3236_s6 = inlined_call_operand.vmem [shape: f32[1,32], index: 6, kind: input, shape index: {}]   ;;  %s3237_s7 = inlined_call_operand.vmem [shape: f32[8,8], index: 7, kind: input, shape index: {}]   ;;  %s3238_s8 = inlined_call_operand.vmem [shape: f32[8,8], index: 8, kind: input, shape index: {}]   ;;  %s3239_s9 = inlined_call_operand.vmem [shape: f32[1,32], index: 9, kind: input, shape index: {}]   ;;  %s3240_s10 = inlined_call_operand.vmem [shape: f32[1,32], index: 10, kind: input, shape index: {}]   ;;  %s3241_s11 = inlined_call_operand.vmem [shape: f32[1,32], index: 11, kind: input, shape index: {}]   ;;  %s3242_s12 = inlined_call_operand.vmem [shape: bf16[32,128], index: 12, kind: input, shape index: {}]   ;;  %s3243_s13 = inlined_call_operand.vmem [shape: f32[1,128], index: 13, kind: input, shape index: {}]   ;;  %s3244_s14 = inlined_call_operand.vmem [shape: bf16[128,32], index: 14, kind: input, shape index: {}]   ;;  %s3245_s15 = inlined_call_operand.vmem [shape: f32[1,32], index: 15, kind: input, shape index: {}]   ;;  %s3246_s16 = inlined_call_operand.vmem [shape: f32[1,32], index: 16, kind: input, shape index: {}]   ;;  %s3247_s17 = inlined_call_operand.hbm [shape: f32[2,8,32], index: 17, kind: output, shape index: {}]  }
   0x1   :  { %3251 = sst [smem:[#allocation11_spill]] %s3230_s0 }
   0x2   :  { %3252 = sst [smem:[#allocation12_spill]] %s3231_s1 }
   0x3   :  { %3253 = sst [smem:[#allocation13_spill]] %s3232_s2 }
   0x4   :  { %3254 = sst [smem:[#allocation14_spill]] %s3233_s3 }
   0x5   :  { %3255 = sst [smem:[#allocation15_spill]] %s3234_s4 }
   0x6   :  { %22 = vsyncpa [#allocation6], 0 }
   0x7   :  { %24 = vsyncpa [#allocation6 + $0x1], 0  ;;  %s2817_s24 = smov 0   ;;  %s2819_s25 = smov 0  }
   0x8   :  { %s2821_s26 = smov 0   ;;  %s2823_s27 = smov 0  }
   0x9   :  { %s2825_s28 = smov 0   ;;  %s2827_s29 = smov 0  }
   0xa LB: > { %3256 = sst [smem:[#allocation8_spill]] %s2687_s24  ;;  %s2318_s0 = sadd.s32 4294967295, %s2707_s29   ;;  %s2707_s29 = sphi %s2827_s29, %s30_s29   ;;  %s2703_s28 = sphi %s2825_s28, %s3268_s28   ;;  %s2699_s27 = sphi %s2823_s27, %s3267_s27   ;;  %s2695_s26 = sphi %s2821_s26, %s3271_s26   ;;  %s2691_s25 = sphi %s2819_s25, %s3270_s25   ;;  %s2687_s24 = sphi %s2817_s24, %s3269_s24  }
   0xb   : > { %3257 = sst [smem:[#allocation9_spill]] %s2703_s28  ;;  %s2319_s30 = sadd.s32 4294967294, %s2707_s29  }
   0xc   : > { %s42_s18 = sadd.s32 1, %s2703_s28  ;;  %s413_s19 = sadd.s32 1, %s2695_s26 }
   0xd   : > { %p44_p0 = scmp.ge.s32.totalorder %s42_s18, 2  ;;  %p423_p1 = scmp.ne.s32.totalorder %s2695_s26, %s2691_s25 }
   0xe   : > { %p424_p2 = scmp.eq.s32.totalorder %s2318_s0, 1  ;;  %p429_p3 = scmp.ne.s32.totalorder %s2691_s25, %s2687_s24 }
   0xf   : > { %s3273_s18 = smov (%p44_p0, %s42_s18), 0  ;;  %p430_p5 = scmp.eq.s32.totalorder %s2319_s30, 1 }
  0x10   : > { %3258 = sst [smem:[#allocation10_spill]] %s3273_s18  ;;  %p2857_p4 = por %p424_p2, %p423_p1 }
  0x11   : > { %s408_s20 = ssub.s32 %s2703_s28, %s3273_s18  ;;  %p2322_p6 = scmp.ge.s32.totalorder %s2707_s29, 1 }
  0x12   : > { %p411_p7 = scmp.eq.s32.totalorder %s408_s20, 0  ;;  %p2864_p8 = por %p430_p5, %p429_p3 }
  0x13   : > { %p503_p9 = scmp.lt.s32.totalorder %s2707_s29, 3 }
  0x14   : > { %s2870_s22 = scalar_select %p411_p7, %s2695_s26, %s413_s19  }
  0x15   : > { %p504_p10 = pnand %p2322_p6, %p503_p9 }
  0x16   : > { %p554_p11 = scmp.lt.s32.totalorder (!%p504_p10), %s2699_s27, 1  ;;  %s3261_s18 = sld [smem:[#allocation11_spill]] (!%p504_p10) }
  0x17   : > { %507 = sbr.rel (%p504_p10) target bundleno = 2614 (0xa36), region = 88  ;;  %s3262_s3 = sld [smem:[#allocation14_spill]] (!%p504_p10) }
  0x18   : > { %s3264_s2 = sld [smem:[#allocation13_spill]] (!%p504_p10)  ;;  %s2715_s30 = smov (!%p504_p10), 120  }
  0x19   : > { %s3265_s4 = sld [smem:[#allocation15_spill]] (!%p504_p10)  ;;  %s2716_s19 = smov (!%p504_p10), 112  }
  0x1a   : > { %s2717_s20 = smov (!%p504_p10), 104   ;;  %s2720_s24 = smov (!%p504_p10), 124  }
  0x1c   : > { %s555_s23 = scalar_select %p554_p11, %s2699_s27, 1  ;;  %vm564_vm0 = vcmask 261120   ;;  %v2709_v8 = vmov 0.0   ;;  %vm2710_vm1 = vmmov 0   ;;  %v2718_v26 = vmov 1983009808  }
  0x1d   : > { %v2597_v7 = vld [vmem:[%s3262_s3 + $0x8] sm:$0xff]   ;;  %2417 = vmatprep.subr.bf16.mxu0 %v2709_v8  ;;  %2421 = vmatprep.mubr.msk.bf16.mxu0 %vm2710_vm1, %v2709_v8  ;;  %v2598_v9 = vld [vmem:[%s3262_s3] sm:$0xff]   ;;  %v699_v27 = vunpack.c.l.s4 %v2718_v26  ;;  %v701_v28 = vlaneseq  ;;  %v2719_v30 = vmov 1934713408   ;;  %vm1162_vm2 = vcmask 31744  }
  0x1e   : > { %s2324_s0 = sshll.u32 %s555_s23, 3  ;;  %2418 = vmatpush3.bf16.msra.mxu0 %v2597_v7  ;;  %2443 = vmatprep.subr.bf16.mxu1 %v2709_v8  ;;  %v2326_v16 = vld [vmem:[%s3264_s2] ss:$0 sm:$0xff]  ;;  %s2713_s23 = smov 88   ;;  %v763_v31 = vunpack.c.l.s4 %v2719_v30  ;;  %vm1199_vm3 = vcmask 60416   ;;  %vm1370_vm4 = vcmask 1043456  }
  0x1f   : > { %s557_s28 = scalar_lea.vmem %s3261_s18, %s2324_s0  ;;  %2419 = vmatprep.subr.bf16.mxu0 %v2709_v8  ;;  %2445 = vmatprep.mubr.msk.bf16.mxu1 %vm2710_vm1, %v2709_v8  ;;  %s3263_s0 = sld [smem:[#allocation12_spill]]  ;;  %v2327_v20 = vld [vmem:[%s3265_s4] ss:$0 sm:$0xff]  ;;  %v700_v32 = vunpack.c.0.s8 %v699_v27  ;;  %v702_v33 = vshrl.u32 %v701_v28, 7  ;;  %vm1366_vm5 = vcmask 64512  }
  0x20   : > { %v2877_v0 = vld [vmem:[%s557_s28] sm:$0xff]  ;;  %s2711_s28 = smov 80   ;;  %s2712_s18 = smov 96   ;;  %v764_v36 = vunpack.c.0.s8 %v763_v31 }
  0x21   : > { %v565_v1 = vsel %vm564_vm0, %v2877_v0, 0.0  ;;  %v2918_v37 = vsub.s32 %v700_v32, %v702_v33 }
  0x22   : > { %566 = vadd.xlane.f32.xlu0 %v565_v1  ;;  %2420 = vmatpush3.bf16.msra.mxu0 %v2598_v9  ;;  %v2920_v43 = vsub.s32 %v764_v36, %v702_v33 }
  0x23   : > { %2425 = vmatprep.subr.bf16.mxu0 %v2709_v8 }
  0x25   : > { %v2325_v14 = vld [vmem:[%s3263_s0] ss:$0 sm:$0xff]  ;;  %s2714_s0 = smov 72  }
  0xab   : > { %v567_v2 = vpop.xlane.xlu0 %566 }
  0xac   : > { %v569_v3 = vmul.f32 0.03125, %v567_v2 }
  0xae   : > { %v570_v4 = vsub.f32 %v2877_v0, %v569_v3 }
  0xb0   : > { %v571_v5 = vmul.f32 %v570_v4, %v570_v4 }
  0xb2   : > { %v572_v6 = vsel %vm564_vm0, %v571_v5, 0.0 }
  0xb3   : > { %573 = vadd.xlane.f32.xlu0 %v572_v6 }
 0x13c   : > { %v574_v10 = vpop.xlane.xlu0 %573 }
 0x13d   : > { %v575_v11 = vmul.f32 0.03125, %v574_v10 }
 0x13f   : > { %v576_v12 = vadd.f32 1e-06, %v575_v11 }
 0x141   : > { %2609 = vrsqrt.f32 %v576_v12 }
 0x14e   : > { %v2610_v13 = vpop.eup %2609 }
 0x14f   : > { %v578_v15 = vmul.f32 %v2610_v13, %v570_v4 }
 0x151   : > { %v586_v17 = vmul.f32 %v2325_v14, %v578_v15 }
 0x153   : > { %v594_v18 = vadd.f32 %v2326_v16, %v586_v17 }
 0x155   : > { %v595_v19 = vpack.c.bf16 %v594_v18, %v594_v18 }
 0x157   : > { %2422 = vmatmul.mubr.msk.bf16.vlgmr.msra.gmra.mxu0 %vm564_vm0, %v595_v19 }
 0x158   : > { %2427 = vmatprep.mubr.msk.bf16.mxu0 %vm2710_vm1, %v2709_v8 }
 0x217   : > { %v656_v21 = vpop.f32.mrf.mxu0 }
 0x218   : > { %v2909_v22 = vadd.f32 %v2327_v20, %v656_v21 }
 0x219   : > { %v2423_v23 = vpop.f32.mrf.mxu0 }
 0x21a   : > { %678 = vrot.lane.b32.xlu0 %v2909_v22, %s2711_s28  ;;  %672 = vrot.lane.b32.xlu1 %v2909_v22, %s2712_s18  ;;  %s2721_s28 = smov 4  }
 0x21b   : > { %v659_v24 = vpop.f32.mrf.mxu0 }
 0x21d   : > { %v2424_v25 = vpop.f32.mrf.mxu0 }
 0x21e   : > { %675 = vrot.lane.b32.xlu1 %v2909_v22, %s2713_s23 }
 0x222   : > { %681 = vrot.lane.b32.xlu1 %v2909_v22, %s2714_s0 }
 0x226   : > { %663 = vrot.lane.b32.xlu1 %v2909_v22, %s2715_s30 }
 0x22a   : > { %666 = vrot.lane.b32.xlu1 %v2909_v22, %s2716_s19  ;;  %s2722_s19 = smov 64  }
 0x22e   : > { %669 = vrot.lane.b32.xlu1 %v2909_v22, %s2717_s20  ;;  %s2723_s20 = smov 56  }
 0x28c   : > { %v673_v29 = vpop.permute.xlu1 %672  ;;  %v679_v34 = vpop.permute.xlu0 %678 }
 0x28d   : > { %v728_v38 = vcombine.low %v673_v29, %v679_v34  ;;  %v729_v39 = vcombine.high %v673_v29, %v679_v34 }
 0x28f   : > { %v736_v44 = vrot.slane %v728_v38, %v2918_v37  ;;  %v743_v45 = vrot.slane %v729_v39, %v2918_v37 }
 0x290   : > { %v676_v35 = vpop.permute.xlu1 %675 }
 0x294   : > { %v682_v40 = vpop.permute.xlu1 %681 }
 0x295   : > { %v744_v41 = vcombine.low %v676_v35, %v682_v40  ;;  %v745_v42 = vcombine.high %v676_v35, %v682_v40 }
 0x297   : > { %v752_v46 = vrot.slane %v744_v41, %v2918_v37  ;;  %v759_v47 = vrot.slane %v745_v42, %v2918_v37 }
 0x298   : > { %v664_v48 = vpop.permute.xlu1 %663 }
 0x299   : > { %v792_v49 = vcombine.low %v736_v44, %v752_v46  ;;  %v793_v50 = vcombine.high %v736_v44, %v752_v46  ;;  %v808_v51 = vcombine.low %v743_v45, %v759_v47  ;;  %v809_v52 = vcombine.high %v743_v45, %v759_v47 }
 0x29b   : > { %v800_v53 = vrot.slane %v792_v49, %v2920_v43  ;;  %v807_v54 = vrot.slane %v793_v50, %v2920_v43  ;;  %v816_v55 = vrot.slane %v808_v51, %v2920_v43  ;;  %v823_v56 = vrot.slane %v809_v52, %v2920_v43 }
 0x29c   : > { %v667_v57 = vpop.permute.xlu1 %666 }
 0x29d   : > { %v2332_v58 = vcombine.low %v800_v53, %v807_v54  ;;  %v2334_v59 = vcombine.high %v800_v53, %v807_v54  ;;  %v2336_v60 = vcombine.low %v816_v55, %v823_v56  ;;  %v2338_v61 = vcombine.high %v816_v55, %v823_v56 }
 0x29e   : > { %v696_v62 = vcombine.low %v2909_v22, %v667_v57  ;;  %v697_v63 = vcombine.high %v2909_v22, %v667_v57 }
 0x29f   : > { %v915_v1 = vrot.slane %v2332_v58, %v2918_v37  ;;  %v931_v2 = vrot.slane %v2334_v59, %v2918_v37  ;;  %v947_v3 = vrot.slane %v2336_v60, %v2918_v37  ;;  %v963_v4 = vrot.slane %v2338_v61, %v2918_v37  ;;  %v1105_v58 = vld [vmem:[%s3238_s8] sm:$0xff] }
 0x2a0   : > { %v670_v5 = vpop.permute.xlu1 %669  ;;  %v704_v11 = vrot.slane %v696_v62, %v2918_v37  ;;  %v711_v12 = vrot.slane %v697_v63, %v2918_v37  ;;  %v1104_v59 = vld [vmem:[%s3237_s7] sm:$0xff] }
 0x2a1   : > { %v712_v6 = vcombine.low %v664_v48, %v670_v5  ;;  %v713_v7 = vcombine.high %v664_v48, %v670_v5  ;;  %v980_v9 = vcombine.low %v915_v1, %v931_v2  ;;  %v1012_v10 = vcombine.low %v947_v3, %v963_v4 }
 0x2a2   : > { %v981_v13 = vcombine.high %v915_v1, %v931_v2  ;;  %v1013_v14 = vcombine.high %v947_v3, %v963_v4 }
 0x2a3   : > { %v720_v15 = vrot.slane %v712_v6, %v2918_v37  ;;  %v727_v16 = vrot.slane %v713_v7, %v2918_v37  ;;  %v988_v17 = vrot.slane %v980_v9, %v2920_v43  ;;  %v1020_v18 = vrot.slane %v1012_v10, %v2920_v43 }
 0x2a4   : > { %v995_v26 = vrot.slane %v981_v13, %v2920_v43  ;;  %v1027_v27 = vrot.slane %v1013_v14, %v2920_v43 }
 0x2a5   : > { %v760_v19 = vcombine.low %v704_v11, %v720_v15  ;;  %v761_v20 = vcombine.high %v704_v11, %v720_v15  ;;  %v776_v21 = vcombine.low %v711_v12, %v727_v16  ;;  %v777_v23 = vcombine.high %v711_v12, %v727_v16 }
 0x2a6   : > { %v2942_v24 = vcombine.high %v988_v17, %v1020_v18  ;;  %v1032_v25 = vcombine.low %v988_v17, %v1020_v18  ;;  %v1034_v36 = vcombine.low %v995_v26, %v1027_v27  ;;  %v1035_v45 = vcombine.high %v995_v26, %v1027_v27 }
 0x2a7   : > { %v768_v28 = vrot.slane %v760_v19, %v2920_v43  ;;  %v775_v29 = vrot.slane %v761_v20, %v2920_v43  ;;  %v784_v30 = vrot.slane %v776_v21, %v2920_v43  ;;  %v791_v31 = vrot.slane %v777_v23, %v2920_v43 }
 0x2a8   : > { %1124 = vrot.lane.b32.xlu0 %v2942_v24, %s2720_s24  ;;  %1122 = vrot.lane.b32.xlu1 %v1032_v25, %s2720_s24  ;;  %v1175_v1 = vmul.f32 %v1104_v59, %v1032_v25  ;;  %v1176_v7 = vmul.f32 %v1104_v59, %v2942_v24  ;;  %v1177_v14 = vmul.f32 %v1104_v59, %v1034_v36 }
 0x2a9   : > { %v2331_v32 = vcombine.low %v768_v28, %v775_v29  ;;  %v2333_v33 = vcombine.high %v768_v28, %v775_v29  ;;  %v2335_v34 = vcombine.low %v784_v30, %v791_v31  ;;  %v2337_v35 = vcombine.high %v784_v30, %v791_v31 }
 0x2aa   : > { %v1178_v19 = vmul.f32 %v1104_v59, %v1035_v45 }
 0x2ab   : > { %v908_v38 = vrot.slane %v2331_v32, %v2918_v37  ;;  %v924_v39 = vrot.slane %v2333_v33, %v2918_v37  ;;  %v940_v40 = vrot.slane %v2335_v34, %v2918_v37  ;;  %v956_v41 = vrot.slane %v2337_v35, %v2918_v37 }
 0x2ac   : > { %1126 = vrot.lane.b32.xlu0 %v1034_v36, %s2720_s24  ;;  %1146 = vrot.lane.b32.xlu1 %v1032_v25, %s2721_s28 }
 0x2ad   : > { %v964_v42 = vcombine.low %v908_v38, %v924_v39  ;;  %v996_v44 = vcombine.low %v940_v40, %v956_v41  ;;  %v965_v49 = vcombine.high %v908_v38, %v924_v39  ;;  %v997_v50 = vcombine.high %v940_v40, %v956_v41 }
 0x2af   : > { %v972_v46 = vrot.slane %v964_v42, %v2920_v43  ;;  %v1004_v47 = vrot.slane %v996_v44, %v2920_v43  ;;  %v979_v52 = vrot.slane %v965_v49, %v2920_v43  ;;  %v1011_v53 = vrot.slane %v997_v50, %v2920_v43 }
 0x2b0   : > { %1128 = vrot.lane.b32.xlu0 %v1035_v45, %s2720_s24  ;;  %1148 = vrot.lane.b32.xlu1 %v2942_v24, %s2721_s28 }
 0x2b1   : > { %v1028_v48 = vcombine.low %v972_v46, %v1004_v47  ;;  %v1029_v51 = vcombine.high %v972_v46, %v1004_v47  ;;  %v1030_v54 = vcombine.low %v979_v52, %v1011_v53  ;;  %v2967_v55 = vcombine.high %v979_v52, %v1011_v53 }
 0x2b3   : > { %v1171_v25 = vmul.f32 %v1104_v59, %v1028_v48  ;;  %v1172_v32 = vmul.f32 %v1104_v59, %v1029_v51  ;;  %v1173_v39 = vmul.f32 %v1104_v59, %v1030_v54  ;;  %v1174_v47 = vmul.f32 %v1104_v59, %v2967_v55 }
 0x2b4   : > { %1150 = vrot.lane.b32.xlu1 %v1034_v36, %s2721_s28  ;;  %1114 = vrot.lane.b32.xlu0 %v1028_v48, %s2720_s24 }
 0x2b8   : > { %1152 = vrot.lane.b32.xlu1 %v1035_v45, %s2721_s28  ;;  %1116 = vrot.lane.b32.xlu0 %v1029_v51, %s2720_s24 }
 0x2bc   : > { %1138 = vrot.lane.b32.xlu1 %v1028_v48, %s2721_s28  ;;  %1118 = vrot.lane.b32.xlu0 %v1030_v54, %s2720_s24 }
 0x2c0   : > { %1140 = vrot.lane.b32.xlu1 %v1029_v51, %s2721_s28  ;;  %1120 = vrot.lane.b32.xlu0 %v2967_v55, %s2720_s24  ;;  %s2724_s24 = smov 48  }
 0x2c4   : > { %1142 = vrot.lane.b32.xlu1 %v1030_v54, %s2721_s28 }
 0x2c8   : > { %1144 = vrot.lane.b32.xlu1 %v2967_v55, %s2721_s28  ;;  %s2725_s28 = smov 40  }
 0x31a   : > { %v1125_v56 = vpop.permute.xlu0 %1124  ;;  %v1123_v57 = vpop.permute.xlu1 %1122 }
 0x31e   : > { %v1127_v60 = vpop.permute.xlu0 %1126  ;;  %v1147_v61 = vpop.permute.xlu1 %1146 }
 0x31f   : > { %v1167_v62 = vsel %vm1162_vm2, %v1123_v57, %v1147_v61 }
 0x320   : > { %v1183_v63 = vmul.f32 %v1167_v62, %v1105_v58 }
 0x322   : > { %v1129_v2 = vpop.permute.xlu0 %1128  ;;  %v1149_v3 = vpop.permute.xlu1 %1148  ;;  %v1191_v4 = vadd.f32 %v1183_v63, %v1175_v1 }
 0x323   : > { %v1168_v5 = vsel %vm1162_vm2, %v1125_v56, %v1149_v3 }
 0x324   : > { %v1184_v6 = vmul.f32 %v1168_v5, %v1105_v58  ;;  %1204 = vxpose.xlu0.b32.start.end [1/1] (short) (narrow) %v1191_v4, 8 }
 0x326   : > { %v1151_v9 = vpop.permute.xlu1 %1150  ;;  %v1192_v10 = vadd.f32 %v1184_v6, %v1176_v7  ;;  %v1115_v12 = vpop.permute.xlu0 %1114 }
 0x327   : > { %v1169_v11 = vsel %vm1162_vm2, %v1127_v60, %v1151_v9 }
 0x328   : > { %v1185_v13 = vmul.f32 %v1169_v11, %v1105_v58  ;;  %1238 = vxpose.xlu1.b32.start.end [1/1] (short) (narrow) %v1192_v10, 8 }
 0x32a   : > { %v1153_v15 = vpop.permute.xlu1 %1152  ;;  %v1193_v16 = vadd.f32 %v1185_v13, %v1177_v14  ;;  %v1117_v20 = vpop.permute.xlu0 %1116 }
 0x32b   : > { %v1170_v17 = vsel %vm1162_vm2, %v1129_v2, %v1153_v15 }
 0x32c   : > { %v1186_v18 = vmul.f32 %v1170_v17, %v1105_v58  ;;  %1273 = vxpose.xlu0.b32.start.end [1/1] (short) (narrow) %v1193_v16, 8 }
 0x32e   : > { %v1139_v21 = vpop.permute.xlu1 %1138  ;;  %v1194_v23 = vadd.f32 %v1186_v18, %v1178_v19  ;;  %v1119_v30 = vpop.permute.xlu0 %1118 }
 0x32f   : > { %v1163_v24 = vsel %vm1162_vm2, %v1115_v12, %v1139_v21 }
 0x330   : > { %v1179_v26 = vmul.f32 %v1163_v24, %v1105_v58  ;;  %1308 = vxpose.xlu0.b32.start.end [1/1] (short) (narrow) %v1194_v23, 8 }
 0x332   : > { %v1187_v27 = vadd.f32 %v1179_v26, %v1171_v25  ;;  %v1141_v28 = vpop.permute.xlu1 %1140  ;;  %v1121_v41 = vpop.permute.xlu0 %1120 }
 0x333   : > { %v1164_v29 = vsel %vm1162_vm2, %v1117_v20, %v1141_v28 }
 0x334   : > { %v1195_v31 = vpack.c.bf16 %v1187_v27, %v1187_v27  ;;  %v1180_v33 = vmul.f32 %v1164_v29, %v1105_v58 }
 0x336   : > { %1200 = vst.msk [vmem:[#allocation2] sm:$0xf] %vm1199_vm3, %v1195_v31  ;;  %v1188_v34 = vadd.f32 %v1180_v33, %v1172_v32  ;;  %v1143_v35 = vpop.permute.xlu1 %1142 }
 0x337   : > { %v1165_v36 = vsel %vm1162_vm2, %v1119_v30, %v1143_v35 }
 0x338   : > { %v1196_v38 = vpack.c.bf16 %v1188_v34, %v1188_v34  ;;  %v1181_v40 = vmul.f32 %v1165_v36, %v1105_v58 }
 0x33a   : > { %1201 = vst.msk [vmem:[#allocation2 + $0x4] sm:$0xf] %vm1199_vm3, %v1196_v38  ;;  %v1189_v42 = vadd.f32 %v1181_v40, %v1173_v39  ;;  %v1145_v44 = vpop.permute.xlu1 %1144 }
 0x33b   : > { %v1166_v45 = vsel %vm1162_vm2, %v1121_v41, %v1145_v44 }
 0x33c   : > { %v1197_v46 = vpack.c.bf16 %v1189_v42, %v1189_v42  ;;  %v1182_v48 = vmul.f32 %v1166_v45, %v1105_v58 }
 0x33d   : > { %v1358_v61 = vld [vmem:[#allocation2] sm:$0xf] }
 0x33e   : > { %1202 = vst.msk [vmem:[#allocation2 + $0x8] sm:$0xf] %vm1199_vm3, %v1197_v46  ;;  %v1190_v49 = vadd.f32 %v1182_v48, %v1174_v47 }
 0x340   : > { %v1198_v50 = vpack.c.bf16 %v1190_v49, %v1190_v49 }
 0x341   : > { %v1359_v3 = vld [vmem:[#allocation2 + $0x4] sm:$0xf] }
 0x342   : > { %1203 = vst.msk [vmem:[#allocation2 + $0xc] sm:$0xf] %vm1199_vm3, %v1198_v50 }
 0x345   : > { %v1360_v7 = vld [vmem:[#allocation2 + $0x8] sm:$0xf] }
 0x349   : > { %v1361_v6 = vld [vmem:[#allocation2 + $0xc] sm:$0xf] }
 0x3a0   : > { %v1220_v51 = vpop.trf.xlu0 }
 0x3a1   : > { %v1236_v52 = vpack.c.bf16 %v1220_v51, %v1220_v51 }
 0x3a3   : > { %1237 = vst.msk [vmem:[#allocation3] sm:$0xf] %vm1199_vm3, %v1236_v52 }
 0x3a4   : > { %v1254_v53 = vpop.trf.xlu1 }
 0x3a5   : > { %v1270_v54 = vpack.c.bf16 %v1254_v53, %v1254_v53 }
 0x3a7   : > { %1272 = vst.msk [vmem:[#allocation3 + $0x4] sm:$0xf] %vm1199_vm3, %v1270_v54 }
 0x3a8   : > { %v1289_v56 = vpop.trf.xlu0 }
 0x3a9   : > { %v1305_v57 = vpack.c.bf16 %v1289_v56, %v1289_v56 }
 0x3aa   : > { %v1362_v60 = vld [vmem:[#allocation3] sm:$0xf] }
 0x3ab   : > { %1307 = vst.msk [vmem:[#allocation3 + $0x8] sm:$0xf] %vm1199_vm3, %v1305_v57  ;;  %v1372_v55 = vsel %vm1370_vm4, %v1362_v60, 0 }
 0x3ac   : > { %2426 = vmatpush3.bf16.msra.mxu0 %v1372_v55  ;;  %v1324_v58 = vpop.trf.xlu0 }
 0x3ad   : > { %v1340_v59 = vpack.c.bf16 %v1324_v58, %v1324_v58  ;;  %2431 = vmatprep.subr.bf16.mxu0 %v2709_v8 }
 0x3ae   : > { %v1363_v62 = vld [vmem:[#allocation3 + $0x4] sm:$0xf] }
 0x3af   : > { %1342 = vst.msk [vmem:[#allocation3 + $0xc] sm:$0xf] %vm1199_vm3, %v1340_v59  ;;  %2428 = vmatmul.mubr.msk.bf16.vlgmr.msra.gmra.mxu0 %vm1366_vm5, %v1358_v61  ;;  %v1418_v63 = vsel %vm1370_vm4, %v1363_v62, 0 }
 0x3b0   : > { %2432 = vmatpush3.bf16.msra.mxu0 %v1418_v63  ;;  %2433 = vmatprep.mubr.msk.bf16.mxu0 %vm2710_vm1, %v2709_v8 }
 0x3b1   : > { %2437 = vmatprep.subr.bf16.mxu0 %v2709_v8 }
 0x3b2   : > { %v1364_v1 = vld [vmem:[#allocation3 + $0x8] sm:$0xf] }
 0x3b3   : > { %v1464_v2 = vsel %vm1370_vm4, %v1364_v1, 0 }
 0x3b6   : > { %v1365_v4 = vld [vmem:[#allocation3 + $0xc] sm:$0xf] }
 0x3b7   : > { %2434 = vmatmul.mubr.msk.bf16.vlgmr.msra.gmra.mxu0 %vm1366_vm5, %v1359_v3  ;;  %v1510_v5 = vsel %vm1370_vm4, %v1365_v4, 0 }
 0x3b8   : > { %2444 = vmatpush3.bf16.msra.mxu1 %v1510_v5  ;;  %2438 = vmatpush3.bf16.msra.mxu0 %v1464_v2 }
 0x3b9   : > { %2439 = vmatprep.mubr.msk.bf16.mxu0 %vm2710_vm1, %v2709_v8  ;;  %2449 = vmatprep.subr.bf16.mxu0 %v2709_v8 }
 0x3ba   : > { %2455 = vmatprep.subr.bf16.mxu1 %v2709_v8 }
 0x3bb   : > { %2446 = vmatmul.mubr.msk.bf16.vlgmr.msra.gmra.mxu1 %vm1366_vm5, %v1361_v6 }
 0x3bc   : > { %2457 = vmatprep.mubr.msk.bf16.mxu1 %vm2710_vm1, %v2709_v8 }
 0x3bf   : > { %2440 = vmatmul.mubr.msk.bf16.vlgmr.msra.gmra.mxu0 %vm1366_vm5, %v1360_v7 }
 0x3c0   : > { %2451 = vmatprep.mubr.msk.bf16.mxu0 %vm2710_vm1, %v2709_v8 }
 0x46f   : > { %v1408_v9 = vpop.f32.mrf.mxu0 }
 0x470   : > { %v1552_v10 = vsel %vm1366_vm5, %v1408_v9, -inf }
 0x471   : > { %1553 = vmax.xlane.f32.xlu0 %v1552_v10  ;;  %v2429_v11 = vpop.f32.mrf.mxu0 }
 0x473   : > { %v1411_v12 = vpop.f32.mrf.mxu0 }
 0x475   : > { %v2430_v13 = vpop.f32.mrf.mxu0 }
 0x477   : > { %v1454_v14 = vpop.f32.mrf.mxu0 }
 0x478   : > { %v1555_v15 = vsel %vm1366_vm5, %v1454_v14, -inf }
 0x479   : > { %1556 = vmax.xlane.f32.xlu1 %v1555_v15  ;;  %v2435_v16 = vpop.f32.mrf.mxu0 }
 0x47b   : > { %v1457_v17 = vpop.f32.mrf.mxu0  ;;  %v1546_v18 = vpop.f32.mrf.mxu1 }
 0x47c   : > { %v1561_v19 = vsel %vm1366_vm5, %v1546_v18, -inf }
 0x47d   : > { %v2447_v20 = vpop.f32.mrf.mxu1  ;;  %1562 = vmax.xlane.f32.xlu0 %v1561_v19  ;;  %v2436_v21 = vpop.f32.mrf.mxu0 }
 0x47f   : > { %v1500_v23 = vpop.f32.mrf.mxu0  ;;  %v1549_v24 = vpop.f32.mrf.mxu1 }
 0x480   : > { %v1558_v25 = vsel %vm1366_vm5, %v1500_v23, -inf }
 0x481   : > { %v2448_v26 = vpop.f32.mrf.mxu1  ;;  %1559 = vmax.xlane.f32.xlu1 %v1558_v25  ;;  %v2441_v27 = vpop.f32.mrf.mxu0 }
 0x483   : > { %v1503_v28 = vpop.f32.mrf.mxu0 }
 0x485   : > { %v2442_v29 = vpop.f32.mrf.mxu0 }
 0x492   : > { %684 = vrot.lane.b32.xlu1 %v2909_v22, %s2722_s19  ;;  %s2375_s19 = sshll.u32 %s2699_s27, 7  ;;  %s2726_s27 = smov [#allocation5]  }
 0x493   : > { %687 = vrot.lane.b32.xlu0 %v2909_v22, %s2723_s20  ;;  %s3189_s18 = scalar_lea.hbm %s3247_s17, %s2375_s19 }
 0x496   : > { %690 = vrot.lane.b32.xlu1 %v2909_v22, %s2724_s24  ;;  %s551_s24 = sand.u32 1, %s2691_s25  }
 0x497   : > { %s2232_s23 = scalar_lea.sflag [#allocation6], %s551_s24 }
 0x49a   : > { %693 = vrot.lane.b32.xlu1 %v2909_v22, %s2725_s28  ;;  %s2323_s28 = sshll.u32 %s551_s24, 3 }
 0x49b   : > { %s553_s20 = scalar_lea.vmem [#allocation5], %s2323_s28  ;;  %s2635_s28 = sshll.u32 %s2726_s27, 4  ;;  %s2636_s28 = int_to_ptr.vmem [resolvable:$false] %s2635_s28 }
 0x49c   : > { %s2246_s2 = sshll.u32 %s553_s20, 4  ;;  %s2637_s30 = scalar_lea.vmem %s2636_s28, 256  ;;  %s2247_s2 = int_to_ptr.vmem [resolvable:$true] %s2246_s2 }
 0x49d   : > { %s2631_s0 = scalar_lea.vmem %s2247_s2, 128  ;;  %p2638_p1 = scmp.lt.s32.totalorder %s2247_s2, %s2636_s28 }
 0x49e   : > { %p2632_p12 = scmp.ne.s32.totalorder %s2247_s2, %s2631_s0  ;;  %p2639_p2 = scmp.lt.s32.totalorder %s2637_s30, %s2631_s0 }
 0x4a0   : > { %p2633_p13 = pnand %p2632_p12, %p2857_p4  ;;  %p2640_p3 = por %p2639_p2, %p2638_p1 }
 0x4a2   : > { %p2634_p0 = pneg %p2633_p13 }
 0x4a4   : > { %p2641_p5 = pnand %p2640_p3, %p2634_p0 }
 0x4fa   : > { %v1554_v30 = vpop.xlane.xlu0 %1553 }
 0x4fb   : > { %v1564_v31 = vsub.f32 %v1408_v9, %v1554_v30 }
 0x4fd   : > { %v1568_v32 = vmul.f32 1.442695, %v1564_v31 }
 0x4ff   : > { %2611 = vpow2.f32 %v1568_v32 }
 0x502   : > { %v1557_v33 = vpop.xlane.xlu1 %1556 }
 0x503   : > { %v1565_v34 = vsub.f32 %v1454_v14, %v1557_v33 }
 0x505   : > { %v1570_v35 = vmul.f32 1.442695, %v1565_v34 }
 0x506   : > { %v1563_v36 = vpop.xlane.xlu0 %1562 }
 0x507   : > { %2613 = vpow2.f32 %v1570_v35  ;;  %v1567_v38 = vsub.f32 %v1546_v18, %v1563_v36 }
 0x509   : > { %v1574_v45 = vmul.f32 1.442695, %v1567_v38 }
 0x50a   : > { %v1560_v39 = vpop.xlane.xlu1 %1559  ;;  %v688_v51 = vpop.permute.xlu0 %687 }
 0x50b   : > { %v1566_v40 = vsub.f32 %v1500_v23, %v1560_v39 }
 0x50c   : > { %v3024_v41 = vpop.eup %2611 }
 0x50d   : > { %v1572_v42 = vmul.f32 1.442695, %v1566_v40  ;;  %v1576_v44 = vsel %vm1366_vm5, %v3024_v41, 0.0 }
 0x50e   : > { %1577 = vadd.xlane.f32.xlu0 %v1576_v44  ;;  %v685_v22 = vpop.permute.xlu1 %684 }
 0x50f   : > { %2615 = vpow2.f32 %v1572_v42 }
 0x510   : > { %2617 = vpow2.f32 %v1574_v45 }
 0x512   : > { %v691_v46 = vpop.permute.xlu1 %690 }
 0x513   : > { %v832_v48 = vcombine.low %v685_v22, %v691_v46  ;;  %v833_v49 = vcombine.high %v685_v22, %v691_v46 }
 0x514   : > { %v3028_v47 = vpop.eup %2613 }
 0x515   : > { %v1579_v50 = vsel %vm1366_vm5, %v3028_v47, 0.0  ;;  %v840_v56 = vrot.slane %v832_v48, %v2918_v37  ;;  %v847_v57 = vrot.slane %v833_v49, %v2918_v37 }
 0x516   : > { %1580 = vadd.xlane.f32.xlu1 %v1579_v50  ;;  %v694_v52 = vpop.permute.xlu1 %693 }
 0x517   : > { %v848_v53 = vcombine.low %v688_v51, %v694_v52  ;;  %v849_v54 = vcombine.high %v688_v51, %v694_v52 }
 0x519   : > { %v856_v60 = vrot.slane %v848_v53, %v2918_v37  ;;  %v863_v55 = vrot.slane %v849_v54, %v2918_v37 }
 0x51b   : > { %v864_v58 = vcombine.low %v840_v56, %v856_v60  ;;  %v865_v59 = vcombine.high %v840_v56, %v856_v60  ;;  %v880_v61 = vcombine.low %v847_v57, %v863_v55  ;;  %v881_v62 = vcombine.high %v847_v57, %v863_v55  ;;  %v1792_v60 = vld [vmem:[%s3235_s5] sm:$0xf] }
 0x51c   : > { %v3036_v63 = vpop.eup %2615  ;;  %v1845_v55 = vsel %vm1370_vm4, %v1792_v60, 0 }
 0x51d   : > { %v872_v1 = vrot.slane %v864_v58, %v2920_v43  ;;  %v879_v2 = vrot.slane %v865_v59, %v2920_v43  ;;  %v888_v3 = vrot.slane %v880_v61, %v2920_v43  ;;  %v895_v4 = vrot.slane %v881_v62, %v2920_v43  ;;  %v3044_v6 = vpop.eup %2617  ;;  %v2349_v58 = vld [vmem:[%s3235_s5 + $0x4] sm:$0xf]  ;;  %v2354_v61 = vld [vmem:[%s3235_s5 + $0xc] sm:$0xf] }
 0x51e   : > { %v1582_v5 = vsel %vm1366_vm5, %v3036_v63, 0.0  ;;  %v1585_v16 = vsel %vm1366_vm5, %v3044_v6, 0.0  ;;  %v1799_v59 = vsel %vm1370_vm4, %v2349_v58, 0 }
 0x51f   : > { %v1036_v7 = vcombine.low %v872_v1, %v879_v2  ;;  %v2339_v9 = vcombine.high %v872_v1, %v879_v2  ;;  %v1052_v10 = vcombine.low %v888_v3, %v895_v4  ;;  %v2340_v11 = vcombine.high %v888_v3, %v895_v4  ;;  %1583 = vadd.xlane.f32.xlu0 %v1582_v5  ;;  %v2352_v5 = vld [vmem:[%s3235_s5 + $0x8] sm:$0xf] }
 0x520   : > { %v1942_v1 = vsel %vm1370_vm4, %v2354_v61, 0 }
 0x521   : > { %v1043_v12 = vrot.slane %v1036_v7, %v2918_v37  ;;  %v1051_v13 = vrot.slane %v2339_v9, %v2918_v37  ;;  %v1059_v14 = vrot.slane %v1052_v10, %v2918_v37  ;;  %v1067_v15 = vrot.slane %v2340_v11, %v2918_v37 }
 0x522   : > { %v1893_v9 = vsel %vm1370_vm4, %v2352_v5, 0  ;;  %v2605_v5 = vld [vmem:[%s3244_s14 + $0x18] sm:$0xff]  }
 0x523   : > { %v1068_v17 = vcombine.low %v1043_v12, %v1051_v13  ;;  %v1069_v18 = vcombine.high %v1043_v12, %v1051_v13  ;;  %v1084_v19 = vcombine.low %v1059_v14, %v1067_v15  ;;  %v1085_v20 = vcombine.high %v1059_v14, %v1067_v15  ;;  %1586 = vadd.xlane.f32.xlu0 %v1585_v16 }
 0x525   : > { %v1076_v21 = vrot.slane %v1068_v17, %v2920_v43  ;;  %v1083_v23 = vrot.slane %v1069_v18, %v2920_v43  ;;  %v1092_v24 = vrot.slane %v1084_v19, %v2920_v43  ;;  %v1099_v25 = vrot.slane %v1085_v20, %v2920_v43 }
 0x527   : > { %v1100_v26 = vcombine.low %v1076_v21, %v1092_v24  ;;  %v1101_v27 = vcombine.high %v1076_v21, %v1092_v24  ;;  %v1102_v28 = vcombine.low %v1083_v23, %v1099_v25  ;;  %v1103_v37 = vcombine.high %v1083_v23, %v1099_v25 }
 0x529   : > { %v1343_v29 = vpack.c.bf16 %v1100_v26, %v1100_v26  ;;  %v1344_v30 = vpack.c.bf16 %v1101_v27, %v1101_v27  ;;  %v1345_v31 = vpack.c.bf16 %v1102_v28, %v1102_v28  ;;  %v1346_v32 = vpack.c.bf16 %v1103_v37, %v1103_v37 }
 0x52b   : > { %1347 = vst.msk [vmem:[#allocation4] sm:$0xf] %vm1199_vm3, %v1343_v29  ;;  %1348 = vst.msk [vmem:[#allocation4 + $0x4] sm:$0xf] %vm1199_vm3, %v1344_v30 }
 0x52c   : > { %1349 = vst.msk [vmem:[#allocation4 + $0x8] sm:$0xf] %vm1199_vm3, %v1345_v31  ;;  %1350 = vst.msk [vmem:[#allocation4 + $0xc] sm:$0xf] %vm1199_vm3, %v1346_v32 }
 0x532   : > { %v1600_v33 = vld [vmem:[#allocation4] sm:$0xf]  ;;  %v1601_v34 = vld [vmem:[#allocation4 + $0x4] sm:$0xf] }
 0x533   : > { %v1608_v43 = vsel %vm1370_vm4, %v1600_v33, 0  ;;  %v1654_v35 = vsel %vm1370_vm4, %v1601_v34, 0  ;;  %v1602_v42 = vld [vmem:[#allocation4 + $0x8] sm:$0xf] }
 0x534   : > { %2450 = vmatpush3.bf16.msra.mxu0 %v1608_v43  ;;  %2456 = vmatpush3.bf16.msra.mxu1 %v1654_v35  ;;  %v1700_v22 = vsel %vm1370_vm4, %v1602_v42, 0 }
 0x535   : > { %2461 = vmatprep.subr.bf16.mxu0 %v2709_v8  ;;  %2467 = vmatprep.subr.bf16.mxu1 %v2709_v8 }
 0x597   : > { %v1578_v36 = vpop.xlane.xlu0 %1577 }
 0x598   : > { %2619 = vrcp.f32 %v1578_v36  ;;  %v2356_v36 = vld [vmem:[%s3236_s6] ss:$0 sm:$0xff] }
 0x59f   : > { %v1581_v38 = vpop.xlane.xlu1 %1580 }
 0x5a0   : > { %2621 = vrcp.f32 %v1581_v38 }
 0x5a5   : > { %v2620_v39 = vpop.eup %2619 }
 0x5a6   : > { %v1592_v40 = vmul.f32 %v2620_v39, %v3024_v41  ;;  %v1603_v41 = vld [vmem:[#allocation4 + $0xc] sm:$0xf]  ;;  %v2357_v39 = vld [vmem:[%s3239_s9] ss:$0 sm:$0xff] }
 0x5a7   : > { %v1746_v51 = vsel %vm1370_vm4, %v1603_v41, 0 }
 0x5a8   : > { %v1584_v44 = vpop.xlane.xlu0 %1583  ;;  %v1596_v45 = vpack.c.bf16 %v1592_v40, %v1592_v40 }
 0x5a9   : > { %2623 = vrcp.f32 %v1584_v44 }
 0x5aa   : > { %2452 = vmatmul.mubr.msk.bf16.vlgmr.msra.gmra.mxu0 %vm1366_vm5, %v1596_v45 }
 0x5ab   : > { %2462 = vmatpush3.bf16.msra.mxu0 %v1700_v22  ;;  %2463 = vmatprep.mubr.msk.bf16.mxu0 %vm2710_vm1, %v2709_v8 }
 0x5ac   : > { %v1587_v46 = vpop.xlane.xlu0 %1586  ;;  %2473 = vmatprep.subr.bf16.mxu0 %v2709_v8 }
 0x5ad   : > { %v2622_v48 = vpop.eup %2621  ;;  %2625 = vrcp.f32 %v1587_v46 }
 0x5ae   : > { %v1593_v49 = vmul.f32 %v2622_v48, %v3028_v47 }
 0x5b0   : > { %v1597_v50 = vpack.c.bf16 %v1593_v49, %v1593_v49 }
 0x5b2   : > { %2458 = vmatmul.mubr.msk.bf16.vlgmr.msra.gmra.mxu1 %vm1366_vm5, %v1597_v50 }
 0x5b3   : > { %2468 = vmatpush3.bf16.msra.mxu1 %v1746_v51  ;;  %2469 = vmatprep.mubr.msk.bf16.mxu1 %vm2710_vm1, %v2709_v8 }
 0x5b4   : > { %2479 = vmatprep.subr.bf16.mxu1 %v2709_v8 }
 0x5b6   : > { %v2624_v52 = vpop.eup %2623 }
 0x5b7   : > { %v1594_v53 = vmul.f32 %v2624_v52, %v3036_v63 }
 0x5b9   : > { %v1598_v54 = vpack.c.bf16 %v1594_v53, %v1594_v53 }
 0x5ba   : > { %v2626_v56 = vpop.eup %2625 }
 0x5bb   : > { %2464 = vmatmul.mubr.msk.bf16.vlgmr.msra.gmra.mxu0 %vm1366_vm5, %v1598_v54  ;;  %v1595_v47 = vmul.f32 %v2626_v56, %v3044_v6  ;;  %v2599_v54 = vld [vmem:[%s3242_s12 + $0x8] sm:$0xff]  }
 0x5bc   : > { %2475 = vmatprep.mubr.msk.bf16.mxu0 %vm2710_vm1, %v2709_v8  ;;  %2474 = vmatpush3.bf16.msra.mxu0 %v1799_v59  ;;  %v2359_v59 = vld [vmem:[%s3241_s11] ss:$0 sm:$0xff] }
 0x5bd   : > { %v1599_v57 = vpack.c.bf16 %v1595_v47, %v1595_v47  ;;  %2485 = vmatprep.subr.bf16.mxu0 %v2709_v8 }
 0x5bf   : > { %2470 = vmatmul.mubr.msk.bf16.vlgmr.msra.gmra.mxu1 %vm1366_vm5, %v1599_v57 }
 0x5c0   : > { %2481 = vmatprep.mubr.msk.bf16.mxu1 %vm2710_vm1, %v2709_v8  ;;  %2480 = vmatpush3.bf16.msra.mxu1 %v1845_v55  ;;  %v2358_v55 = vld [vmem:[%s3240_s10] ss:$0 sm:$0xff] }
 0x5c1   : > { %2491 = vmatprep.subr.bf16.mxu1 %v2709_v8 }
 0x66a   : > { %v1644_v62 = vpop.f32.mrf.mxu0 }
 0x66b   : > { %v1788_v63 = vpack.c.bf16 %v1644_v62, %v1644_v62 }
 0x66c   : > { %v2453_v2 = vpop.f32.mrf.mxu0 }
 0x66d   : > { %2482 = vmatmul.mubr.msk.bf16.vlgmr.msra.gmra.mxu1 %vm1366_vm5, %v1788_v63  ;;  %v2602_v2 = vld [vmem:[%s3244_s14 + $0x30] sm:$0xff]  }
 0x66e   : > { %v1647_v3 = vpop.f32.mrf.mxu0  ;;  %2492 = vmatpush3.bf16.msra.mxu1 %v1942_v1  ;;  %2493 = vmatprep.mubr.msk.bf16.mxu1 %vm2710_vm1, %v2709_v8  ;;  %v2601_v1 = vld [vmem:[%s3244_s14 + $0x38] sm:$0xff]  }
 0x66f   : > { %2505 = vmatprep.subr.bf16.mxu1 %v2709_v8  ;;  %v2603_v3 = vld [vmem:[%s3244_s14 + $0x28] sm:$0xff]  }
 0x670   : > { %v2454_v4 = vpop.f32.mrf.mxu0 }
 0x671   : > { %v2604_v4 = vld [vmem:[%s3244_s14 + $0x20] sm:$0xff]  }
 0x672   : > { %v1690_v6 = vpop.f32.mrf.mxu1 }
 0x673   : > { %v1789_v7 = vpack.c.bf16 %v1690_v6, %v1690_v6  ;;  %v2606_v6 = vld [vmem:[%s3244_s14 + $0x10] sm:$0xff]  }
 0x674   : > { %v2459_v10 = vpop.f32.mrf.mxu1 }
 0x675   : > { %2476 = vmatmul.mubr.msk.bf16.vlgmr.msra.gmra.mxu0 %vm1366_vm5, %v1789_v7  ;;  %v2607_v7 = vld [vmem:[%s3244_s14 + $0x8] sm:$0xff]   ;;  %v2360_v10 = vld [vmem:[%s3243_s13] ss:$0 sm:$0xff] }
 0x676   : > { %v1693_v11 = vpop.f32.mrf.mxu1  ;;  %2486 = vmatpush3.bf16.msra.mxu0 %v1893_v9  ;;  %2487 = vmatprep.mubr.msk.bf16.mxu0 %vm2710_vm1, %v2709_v8  ;;  %v2608_v9 = vld [vmem:[%s3244_s14] sm:$0xff]  }
 0x677   : > { %2497 = vmatprep.subr.bf16.mxu0 %v2709_v8 }
 0x678   : > { %v2460_v12 = vpop.f32.mrf.mxu1 }
 0x67b   : > { %v1736_v13 = vpop.f32.mrf.mxu0 }
 0x67c   : > { %v1790_v14 = vpack.c.bf16 %v1736_v13, %v1736_v13 }
 0x67d   : > { %v2465_v15 = vpop.f32.mrf.mxu0 }
 0x67e   : > { %2488 = vmatmul.mubr.msk.bf16.vlgmr.msra.gmra.mxu0 %vm1366_vm5, %v1790_v14 }
 0x67f   : > { %v1739_v16 = vpop.f32.mrf.mxu0  ;;  %v1782_v17 = vpop.f32.mrf.mxu1  ;;  %2501 = vmatprep.mubr.msk.bf16.mxu0 %vm2710_vm1, %v2709_v8  ;;  %2498 = vmatpush3.bf16.msra.mxu0 %v2599_v54 }
 0x680   : > { %v1791_v18 = vpack.c.bf16 %v1782_v17, %v1782_v17  ;;  %2499 = vmatprep.subr.bf16.mxu0 %v2709_v8 }
 0x681   : > { %v2466_v19 = vpop.f32.mrf.mxu0  ;;  %v2471_v20 = vpop.f32.mrf.mxu1 }
 0x682   : > { %2494 = vmatmul.mubr.msk.bf16.vlgmr.msra.gmra.mxu1 %vm1366_vm5, %v1791_v18 }
 0x683   : > { %v1785_v21 = vpop.f32.mrf.mxu1  ;;  %2521 = vmatprep.mubr.msk.bf16.mxu1 %vm2710_vm1, %v2709_v8  ;;  %2506 = vmatpush3.bf16.msra.mxu1 %v2601_v1 }
 0x684   : > { %2507 = vmatprep.subr.bf16.mxu1 %v2709_v8 }
 0x685   : > { %v2472_v23 = vpop.f32.mrf.mxu1 }
 0x687   : > { %2508 = vmatpush3.bf16.msra.mxu1 %v2602_v2 }
 0x688   : > { %2509 = vmatprep.subr.bf16.mxu1 %v2709_v8 }
 0x68b   : > { %2510 = vmatpush3.bf16.msra.mxu1 %v2603_v3 }
 0x68c   : > { %2511 = vmatprep.subr.bf16.mxu1 %v2709_v8 }
 0x68f   : > { %2512 = vmatpush3.bf16.msra.mxu1 %v2604_v4 }
 0x690   : > { %2513 = vmatprep.subr.bf16.mxu1 %v2709_v8 }
 0x693   : > { %2514 = vmatpush3.bf16.msra.mxu1 %v2605_v5 }
 0x694   : > { %2515 = vmatprep.subr.bf16.mxu1 %v2709_v8 }
 0x697   : > { %2516 = vmatpush3.bf16.msra.mxu1 %v2606_v6 }
 0x698   : > { %2517 = vmatprep.subr.bf16.mxu1 %v2709_v8 }
 0x69b   : > { %2518 = vmatpush3.bf16.msra.mxu1 %v2607_v7 }
 0x69c   : > { %2519 = vmatprep.subr.bf16.mxu1 %v2709_v8 }
 0x69f   : > { %2520 = vmatpush3.bf16.msra.mxu1 %v2608_v9 }
 0x72d   : > { %v1881_v24 = vpop.f32.mrf.mxu1 }
 0x72f   : > { %v2483_v25 = vpop.f32.mrf.mxu1 }
 0x731   : > { %v1884_v26 = vpop.f32.mrf.mxu1 }
 0x732   : > { %v2364_v26 = vld [vmem:[%s3245_s15] ss:$0 sm:$0xff] }
 0x733   : > { %v2484_v27 = vpop.f32.mrf.mxu1 }
 0x735   : > { %v1835_v28 = vpop.f32.mrf.mxu0 }
 0x736   : > { %v1882_v32 = vadd.f32 %v1881_v24, %v1835_v28  ;;  %v2373_v28 = vld [vmem:[%s3246_s16] ss:$0 sm:$0xff] }
 0x737   : > { %v2477_v37 = vpop.f32.mrf.mxu0 }
 0x739   : > { %v1838_v29 = vpop.f32.mrf.mxu0 }
 0x73b   : > { %v2478_v30 = vpop.f32.mrf.mxu0 }
 0x73e   : > { %v1929_v31 = vpop.f32.mrf.mxu0 }
 0x73f   : > { %v1935_v34 = vadd.f32 %v1929_v31, %v1882_v32 }
 0x740   : > { %v2489_v33 = vpop.f32.mrf.mxu0 }
 0x742   : > { %v1932_v43 = vpop.f32.mrf.mxu0  ;;  %v1978_v35 = vpop.f32.mrf.mxu1 }
 0x743   : > { %v1984_v38 = vadd.f32 %v1978_v35, %v1935_v34 }
 0x744   : > { %v2490_v40 = vpop.f32.mrf.mxu0  ;;  %v2495_v42 = vpop.f32.mrf.mxu1 }
 0x745   : > { %v1992_v44 = vadd.f32 %v2356_v36, %v1984_v38 }
 0x746   : > { %v1981_v45 = vpop.f32.mrf.mxu1 }
 0x747   : > { %v2000_v22 = vmul.f32 %v2357_v39, %v1992_v44 }
 0x748   : > { %v2496_v46 = vpop.f32.mrf.mxu1 }
 0x749   : > { %v3123_v48 = vadd.f32 %v2000_v22, %v2877_v0  ;;  %v2600_v0 = vld [vmem:[%s3242_s12] sm:$0xff]  }
 0x74a   : > { %2500 = vmatpush3.bf16.msra.mxu0 %v2600_v0 }
 0x74b   : > { %v2003_v49 = vsel %vm564_vm0, %v3123_v48, 0.0 }
 0x74c   : > { %2004 = vadd.xlane.f32.xlu1 %v2003_v49 }
 0x7d5   : > { %v2005_v41 = vpop.xlane.xlu1 %2004 }
 0x7d6   : > { %v2007_v50 = vmul.f32 0.03125, %v2005_v41 }
 0x7d8   : > { %v2008_v51 = vsub.f32 %v3123_v48, %v2007_v50 }
 0x7da   : > { %v2009_v52 = vmul.f32 %v2008_v51, %v2008_v51 }
 0x7dc   : > { %v2010_v53 = vsel %vm564_vm0, %v2009_v52, 0.0 }
 0x7dd   : > { %2011 = vadd.xlane.f32.xlu0 %v2010_v53 }
 0x866   : > { %v2012_v56 = vpop.xlane.xlu0 %2011 }
 0x867   : > { %v2013_v47 = vmul.f32 0.03125, %v2012_v56 }
 0x869   : > { %v2014_v57 = vadd.f32 1e-06, %v2013_v47 }
 0x86b   : > { %2627 = vrsqrt.f32 %v2014_v57 }
 0x878   : > { %v2628_v60 = vpop.eup %2627 }
 0x879   : > { %v2016_v58 = vmul.f32 %v2628_v60, %v2008_v51 }
 0x87b   : > { %v2024_v61 = vmul.f32 %v2358_v55, %v2016_v58 }
 0x87d   : > { %v2032_v62 = vadd.f32 %v2359_v59, %v2024_v61 }
 0x87f   : > { %v2033_v63 = vpack.c.bf16 %v2032_v62, %v2032_v62 }
 0x881   : > { %2502 = vmatmul.mubr.msk.bf16.vlgmr.msra.gmra.mxu0 %vm564_vm0, %v2033_v63 }
 0x941   : > { %v2094_v11 = vpop.f32.mrf.mxu0 }
 0x942   : > { %v2095_v12 = vadd.f32 %v2360_v10, %v2094_v11 }
 0x943   : > { %v2503_v13 = vpop.f32.mrf.mxu0 }
 0x944   : > { %v2101_v14 = vmul.f32 0.044715, %v2095_v12  ;;  %v2100_v8 = vmul.f32 0.5, %v2095_v12 }
 0x945   : > { %v2097_v15 = vpop.f32.mrf.mxu0 }
 0x946   : > { %v2102_v16 = vmul.f32 %v2101_v14, %v2095_v12 }
 0x947   : > { %v2504_v17 = vpop.f32.mrf.mxu0 }
 0x948   : > { %v2103_v18 = vmul.f32 %v2102_v16, %v2095_v12 }
 0x94a   : > { %v2104_v19 = vadd.f32 %v2103_v18, %v2095_v12 }
 0x94c   : > { %v2105_v20 = vmul.f32 0.7978846, %v2104_v19 }
 0x94e   : > { %2629 = vtanh.f32 %v2105_v20 }
 0x95b   : > { %v2630_v21 = vpop.eup %2629 }
 0x95c   : > { %v2107_v23 = vadd.f32 1.0, %v2630_v21 }
 0x95e   : > { %v2108_v24 = vmul.f32 %v2107_v23, %v2100_v8 }
 0x960   : > { %v2109_v25 = vpack.c.bf16 %v2108_v24, %v2108_v24 }
 0x962   : > { %2522 = vmatmul.mubr.bf16.vlgmr.msra.gmra.mxu1 %v2109_v25 }
 0xa22   : > { %v2215_v27 = vpop.f32.mrf.mxu1 }
 0xa23   : > { %v2216_v37 = vadd.f32 %v2364_v26, %v2215_v27 }
 0xa24   : > { %v2523_v29 = vpop.f32.mrf.mxu1 }
 0xa25   : > { %v2228_v30 = vmul.f32 %v2373_v28, %v2216_v37 }
 0xa26   : > { %v2218_v31 = vpop.f32.mrf.mxu1 }
 0xa27   : > { %v2229_v32 = vadd.f32 %v2228_v30, %v3123_v48 }
 0xa28   : > { %v2524_v33 = vpop.f32.mrf.mxu1 }
 0xa29   : > { %2230 = vst.msk [vmem:[%s553_s20] sm:$0xff] %vm564_vm0, %v2229_v32 }
 0xa2a   : > { %2644 = shalt.err (!%p2641_p5)
}
 0xa2b   : > { %s2645_s3 = scalar_lea.hbm %s3189_s18, 128  ;;  %s2649_s19 = scalar_lea.hbm %s3247_s17, 256 }
 0xa2c   : > { %p2646_p6 = scmp.ne.s32.totalorder %s3189_s18, %s2645_s3  ;;  %p2650_p10 = scmp.lt.s32.totalorder %s3189_s18, %s3247_s17 }
 0xa2d   : > { %p2651_p11 = scmp.lt.s32.totalorder %s2649_s19, %s2645_s3 }
 0xa2e   : > { %p2647_p7 = pnand %p2646_p6, %p2857_p4 }
 0xa2f   : > { %p2652_p12 = por %p2651_p11, %p2650_p10 }
 0xa30   : > { %p2648_p9 = pneg %p2647_p7 }
 0xa32   : > { %p2653_p13 = pnand %p2652_p12, %p2648_p9 }
 0xa34   : > { %2656 = shalt.err (!%p2653_p13)
}
 0xa35   : > { %2525 = dma.vmem_to_hbm [thread:$0]  (%p2857_p4), %s2247_s2, 128, %s3189_s18, %s2232_s23  }
 0xa36 PF: > { %s3266_s0 = sld [smem:[#allocation8_spill]]  ;;  %p2531_p0 = scmp.ge.s32.totalorder %s2707_s29, 2 }
 0xa38   : > { %p2528_p1 = pnand %p2531_p0, %p2864_p8 }
 0xa3a   : > { %p2529_p2 = pneg %p2528_p1 }
 0xa3c   : > { %s2258_s28 = sand.u32 1, %s3266_s0  }
 0xa3d   : > { %s2259_s30 = scalar_lea.sflag [#allocation6], %s2258_s28 }
 0xa3e   : > { %2682 = dma.done.wait (%p2529_p2), %s2259_s30, 128  }
 0xa3f   : > { %2684 = vsyncadd (%p2529_p2), %s2259_s30, 4294967168  ;;  %s30_s29 = sadd.s32 1, %s2707_s29   ;;  %s3267_s27 = sld [smem:[#allocation9_spill]] }
 0xa40   : > { %p27_p3 = scmp.ge.s32.totalorder %s30_s29, 4   ;;  %s3268_s28 = sld [smem:[#allocation10_spill]] }
 0xa41   : > { %s3269_s24 = smov %s2691_s25  ;;  %s3270_s25 = smov %s2695_s26 }
 0xa42   : > { %s3271_s26 = smov %s2870_s22  ;;  %29 = sbr.rel (!%p27_p3) target bundleno = 10 (0xa), region = 135 }
 0xa47   :  { %2264 = vsyncpa [#allocation6], 1 }
 0xa48   :  { %2266 = vsyncpa [#allocation6 + $0x1], 1 }

</bundles_post_ra>
